<compile_context>
chip_gen: v5e
topology: v5e:2x2
jax: 0.10.0
libtpu: 0.0.40
codegen_flags: <defaults>
</compile_context>

<pallas_src>
import functools

import jax
import jax.numpy as jnp
from jax.experimental import pallas as pl
from jax.experimental.pallas import tpu as pltpu


# Fixed by the PyTorch module (3x32x32 input -> 16*5*5 = 400 FC features).
K5 = 5
C0, C1, C2 = 3, 6, 16
NCLS = 10
W_IN = 32
W_C1 = W_IN - K5 + 1          # 28: conv1 valid output width
P1 = W_C1 * W_C1              # 784: conv1 output positions per image

# Scratch widths in 28x28-grid *positions*, chosen so every shifted read stays
# in bounds and every position a valid downstream output consumes is valid:
#   valid conv2 outputs live at positions <= 2*(9*28+9) = 522  -> W2  >= 523
#   conv2 strip build reads pool1 at <= (W2-1) + 2*(4*28+4)    -> WM1 >= W2+232
#   pool1 reads conv1 output at      <= (WM1-1) + 29           -> WY1 >= WM1+29
W2 = 528
WM1 = 768
WY1 = 800


def _convnet_kernel(x1_ref, w1_ref, b1_ref, w2_ref, b2_ref, wf_ref, bf_ref,
                    out_ref, y1_ref, m1_ref, s2_ref, y2_ref, f_ref, *, bb):
    n1 = WM1 * bb
    n2 = W2 * bb

    # ---- layer 1: conv1 as ONE matmul over the prebuilt im2col strip,
    #      + bias + ReLU (K = 75 folded into the MXU contraction). ----
    y1_ref[...] = jnp.maximum(
        jnp.dot(w1_ref[...], x1_ref[...],
                preferred_element_type=jnp.float32) + b1_ref[...], 0.0)

    # ---- pool1: 2x2/2 max as the max of 4 lane-shifted reads; results stay at
    #      each window's top-left position on the 28-grid (implicit stride-2
    #      grid, no compaction needed downstream). ----
    m1_ref[...] = jnp.maximum(
        jnp.maximum(y1_ref[:, pl.ds(0, n1)],
                    y1_ref[:, pl.ds(bb, n1)]),
        jnp.maximum(y1_ref[:, pl.ds(W_C1 * bb, n1)],
                    y1_ref[:, pl.ds((W_C1 + 1) * bb, n1)]))

    # ---- conv2 im2col strip: each shifted row-block written exactly once.
    #      Rows are tap-major / channel-minor (t*6 + c), matching w2_ref. ----
    for t in range(K5 * K5):
        kh, kw = divmod(t, K5)
        off = 2 * (kh * W_C1 + kw) * bb          # stride-2 grid => 2x shifts
        s2_ref[pl.ds(t * C1, C1), :] = m1_ref[:, pl.ds(off, n2)]

    # ---- layer 2: conv2 as ONE matmul (K = 150), + bias + ReLU. ----
    y2_ref[...] = jnp.maximum(
        jnp.dot(w2_ref[...], s2_ref[...],
                preferred_element_type=jnp.float32) + b2_ref[...], 0.0)

    # ---- pool2 fused with the FC feature gather: for each of the 25 pooled
    #      positions, max the 2x2 window (stride-4 grid) and drop the (16, bb)
    #      block straight into the FC strip (rows t*16 + ch). ----
    for t in range(K5 * K5):
        i, j = divmod(t, K5)
        p = 4 * (i * W_C1 + j) * bb
        blk = jnp.maximum(
            jnp.maximum(y2_ref[:, pl.ds(p, bb)],
                        y2_ref[:, pl.ds(p + 2 * bb, bb)]),
            jnp.maximum(y2_ref[:, pl.ds(p + 2 * W_C1 * bb, bb)],
                        y2_ref[:, pl.ds(p + (2 * W_C1 + 2) * bb, bb)]))
        f_ref[pl.ds(t * C2, C2), :] = blk

    # ---- fc: ONE (10, 400) @ (400, bb) matmul + bias, one store. ----
    out_ref[...] = jnp.dot(wf_ref[...], f_ref[...],
                           preferred_element_type=jnp.float32) + bf_ref[...]


@jax.jit
def convnet_forward(x, params):
    """x: (B, 3, 32, 32) float32 NCHW.  Returns (B, 10) logits."""
    w1, b1, w2, b2, wf, bf = params
    B = x.shape[0]

    # Per-grid-step batch block (cap keeps scratch well under v5e's 16 MiB
    # default scoped VMEM and v7x's 64 MiB physical VMEM).
    bb = B if B <= 8 else 8
    if B % bb:
        bb = B   # TODO(synk): pad ragged batches to a multiple of the block.
    nb = B // bb

    # ---- one-time (trace-time) layout prep ----
    # conv1 im2col strip: rows tap-major/channel-minor (t*3 + c), columns
    # position-major/batch-minor ((r*28+c)*bb + b) per batch block; zero-padded
    # on positions [784, WY1) so the kernel's padded width is deterministic.
    xb = x.reshape(nb, bb, C0, W_IN, W_IN)
    taps = [xb[:, :, :, kh:kh + W_C1, kw:kw + W_C1]
            for kh in range(K5) for kw in range(K5)]
    xs = jnp.stack(taps, axis=2)                    # (nb, bb, 25, C0, 28, 28)
    xs = jnp.transpose(xs, (0, 2, 3, 4, 5, 1))      # (nb, 25, C0, 28, 28, bb)
    x1 = xs.reshape(nb, K5 * K5 * C0, P1 * bb)
    x1 = jnp.pad(x1, ((0, 0), (0, 0), (0, (WY1 - P1) * bb)))

    # Weight/bias re-layouts matching the strip row orders (trace time, tiny).
    w1r = jnp.transpose(w1, (0, 2, 3, 1)).reshape(C1, K5 * K5 * C0)    # (6,75)
    w2r = jnp.transpose(w2, (0, 2, 3, 1)).reshape(C2, K5 * K5 * C1)    # (16,150)
    wfr = wf.reshape(NCLS, C2, K5 * K5).transpose(0, 2, 1) \
            .reshape(NCLS, K5 * K5 * C2)                               # (10,400)
    b1c = b1.reshape(C1, 1)
    b2c = b2.reshape(C2, 1)
    bfc = bf.reshape(NCLS, 1)

    flops = 2 * B * (C1 * K5 * K5 * C0 * WY1 + C2 * K5 * K5 * C1 * W2
                     + NCLS * K5 * K5 * C2)
    bytes_accessed = 4 * (x1.size + w1r.size + w2r.size + wfr.size
                          + b1c.size + b2c.size + bfc.size + NCLS * B)

    out = pl.pallas_call(
        functools.partial(_convnet_kernel, bb=bb),
        out_shape=jax.ShapeDtypeStruct((nb, NCLS, bb), jnp.float32),
        grid_spec=pltpu.PrefetchScalarGridSpec(
            num_scalar_prefetch=0,
            grid=(nb,),
            in_specs=[
                pl.BlockSpec((None, K5 * K5 * C0, WY1 * bb),
                             lambda i: (i, 0, 0)),                # im2col strip
                pl.BlockSpec((C1, K5 * K5 * C0), lambda i: (0, 0)),   # w1
                pl.BlockSpec((C1, 1), lambda i: (0, 0)),              # b1
                pl.BlockSpec((C2, K5 * K5 * C1), lambda i: (0, 0)),   # w2
                pl.BlockSpec((C2, 1), lambda i: (0, 0)),              # b2
                pl.BlockSpec((NCLS, K5 * K5 * C2), lambda i: (0, 0)), # fc w
                pl.BlockSpec((NCLS, 1), lambda i: (0, 0)),            # fc b
            ],
            out_specs=pl.BlockSpec((None, NCLS, bb), lambda i: (i, 0, 0)),
            scratch_shapes=[
                pltpu.VMEM((C1, WY1 * bb), jnp.float32),            # conv1 out
                pltpu.VMEM((C1, WM1 * bb), jnp.float32),            # pool1 out
                pltpu.VMEM((K5 * K5 * C1, W2 * bb), jnp.float32),   # conv2 strip
                pltpu.VMEM((C2, W2 * bb), jnp.float32),             # conv2 out
                pltpu.VMEM((K5 * K5 * C2, bb), jnp.float32),        # fc features
            ],
        ),
        compiler_params=pltpu.CompilerParams(
            dimension_semantics=("parallel",)),
        cost_estimate=pl.CostEstimate(flops=flops, transcendentals=0,
                                      bytes_accessed=bytes_accessed),
    )(x1, w1r, b1c, w2r, b2c, wfr, bfc)

    return jnp.transpose(out, (0, 2, 1)).reshape(B, NCLS)


# ---------------------------------------------------------------------------
# Pure-JAX reference (correctness check only).
# ---------------------------------------------------------------------------
def reference_forward(x, params):
    w1, b1, w2, b2, wf, bf = params

    def conv(t, w, b):
        y = jax.lax.conv_general_dilated(
            t, w, (1, 1), "VALID", dimension_numbers=("NCHW", "OIHW", "NCHW"),
            precision=jax.lax.Precision.HIGHEST)
        return y + b[None, :, None, None]

    def pool(t):
        return jax.lax.reduce_window(
            t, -jnp.inf, jax.lax.max, (1, 1, 2, 2), (1, 1, 2, 2), "VALID")

    y = pool(jax.nn.relu(conv(x, w1, b1)))
    y = pool(jax.nn.relu(conv(y, w2, b2)))
    y = y.reshape(y.shape[0], -1)
    return jnp.dot(y, wf.T, precision=jax.lax.Precision.HIGHEST) + bf


if __name__ == "__main__":
    key = jax.random.PRNGKey(0)
    k1, k2, k3, k4, k5, k6, kx = jax.random.split(key, 7)

    # Deterministic synthetic parameters (shapes from ConvNet.__init__).
    params = (
        jax.random.normal(k1, (6, 3, 5, 5), jnp.float32) * 0.1,    # conv1 w
        jax.random.normal(k2, (6,), jnp.float32) * 0.1,            # conv1 b
        jax.random.normal(k3, (16, 6, 5, 5), jnp.float32) * 0.1,   # conv2 w
        jax.random.normal(k4, (16,), jnp.float32) * 0.1,           # conv2 b
        jax.random.normal(k5, (10, 400), jnp.float32) * 0.05,      # fc w
        jax.random.normal(k6, (10,), jnp.float32) * 0.05,          # fc b
    )

    # Input must be 3x32x32 so the flattened feature size is 5*5*16 = 400.
    x = jax.random.normal(kx, (2, 3, 32, 32), jnp.float32)

    out = jax.block_until_ready(convnet_forward(x, params))
    ref = jax.block_until_ready(reference_forward(x, params))

    assert out.shape == (2, 10), out.shape
    assert jnp.allclose(out, ref, rtol=1e-4, atol=1e-4), (out, ref)

    print("KERNEL_OK")
</pallas_src>

<mosaic_0001>
module attributes {stable_mosaic.version = 11 : i64} {
  func.func @_convnet_kernel(%arg0: i32, %arg1: memref<1x75x1600xf32, #tpu.memory_space<vmem>>, %arg2: memref<6x75xf32, #tpu.memory_space<vmem>>, %arg3: memref<6x1xf32, #tpu.memory_space<vmem>>, %arg4: memref<16x150xf32, #tpu.memory_space<vmem>>, %arg5: memref<16x1xf32, #tpu.memory_space<vmem>>, %arg6: memref<10x400xf32, #tpu.memory_space<vmem>>, %arg7: memref<10x1xf32, #tpu.memory_space<vmem>>, %arg8: memref<1x10x2xf32, #tpu.memory_space<vmem>>, %arg9: memref<6x1600xf32, #tpu.memory_space<vmem>>, %arg10: memref<6x1536xf32, #tpu.memory_space<vmem>>, %arg11: memref<150x1056xf32, #tpu.memory_space<vmem>>, %arg12: memref<16x1056xf32, #tpu.memory_space<vmem>>, %arg13: memref<400x2xf32, #tpu.memory_space<vmem>>) attributes {dimension_semantics = [#tpu.dimension_semantics<parallel>], iteration_bounds = array<i64: 1>, scalar_prefetch = 0 : i64, scratch_operands = 5 : i64, tpu.core_type = #tpu.core_type<tc>, window_params = [{transform_indices = @transform_0, window_bounds = array<i64: 1, 75, 1600>}, {pipeline_mode = #tpu.pipeline_mode<synchronous>, transform_indices = @transform_1, window_bounds = array<i64: 6, 75>}, {pipeline_mode = #tpu.pipeline_mode<synchronous>, transform_indices = @transform_2, window_bounds = array<i64: 6, 1>}, {pipeline_mode = #tpu.pipeline_mode<synchronous>, transform_indices = @transform_3, window_bounds = array<i64: 16, 150>}, {pipeline_mode = #tpu.pipeline_mode<synchronous>, transform_indices = @transform_4, window_bounds = array<i64: 16, 1>}, {pipeline_mode = #tpu.pipeline_mode<synchronous>, transform_indices = @transform_5, window_bounds = array<i64: 10, 400>}, {pipeline_mode = #tpu.pipeline_mode<synchronous>, transform_indices = @transform_6, window_bounds = array<i64: 10, 1>}, {transform_indices = @transform_7, window_bounds = array<i64: 1, 10, 2>}]} {
    %c0 = arith.constant 0 : index
    %c0_0 = arith.constant 0 : index
    %0 = vector.load %arg2[%c0, %c0_0] : memref<6x75xf32, #tpu.memory_space<vmem>>, vector<6x75xf32>
    %c0_1 = arith.constant 0 : index
    %c0_2 = arith.constant 0 : index
    %c0_3 = arith.constant 0 : index
    %1 = vector.load %arg1[%c0_1, %c0_2, %c0_3] : memref<1x75x1600xf32, #tpu.memory_space<vmem>>, vector<1x75x1600xf32>
    %2 = vector.shape_cast %1 : vector<1x75x1600xf32> to vector<75x1600xf32>
    %cst = arith.constant dense<0.000000e+00> : vector<6x1600xf32>
    %3 = tpu.matmul %0, %2, %cst {dimension_numbers = #tpu.dot_dimension_numbers<[1], [0], [0], [1], [0, 0, 1, 1], [], []>} : vector<6x75xf32>, vector<75x1600xf32>, vector<6x1600xf32> -> vector<6x1600xf32>
    %c0_4 = arith.constant 0 : index
    %c0_5 = arith.constant 0 : index
    %4 = vector.load %arg3[%c0_4, %c0_5] : memref<6x1xf32, #tpu.memory_space<vmem>>, vector<6x1xf32>
    %5 = vector.broadcast %4 : vector<6x1xf32> to vector<6x1600xf32>
    %6 = arith.addf %3, %5 : vector<6x1600xf32>
    %cst_6 = arith.constant 0.000000e+00 : f32
    %7 = vector.broadcast %cst_6 : f32 to vector<6x1600xf32>
    %8 = arith.maximumf %6, %7 : vector<6x1600xf32>
    %c0_7 = arith.constant 0 : index
    %c0_8 = arith.constant 0 : index
    %9 = vector.load %arg9[%c0_7, %c0_8] : memref<6x1600xf32, #tpu.memory_space<vmem>>, vector<6x1600xf32>
    tpu.vector_store %arg9[%c0_7, %c0_8], %8 {strides = array<i32>} : memref<6x1600xf32, #tpu.memory_space<vmem>>, vector<6x1600xf32>,
    %c0_9 = arith.constant 0 : index
    %c0_10 = arith.constant 0 : index
    %10 = vector.load %arg9[%c0_9, %c0_10] : memref<6x1600xf32, #tpu.memory_space<vmem>>, vector<6x1536xf32>
    %c0_11 = arith.constant 0 : index
    %c2 = arith.constant 2 : index
    %11 = vector.load %arg9[%c0_11, %c2] : memref<6x1600xf32, #tpu.memory_space<vmem>>, vector<6x1536xf32>
    %12 = arith.maximumf %10, %11 : vector<6x1536xf32>
    %c0_12 = arith.constant 0 : index
    %c56 = arith.constant 56 : index
    %13 = vector.load %arg9[%c0_12, %c56] : memref<6x1600xf32, #tpu.memory_space<vmem>>, vector<6x1536xf32>
    %c0_13 = arith.constant 0 : index
    %c58 = arith.constant 58 : index
    %14 = vector.load %arg9[%c0_13, %c58] : memref<6x1600xf32, #tpu.memory_space<vmem>>, vector<6x1536xf32>
    %15 = arith.maximumf %13, %14 : vector<6x1536xf32>
    %16 = arith.maximumf %12, %15 : vector<6x1536xf32>
    %c0_14 = arith.constant 0 : index
    %c0_15 = arith.constant 0 : index
    %17 = vector.load %arg10[%c0_14, %c0_15] : memref<6x1536xf32, #tpu.memory_space<vmem>>, vector<6x1536xf32>
    tpu.vector_store %arg10[%c0_14, %c0_15], %16 {strides = array<i32>} : memref<6x1536xf32, #tpu.memory_space<vmem>>, vector<6x1536xf32>,
    %c0_16 = arith.constant 0 : index
    %c0_17 = arith.constant 0 : index
    %18 = vector.load %arg10[%c0_16, %c0_17] : memref<6x1536xf32, #tpu.memory_space<vmem>>, vector<6x1056xf32>
    %c0_18 = arith.constant 0 : index
    %c0_19 = arith.constant 0 : index
    %19 = vector.load %arg11[%c0_18, %c0_19] : memref<150x1056xf32, #tpu.memory_space<vmem>>, vector<6x1056xf32>
    tpu.vector_store %arg11[%c0_18, %c0_19], %18 {strides = array<i32>} : memref<150x1056xf32, #tpu.memory_space<vmem>>, vector<6x1056xf32>,
    %c0_20 = arith.constant 0 : index
    %c4 = arith.constant 4 : index
    %20 = vector.load %arg10[%c0_20, %c4] : memref<6x1536xf32, #tpu.memory_space<vmem>>, vector<6x1056xf32>
    %c6 = arith.constant 6 : index
    %c0_21 = arith.constant 0 : index
    %21 = vector.load %arg11[%c6, %c0_21] : memref<150x1056xf32, #tpu.memory_space<vmem>>, vector<6x1056xf32>
    tpu.vector_store %arg11[%c6, %c0_21], %20 {strides = array<i32>} : memref<150x1056xf32, #tpu.memory_space<vmem>>, vector<6x1056xf32>,
    %c0_22 = arith.constant 0 : index
    %c8 = arith.constant 8 : index
    %22 = vector.load %arg10[%c0_22, %c8] : memref<6x1536xf32, #tpu.memory_space<vmem>>, vector<6x1056xf32>
    %c12 = arith.constant 12 : index
    %c0_23 = arith.constant 0 : index
    %23 = vector.load %arg11[%c12, %c0_23] : memref<150x1056xf32, #tpu.memory_space<vmem>>, vector<6x1056xf32>
    tpu.vector_store %arg11[%c12, %c0_23], %22 {strides = array<i32>} : memref<150x1056xf32, #tpu.memory_space<vmem>>, vector<6x1056xf32>,
    %c0_24 = arith.constant 0 : index
    %c12_25 = arith.constant 12 : index
    %24 = vector.load %arg10[%c0_24, %c12_25] : memref<6x1536xf32, #tpu.memory_space<vmem>>, vector<6x1056xf32>
    %c18 = arith.constant 18 : index
    %c0_26 = arith.constant 0 : index
    %25 = vector.load %arg11[%c18, %c0_26] : memref<150x1056xf32, #tpu.memory_space<vmem>>, vector<6x1056xf32>
    tpu.vector_store %arg11[%c18, %c0_26], %24 {strides = array<i32>} : memref<150x1056xf32, #tpu.memory_space<vmem>>, vector<6x1056xf32>,
    %c0_27 = arith.constant 0 : index
    %c16 = arith.constant 16 : index
    %26 = vector.load %arg10[%c0_27, %c16] : memref<6x1536xf32, #tpu.memory_space<vmem>>, vector<6x1056xf32>
    %c24 = arith.constant 24 : index
    %c0_28 = arith.constant 0 : index
    %27 = vector.load %arg11[%c24, %c0_28] : memref<150x1056xf32, #tpu.memory_space<vmem>>, vector<6x1056xf32>
    tpu.vector_store %arg11[%c24, %c0_28], %26 {strides = array<i32>} : memref<150x1056xf32, #tpu.memory_space<vmem>>, vector<6x1056xf32>,
    %c0_29 = arith.constant 0 : index
    %c112 = arith.constant 112 : index
    %28 = vector.load %arg10[%c0_29, %c112] : memref<6x1536xf32, #tpu.memory_space<vmem>>, vector<6x1056xf32>
    %c30 = arith.constant 30 : index
    %c0_30 = arith.constant 0 : index
    %29 = vector.load %arg11[%c30, %c0_30] : memref<150x1056xf32, #tpu.memory_space<vmem>>, vector<6x1056xf32>
    tpu.vector_store %arg11[%c30, %c0_30], %28 {strides = array<i32>} : memref<150x1056xf32, #tpu.memory_space<vmem>>, vector<6x1056xf32>,
    %c0_31 = arith.constant 0 : index
    %c116 = arith.constant 116 : index
    %30 = vector.load %arg10[%c0_31, %c116] : memref<6x1536xf32, #tpu.memory_space<vmem>>, vector<6x1056xf32>
    %c36 = arith.constant 36 : index
    %c0_32 = arith.constant 0 : index
    %31 = vector.load %arg11[%c36, %c0_32] : memref<150x1056xf32, #tpu.memory_space<vmem>>, vector<6x1056xf32>
    tpu.vector_store %arg11[%c36, %c0_32], %30 {strides = array<i32>} : memref<150x1056xf32, #tpu.memory_space<vmem>>, vector<6x1056xf32>,
    %c0_33 = arith.constant 0 : index
    %c120 = arith.constant 120 : index
    %32 = vector.load %arg10[%c0_33, %c120] : memref<6x1536xf32, #tpu.memory_space<vmem>>, vector<6x1056xf32>
    %c42 = arith.constant 42 : index
    %c0_34 = arith.constant 0 : index
    %33 = vector.load %arg11[%c42, %c0_34] : memref<150x1056xf32, #tpu.memory_space<vmem>>, vector<6x1056xf32>
    tpu.vector_store %arg11[%c42, %c0_34], %32 {strides = array<i32>} : memref<150x1056xf32, #tpu.memory_space<vmem>>, vector<6x1056xf32>,
    %c0_35 = arith.constant 0 : index
    %c124 = arith.constant 124 : index
    %34 = vector.load %arg10[%c0_35, %c124] : memref<6x1536xf32, #tpu.memory_space<vmem>>, vector<6x1056xf32>
    %c48 = arith.constant 48 : index
    %c0_36 = arith.constant 0 : index
    %35 = vector.load %arg11[%c48, %c0_36] : memref<150x1056xf32, #tpu.memory_space<vmem>>, vector<6x1056xf32>
    tpu.vector_store %arg11[%c48, %c0_36], %34 {strides = array<i32>} : memref<150x1056xf32, #tpu.memory_space<vmem>>, vector<6x1056xf32>,
    %c0_37 = arith.constant 0 : index
    %c128 = arith.constant 128 : index
    %36 = vector.load %arg10[%c0_37, %c128] : memref<6x1536xf32, #tpu.memory_space<vmem>>, vector<6x1056xf32>
    %c54 = arith.constant 54 : index
    %c0_38 = arith.constant 0 : index
    %37 = vector.load %arg11[%c54, %c0_38] : memref<150x1056xf32, #tpu.memory_space<vmem>>, vector<6x1056xf32>
    tpu.vector_store %arg11[%c54, %c0_38], %36 {strides = array<i32>} : memref<150x1056xf32, #tpu.memory_space<vmem>>, vector<6x1056xf32>,
    %c0_39 = arith.constant 0 : index
    %c224 = arith.constant 224 : index
    %38 = vector.load %arg10[%c0_39, %c224] : memref<6x1536xf32, #tpu.memory_space<vmem>>, vector<6x1056xf32>
    %c60 = arith.constant 60 : index
    %c0_40 = arith.constant 0 : index
    %39 = vector.load %arg11[%c60, %c0_40] : memref<150x1056xf32, #tpu.memory_space<vmem>>, vector<6x1056xf32>
    tpu.vector_store %arg11[%c60, %c0_40], %38 {strides = array<i32>} : memref<150x1056xf32, #tpu.memory_space<vmem>>, vector<6x1056xf32>,
    %c0_41 = arith.constant 0 : index
    %c228 = arith.constant 228 : index
    %40 = vector.load %arg10[%c0_41, %c228] : memref<6x1536xf32, #tpu.memory_space<vmem>>, vector<6x1056xf32>
    %c66 = arith.constant 66 : index
    %c0_42 = arith.constant 0 : index
    %41 = vector.load %arg11[%c66, %c0_42] : memref<150x1056xf32, #tpu.memory_space<vmem>>, vector<6x1056xf32>
    tpu.vector_store %arg11[%c66, %c0_42], %40 {strides = array<i32>} : memref<150x1056xf32, #tpu.memory_space<vmem>>, vector<6x1056xf32>,
    %c0_43 = arith.constant 0 : index
    %c232 = arith.constant 232 : index
    %42 = vector.load %arg10[%c0_43, %c232] : memref<6x1536xf32, #tpu.memory_space<vmem>>, vector<6x1056xf32>
    %c72 = arith.constant 72 : index
    %c0_44 = arith.constant 0 : index
    %43 = vector.load %arg11[%c72, %c0_44] : memref<150x1056xf32, #tpu.memory_space<vmem>>, vector<6x1056xf32>
    tpu.vector_store %arg11[%c72, %c0_44], %42 {strides = array<i32>} : memref<150x1056xf32, #tpu.memory_space<vmem>>, vector<6x1056xf32>,
    %c0_45 = arith.constant 0 : index
    %c236 = arith.constant 236 : index
    %44 = vector.load %arg10[%c0_45, %c236] : memref<6x1536xf32, #tpu.memory_space<vmem>>, vector<6x1056xf32>
    %c78 = arith.constant 78 : index
    %c0_46 = arith.constant 0 : index
    %45 = vector.load %arg11[%c78, %c0_46] : memref<150x1056xf32, #tpu.memory_space<vmem>>, vector<6x1056xf32>
    tpu.vector_store %arg11[%c78, %c0_46], %44 {strides = array<i32>} : memref<150x1056xf32, #tpu.memory_space<vmem>>, vector<6x1056xf32>,
    %c0_47 = arith.constant 0 : index
    %c240 = arith.constant 240 : index
    %46 = vector.load %arg10[%c0_47, %c240] : memref<6x1536xf32, #tpu.memory_space<vmem>>, vector<6x1056xf32>
    %c84 = arith.constant 84 : index
    %c0_48 = arith.constant 0 : index
    %47 = vector.load %arg11[%c84, %c0_48] : memref<150x1056xf32, #tpu.memory_space<vmem>>, vector<6x1056xf32>
    tpu.vector_store %arg11[%c84, %c0_48], %46 {strides = array<i32>} : memref<150x1056xf32, #tpu.memory_space<vmem>>, vector<6x1056xf32>,
    %c0_49 = arith.constant 0 : index
    %c336 = arith.constant 336 : index
    %48 = vector.load %arg10[%c0_49, %c336] : memref<6x1536xf32, #tpu.memory_space<vmem>>, vector<6x1056xf32>
    %c90 = arith.constant 90 : index
    %c0_50 = arith.constant 0 : index
    %49 = vector.load %arg11[%c90, %c0_50] : memref<150x1056xf32, #tpu.memory_space<vmem>>, vector<6x1056xf32>
    tpu.vector_store %arg11[%c90, %c0_50], %48 {strides = array<i32>} : memref<150x1056xf32, #tpu.memory_space<vmem>>, vector<6x1056xf32>,
    %c0_51 = arith.constant 0 : index
    %c340 = arith.constant 340 : index
    %50 = vector.load %arg10[%c0_51, %c340] : memref<6x1536xf32, #tpu.memory_space<vmem>>, vector<6x1056xf32>
    %c96 = arith.constant 96 : index
    %c0_52 = arith.constant 0 : index
    %51 = vector.load %arg11[%c96, %c0_52] : memref<150x1056xf32, #tpu.memory_space<vmem>>, vector<6x1056xf32>
    tpu.vector_store %arg11[%c96, %c0_52], %50 {strides = array<i32>} : memref<150x1056xf32, #tpu.memory_space<vmem>>, vector<6x1056xf32>,
    %c0_53 = arith.constant 0 : index
    %c344 = arith.constant 344 : index
    %52 = vector.load %arg10[%c0_53, %c344] : memref<6x1536xf32, #tpu.memory_space<vmem>>, vector<6x1056xf32>
    %c102 = arith.constant 102 : index
    %c0_54 = arith.constant 0 : index
    %53 = vector.load %arg11[%c102, %c0_54] : memref<150x1056xf32, #tpu.memory_space<vmem>>, vector<6x1056xf32>
    tpu.vector_store %arg11[%c102, %c0_54], %52 {strides = array<i32>} : memref<150x1056xf32, #tpu.memory_space<vmem>>, vector<6x1056xf32>,
    %c0_55 = arith.constant 0 : index
    %c348 = arith.constant 348 : index
    %54 = vector.load %arg10[%c0_55, %c348] : memref<6x1536xf32, #tpu.memory_space<vmem>>, vector<6x1056xf32>
    %c108 = arith.constant 108 : index
    %c0_56 = arith.constant 0 : index
    %55 = vector.load %arg11[%c108, %c0_56] : memref<150x1056xf32, #tpu.memory_space<vmem>>, vector<6x1056xf32>
    tpu.vector_store %arg11[%c108, %c0_56], %54 {strides = array<i32>} : memref<150x1056xf32, #tpu.memory_space<vmem>>, vector<6x1056xf32>,
    %c0_57 = arith.constant 0 : index
    %c352 = arith.constant 352 : index
    %56 = vector.load %arg10[%c0_57, %c352] : memref<6x1536xf32, #tpu.memory_space<vmem>>, vector<6x1056xf32>
    %c114 = arith.constant 114 : index
    %c0_58 = arith.constant 0 : index
    %57 = vector.load %arg11[%c114, %c0_58] : memref<150x1056xf32, #tpu.memory_space<vmem>>, vector<6x1056xf32>
    tpu.vector_store %arg11[%c114, %c0_58], %56 {strides = array<i32>} : memref<150x1056xf32, #tpu.memory_space<vmem>>, vector<6x1056xf32>,
    %c0_59 = arith.constant 0 : index
    %c448 = arith.constant 448 : index
    %58 = vector.load %arg10[%c0_59, %c448] : memref<6x1536xf32, #tpu.memory_space<vmem>>, vector<6x1056xf32>
    %c120_60 = arith.constant 120 : index
    %c0_61 = arith.constant 0 : index
    %59 = vector.load %arg11[%c120_60, %c0_61] : memref<150x1056xf32, #tpu.memory_space<vmem>>, vector<6x1056xf32>
    tpu.vector_store %arg11[%c120_60, %c0_61], %58 {strides = array<i32>} : memref<150x1056xf32, #tpu.memory_space<vmem>>, vector<6x1056xf32>,
    %c0_62 = arith.constant 0 : index
    %c452 = arith.constant 452 : index
    %60 = vector.load %arg10[%c0_62, %c452] : memref<6x1536xf32, #tpu.memory_space<vmem>>, vector<6x1056xf32>
    %c126 = arith.constant 126 : index
    %c0_63 = arith.constant 0 : index
    %61 = vector.load %arg11[%c126, %c0_63] : memref<150x1056xf32, #tpu.memory_space<vmem>>, vector<6x1056xf32>
    tpu.vector_store %arg11[%c126, %c0_63], %60 {strides = array<i32>} : memref<150x1056xf32, #tpu.memory_space<vmem>>, vector<6x1056xf32>,
    %c0_64 = arith.constant 0 : index
    %c456 = arith.constant 456 : index
    %62 = vector.load %arg10[%c0_64, %c456] : memref<6x1536xf32, #tpu.memory_space<vmem>>, vector<6x1056xf32>
    %c132 = arith.constant 132 : index
    %c0_65 = arith.constant 0 : index
    %63 = vector.load %arg11[%c132, %c0_65] : memref<150x1056xf32, #tpu.memory_space<vmem>>, vector<6x1056xf32>
    tpu.vector_store %arg11[%c132, %c0_65], %62 {strides = array<i32>} : memref<150x1056xf32, #tpu.memory_space<vmem>>, vector<6x1056xf32>,
    %c0_66 = arith.constant 0 : index
    %c460 = arith.constant 460 : index
    %64 = vector.load %arg10[%c0_66, %c460] : memref<6x1536xf32, #tpu.memory_space<vmem>>, vector<6x1056xf32>
    %c138 = arith.constant 138 : index
    %c0_67 = arith.constant 0 : index
    %65 = vector.load %arg11[%c138, %c0_67] : memref<150x1056xf32, #tpu.memory_space<vmem>>, vector<6x1056xf32>
    tpu.vector_store %arg11[%c138, %c0_67], %64 {strides = array<i32>} : memref<150x1056xf32, #tpu.memory_space<vmem>>, vector<6x1056xf32>,
    %c0_68 = arith.constant 0 : index
    %c464 = arith.constant 464 : index
    %66 = vector.load %arg10[%c0_68, %c464] : memref<6x1536xf32, #tpu.memory_space<vmem>>, vector<6x1056xf32>
    %c144 = arith.constant 144 : index
    %c0_69 = arith.constant 0 : index
    %67 = vector.load %arg11[%c144, %c0_69] : memref<150x1056xf32, #tpu.memory_space<vmem>>, vector<6x1056xf32>
    tpu.vector_store %arg11[%c144, %c0_69], %66 {strides = array<i32>} : memref<150x1056xf32, #tpu.memory_space<vmem>>, vector<6x1056xf32>,
    %c0_70 = arith.constant 0 : index
    %c0_71 = arith.constant 0 : index
    %68 = vector.load %arg4[%c0_70, %c0_71] : memref<16x150xf32, #tpu.memory_space<vmem>>, vector<16x150xf32>
    %c0_72 = arith.constant 0 : index
    %c0_73 = arith.constant 0 : index
    %69 = vector.load %arg11[%c0_72, %c0_73] : memref<150x1056xf32, #tpu.memory_space<vmem>>, vector<150x1056xf32>
    %cst_74 = arith.constant dense<0.000000e+00> : vector<16x1056xf32>
    %70 = tpu.matmul %68, %69, %cst_74 {dimension_numbers = #tpu.dot_dimension_numbers<[1], [0], [0], [1], [0, 0, 1, 1], [], []>} : vector<16x150xf32>, vector<150x1056xf32>, vector<16x1056xf32> -> vector<16x1056xf32>
    %c0_75 = arith.constant 0 : index
    %c0_76 = arith.constant 0 : index
    %71 = vector.load %arg5[%c0_75, %c0_76] : memref<16x1xf32, #tpu.memory_space<vmem>>, vector<16x1xf32>
    %72 = vector.broadcast %71 : vector<16x1xf32> to vector<16x1056xf32>
    %73 = arith.addf %70, %72 : vector<16x1056xf32>
    %cst_77 = arith.constant 0.000000e+00 : f32
    %74 = vector.broadcast %cst_77 : f32 to vector<16x1056xf32>
    %75 = arith.maximumf %73, %74 : vector<16x1056xf32>
    %c0_78 = arith.constant 0 : index
    %c0_79 = arith.constant 0 : index
    %76 = vector.load %arg12[%c0_78, %c0_79] : memref<16x1056xf32, #tpu.memory_space<vmem>>, vector<16x1056xf32>
    tpu.vector_store %arg12[%c0_78, %c0_79], %75 {strides = array<i32>} : memref<16x1056xf32, #tpu.memory_space<vmem>>, vector<16x1056xf32>,
    %c0_80 = arith.constant 0 : index
    %c0_81 = arith.constant 0 : index
    %77 = vector.load %arg12[%c0_80, %c0_81] : memref<16x1056xf32, #tpu.memory_space<vmem>>, vector<16x2xf32>
    %c0_82 = arith.constant 0 : index
    %c4_83 = arith.constant 4 : index
    %78 = vector.load %arg12[%c0_82, %c4_83] : memref<16x1056xf32, #tpu.memory_space<vmem>>, vector<16x2xf32>
    %79 = arith.maximumf %77, %78 : vector<16x2xf32>
    %c0_84 = arith.constant 0 : index
    %c112_85 = arith.constant 112 : index
    %80 = vector.load %arg12[%c0_84, %c112_85] : memref<16x1056xf32, #tpu.memory_space<vmem>>, vector<16x2xf32>
    %c0_86 = arith.constant 0 : index
    %c116_87 = arith.constant 116 : index
    %81 = vector.load %arg12[%c0_86, %c116_87] : memref<16x1056xf32, #tpu.memory_space<vmem>>, vector<16x2xf32>
    %82 = arith.maximumf %80, %81 : vector<16x2xf32>
    %83 = arith.maximumf %79, %82 : vector<16x2xf32>
    %c0_88 = arith.constant 0 : index
    %c0_89 = arith.constant 0 : index
    %84 = vector.load %arg13[%c0_88, %c0_89] : memref<400x2xf32, #tpu.memory_space<vmem>>, vector<16x2xf32>
    tpu.vector_store %arg13[%c0_88, %c0_89], %83 {strides = array<i32>} : memref<400x2xf32, #tpu.memory_space<vmem>>, vector<16x2xf32>,
    %c0_90 = arith.constant 0 : index
    %c8_91 = arith.constant 8 : index
    %85 = vector.load %arg12[%c0_90, %c8_91] : memref<16x1056xf32, #tpu.memory_space<vmem>>, vector<16x2xf32>
    %c0_92 = arith.constant 0 : index
    %c12_93 = arith.constant 12 : index
    %86 = vector.load %arg12[%c0_92, %c12_93] : memref<16x1056xf32, #tpu.memory_space<vmem>>, vector<16x2xf32>
    %87 = arith.maximumf %85, %86 : vector<16x2xf32>
    %c0_94 = arith.constant 0 : index
    %c120_95 = arith.constant 120 : index
    %88 = vector.load %arg12[%c0_94, %c120_95] : memref<16x1056xf32, #tpu.memory_space<vmem>>, vector<16x2xf32>
    %c0_96 = arith.constant 0 : index
    %c124_97 = arith.constant 124 : index
    %89 = vector.load %arg12[%c0_96, %c124_97] : memref<16x1056xf32, #tpu.memory_space<vmem>>, vector<16x2xf32>
    %90 = arith.maximumf %88, %89 : vector<16x2xf32>
    %91 = arith.maximumf %87, %90 : vector<16x2xf32>
    %c16_98 = arith.constant 16 : index
    %c0_99 = arith.constant 0 : index
    %92 = vector.load %arg13[%c16_98, %c0_99] : memref<400x2xf32, #tpu.memory_space<vmem>>, vector<16x2xf32>
    tpu.vector_store %arg13[%c16_98, %c0_99], %91 {strides = array<i32>} : memref<400x2xf32, #tpu.memory_space<vmem>>, vector<16x2xf32>,
    %c0_100 = arith.constant 0 : index
    %c16_101 = arith.constant 16 : index
    %93 = vector.load %arg12[%c0_100, %c16_101] : memref<16x1056xf32, #tpu.memory_space<vmem>>, vector<16x2xf32>
    %c0_102 = arith.constant 0 : index
    %c20 = arith.constant 20 : index
    %94 = vector.load %arg12[%c0_102, %c20] : memref<16x1056xf32, #tpu.memory_space<vmem>>, vector<16x2xf32>
    %95 = arith.maximumf %93, %94 : vector<16x2xf32>
    %c0_103 = arith.constant 0 : index
    %c128_104 = arith.constant 128 : index
    %96 = vector.load %arg12[%c0_103, %c128_104] : memref<16x1056xf32, #tpu.memory_space<vmem>>, vector<16x2xf32>
    %c0_105 = arith.constant 0 : index
    %c132_106 = arith.constant 132 : index
    %97 = vector.load %arg12[%c0_105, %c132_106] : memref<16x1056xf32, #tpu.memory_space<vmem>>, vector<16x2xf32>
    %98 = arith.maximumf %96, %97 : vector<16x2xf32>
    %99 = arith.maximumf %95, %98 : vector<16x2xf32>
    %c32 = arith.constant 32 : index
    %c0_107 = arith.constant 0 : index
    %100 = vector.load %arg13[%c32, %c0_107] : memref<400x2xf32, #tpu.memory_space<vmem>>, vector<16x2xf32>
    tpu.vector_store %arg13[%c32, %c0_107], %99 {strides = array<i32>} : memref<400x2xf32, #tpu.memory_space<vmem>>, vector<16x2xf32>,
    %c0_108 = arith.constant 0 : index
    %c24_109 = arith.constant 24 : index
    %101 = vector.load %arg12[%c0_108, %c24_109] : memref<16x1056xf32, #tpu.memory_space<vmem>>, vector<16x2xf32>
    %c0_110 = arith.constant 0 : index
    %c28 = arith.constant 28 : index
    %102 = vector.load %arg12[%c0_110, %c28] : memref<16x1056xf32, #tpu.memory_space<vmem>>, vector<16x2xf32>
    %103 = arith.maximumf %101, %102 : vector<16x2xf32>
    %c0_111 = arith.constant 0 : index
    %c136 = arith.constant 136 : index
    %104 = vector.load %arg12[%c0_111, %c136] : memref<16x1056xf32, #tpu.memory_space<vmem>>, vector<16x2xf32>
    %c0_112 = arith.constant 0 : index
    %c140 = arith.constant 140 : index
    %105 = vector.load %arg12[%c0_112, %c140] : memref<16x1056xf32, #tpu.memory_space<vmem>>, vector<16x2xf32>
    %106 = arith.maximumf %104, %105 : vector<16x2xf32>
    %107 = arith.maximumf %103, %106 : vector<16x2xf32>
    %c48_113 = arith.constant 48 : index
    %c0_114 = arith.constant 0 : index
    %108 = vector.load %arg13[%c48_113, %c0_114] : memref<400x2xf32, #tpu.memory_space<vmem>>, vector<16x2xf32>
    tpu.vector_store %arg13[%c48_113, %c0_114], %107 {strides = array<i32>} : memref<400x2xf32, #tpu.memory_space<vmem>>, vector<16x2xf32>,
    %c0_115 = arith.constant 0 : index
    %c32_116 = arith.constant 32 : index
    %109 = vector.load %arg12[%c0_115, %c32_116] : memref<16x1056xf32, #tpu.memory_space<vmem>>, vector<16x2xf32>
    %c0_117 = arith.constant 0 : index
    %c36_118 = arith.constant 36 : index
    %110 = vector.load %arg12[%c0_117, %c36_118] : memref<16x1056xf32, #tpu.memory_space<vmem>>, vector<16x2xf32>
    %111 = arith.maximumf %109, %110 : vector<16x2xf32>
    %c0_119 = arith.constant 0 : index
    %c144_120 = arith.constant 144 : index
    %112 = vector.load %arg12[%c0_119, %c144_120] : memref<16x1056xf32, #tpu.memory_space<vmem>>, vector<16x2xf32>
    %c0_121 = arith.constant 0 : index
    %c148 = arith.constant 148 : index
    %113 = vector.load %arg12[%c0_121, %c148] : memref<16x1056xf32, #tpu.memory_space<vmem>>, vector<16x2xf32>
    %114 = arith.maximumf %112, %113 : vector<16x2xf32>
    %115 = arith.maximumf %111, %114 : vector<16x2xf32>
    %c64 = arith.constant 64 : index
    %c0_122 = arith.constant 0 : index
    %116 = vector.load %arg13[%c64, %c0_122] : memref<400x2xf32, #tpu.memory_space<vmem>>, vector<16x2xf32>
    tpu.vector_store %arg13[%c64, %c0_122], %115 {strides = array<i32>} : memref<400x2xf32, #tpu.memory_space<vmem>>, vector<16x2xf32>,
    %c0_123 = arith.constant 0 : index
    %c224_124 = arith.constant 224 : index
    %117 = vector.load %arg12[%c0_123, %c224_124] : memref<16x1056xf32, #tpu.memory_space<vmem>>, vector<16x2xf32>
    %c0_125 = arith.constant 0 : index
    %c228_126 = arith.constant 228 : index
    %118 = vector.load %arg12[%c0_125, %c228_126] : memref<16x1056xf32, #tpu.memory_space<vmem>>, vector<16x2xf32>
    %119 = arith.maximumf %117, %118 : vector<16x2xf32>
    %c0_127 = arith.constant 0 : index
    %c336_128 = arith.constant 336 : index
    %120 = vector.load %arg12[%c0_127, %c336_128] : memref<16x1056xf32, #tpu.memory_space<vmem>>, vector<16x2xf32>
    %c0_129 = arith.constant 0 : index
    %c340_130 = arith.constant 340 : index
    %121 = vector.load %arg12[%c0_129, %c340_130] : memref<16x1056xf32, #tpu.memory_space<vmem>>, vector<16x2xf32>
    %122 = arith.maximumf %120, %121 : vector<16x2xf32>
    %123 = arith.maximumf %119, %122 : vector<16x2xf32>
    %c80 = arith.constant 80 : index
    %c0_131 = arith.constant 0 : index
    %124 = vector.load %arg13[%c80, %c0_131] : memref<400x2xf32, #tpu.memory_space<vmem>>, vector<16x2xf32>
    tpu.vector_store %arg13[%c80, %c0_131], %123 {strides = array<i32>} : memref<400x2xf32, #tpu.memory_space<vmem>>, vector<16x2xf32>,
    %c0_132 = arith.constant 0 : index
    %c232_133 = arith.constant 232 : index
    %125 = vector.load %arg12[%c0_132, %c232_133] : memref<16x1056xf32, #tpu.memory_space<vmem>>, vector<16x2xf32>
    %c0_134 = arith.constant 0 : index
    %c236_135 = arith.constant 236 : index
    %126 = vector.load %arg12[%c0_134, %c236_135] : memref<16x1056xf32, #tpu.memory_space<vmem>>, vector<16x2xf32>
    %127 = arith.maximumf %125, %126 : vector<16x2xf32>
    %c0_136 = arith.constant 0 : index
    %c344_137 = arith.constant 344 : index
    %128 = vector.load %arg12[%c0_136, %c344_137] : memref<16x1056xf32, #tpu.memory_space<vmem>>, vector<16x2xf32>
    %c0_138 = arith.constant 0 : index
    %c348_139 = arith.constant 348 : index
    %129 = vector.load %arg12[%c0_138, %c348_139] : memref<16x1056xf32, #tpu.memory_space<vmem>>, vector<16x2xf32>
    %130 = arith.maximumf %128, %129 : vector<16x2xf32>
    %131 = arith.maximumf %127, %130 : vector<16x2xf32>
    %c96_140 = arith.constant 96 : index
    %c0_141 = arith.constant 0 : index
    %132 = vector.load %arg13[%c96_140, %c0_141] : memref<400x2xf32, #tpu.memory_space<vmem>>, vector<16x2xf32>
    tpu.vector_store %arg13[%c96_140, %c0_141], %131 {strides = array<i32>} : memref<400x2xf32, #tpu.memory_space<vmem>>, vector<16x2xf32>,
    %c0_142 = arith.constant 0 : index
    %c240_143 = arith.constant 240 : index
    %133 = vector.load %arg12[%c0_142, %c240_143] : memref<16x1056xf32, #tpu.memory_space<vmem>>, vector<16x2xf32>
    %c0_144 = arith.constant 0 : index
    %c244 = arith.constant 244 : index
    %134 = vector.load %arg12[%c0_144, %c244] : memref<16x1056xf32, #tpu.memory_space<vmem>>, vector<16x2xf32>
    %135 = arith.maximumf %133, %134 : vector<16x2xf32>
    %c0_145 = arith.constant 0 : index
    %c352_146 = arith.constant 352 : index
    %136 = vector.load %arg12[%c0_145, %c352_146] : memref<16x1056xf32, #tpu.memory_space<vmem>>, vector<16x2xf32>
    %c0_147 = arith.constant 0 : index
    %c356 = arith.constant 356 : index
    %137 = vector.load %arg12[%c0_147, %c356] : memref<16x1056xf32, #tpu.memory_space<vmem>>, vector<16x2xf32>
    %138 = arith.maximumf %136, %137 : vector<16x2xf32>
    %139 = arith.maximumf %135, %138 : vector<16x2xf32>
    %c112_148 = arith.constant 112 : index
    %c0_149 = arith.constant 0 : index
    %140 = vector.load %arg13[%c112_148, %c0_149] : memref<400x2xf32, #tpu.memory_space<vmem>>, vector<16x2xf32>
    tpu.vector_store %arg13[%c112_148, %c0_149], %139 {strides = array<i32>} : memref<400x2xf32, #tpu.memory_space<vmem>>, vector<16x2xf32>,
    %c0_150 = arith.constant 0 : index
    %c248 = arith.constant 248 : index
    %141 = vector.load %arg12[%c0_150, %c248] : memref<16x1056xf32, #tpu.memory_space<vmem>>, vector<16x2xf32>
    %c0_151 = arith.constant 0 : index
    %c252 = arith.constant 252 : index
    %142 = vector.load %arg12[%c0_151, %c252] : memref<16x1056xf32, #tpu.memory_space<vmem>>, vector<16x2xf32>
    %143 = arith.maximumf %141, %142 : vector<16x2xf32>
    %c0_152 = arith.constant 0 : index
    %c360 = arith.constant 360 : index
    %144 = vector.load %arg12[%c0_152, %c360] : memref<16x1056xf32, #tpu.memory_space<vmem>>, vector<16x2xf32>
    %c0_153 = arith.constant 0 : index
    %c364 = arith.constant 364 : index
    %145 = vector.load %arg12[%c0_153, %c364] : memref<16x1056xf32, #tpu.memory_space<vmem>>, vector<16x2xf32>
    %146 = arith.maximumf %144, %145 : vector<16x2xf32>
    %147 = arith.maximumf %143, %146 : vector<16x2xf32>
    %c128_154 = arith.constant 128 : index
    %c0_155 = arith.constant 0 : index
    %148 = vector.load %arg13[%c128_154, %c0_155] : memref<400x2xf32, #tpu.memory_space<vmem>>, vector<16x2xf32>
    tpu.vector_store %arg13[%c128_154, %c0_155], %147 {strides = array<i32>} : memref<400x2xf32, #tpu.memory_space<vmem>>, vector<16x2xf32>,
    %c0_156 = arith.constant 0 : index
    %c256 = arith.constant 256 : index
    %149 = vector.load %arg12[%c0_156, %c256] : memref<16x1056xf32, #tpu.memory_space<vmem>>, vector<16x2xf32>
    %c0_157 = arith.constant 0 : index
    %c260 = arith.constant 260 : index
    %150 = vector.load %arg12[%c0_157, %c260] : memref<16x1056xf32, #tpu.memory_space<vmem>>, vector<16x2xf32>
    %151 = arith.maximumf %149, %150 : vector<16x2xf32>
    %c0_158 = arith.constant 0 : index
    %c368 = arith.constant 368 : index
    %152 = vector.load %arg12[%c0_158, %c368] : memref<16x1056xf32, #tpu.memory_space<vmem>>, vector<16x2xf32>
    %c0_159 = arith.constant 0 : index
    %c372 = arith.constant 372 : index
    %153 = vector.load %arg12[%c0_159, %c372] : memref<16x1056xf32, #tpu.memory_space<vmem>>, vector<16x2xf32>
    %154 = arith.maximumf %152, %153 : vector<16x2xf32>
    %155 = arith.maximumf %151, %154 : vector<16x2xf32>
    %c144_160 = arith.constant 144 : index
    %c0_161 = arith.constant 0 : index
    %156 = vector.load %arg13[%c144_160, %c0_161] : memref<400x2xf32, #tpu.memory_space<vmem>>, vector<16x2xf32>
    tpu.vector_store %arg13[%c144_160, %c0_161], %155 {strides = array<i32>} : memref<400x2xf32, #tpu.memory_space<vmem>>, vector<16x2xf32>,
    %c0_162 = arith.constant 0 : index
    %c448_163 = arith.constant 448 : index
    %157 = vector.load %arg12[%c0_162, %c448_163] : memref<16x1056xf32, #tpu.memory_space<vmem>>, vector<16x2xf32>
    %c0_164 = arith.constant 0 : index
    %c452_165 = arith.constant 452 : index
    %158 = vector.load %arg12[%c0_164, %c452_165] : memref<16x1056xf32, #tpu.memory_space<vmem>>, vector<16x2xf32>
    %159 = arith.maximumf %157, %158 : vector<16x2xf32>
    %c0_166 = arith.constant 0 : index
    %c560 = arith.constant 560 : index
    %160 = vector.load %arg12[%c0_166, %c560] : memref<16x1056xf32, #tpu.memory_space<vmem>>, vector<16x2xf32>
    %c0_167 = arith.constant 0 : index
    %c564 = arith.constant 564 : index
    %161 = vector.load %arg12[%c0_167, %c564] : memref<16x1056xf32, #tpu.memory_space<vmem>>, vector<16x2xf32>
    %162 = arith.maximumf %160, %161 : vector<16x2xf32>
    %163 = arith.maximumf %159, %162 : vector<16x2xf32>
    %c160 = arith.constant 160 : index
    %c0_168 = arith.constant 0 : index
    %164 = vector.load %arg13[%c160, %c0_168] : memref<400x2xf32, #tpu.memory_space<vmem>>, vector<16x2xf32>
    tpu.vector_store %arg13[%c160, %c0_168], %163 {strides = array<i32>} : memref<400x2xf32, #tpu.memory_space<vmem>>, vector<16x2xf32>,
    %c0_169 = arith.constant 0 : index
    %c456_170 = arith.constant 456 : index
    %165 = vector.load %arg12[%c0_169, %c456_170] : memref<16x1056xf32, #tpu.memory_space<vmem>>, vector<16x2xf32>
    %c0_171 = arith.constant 0 : index
    %c460_172 = arith.constant 460 : index
    %166 = vector.load %arg12[%c0_171, %c460_172] : memref<16x1056xf32, #tpu.memory_space<vmem>>, vector<16x2xf32>
    %167 = arith.maximumf %165, %166 : vector<16x2xf32>
    %c0_173 = arith.constant 0 : index
    %c568 = arith.constant 568 : index
    %168 = vector.load %arg12[%c0_173, %c568] : memref<16x1056xf32, #tpu.memory_space<vmem>>, vector<16x2xf32>
    %c0_174 = arith.constant 0 : index
    %c572 = arith.constant 572 : index
    %169 = vector.load %arg12[%c0_174, %c572] : memref<16x1056xf32, #tpu.memory_space<vmem>>, vector<16x2xf32>
    %170 = arith.maximumf %168, %169 : vector<16x2xf32>
    %171 = arith.maximumf %167, %170 : vector<16x2xf32>
    %c176 = arith.constant 176 : index
    %c0_175 = arith.constant 0 : index
    %172 = vector.load %arg13[%c176, %c0_175] : memref<400x2xf32, #tpu.memory_space<vmem>>, vector<16x2xf32>
    tpu.vector_store %arg13[%c176, %c0_175], %171 {strides = array<i32>} : memref<400x2xf32, #tpu.memory_space<vmem>>, vector<16x2xf32>,
    %c0_176 = arith.constant 0 : index
    %c464_177 = arith.constant 464 : index
    %173 = vector.load %arg12[%c0_176, %c464_177] : memref<16x1056xf32, #tpu.memory_space<vmem>>, vector<16x2xf32>
    %c0_178 = arith.constant 0 : index
    %c468 = arith.constant 468 : index
    %174 = vector.load %arg12[%c0_178, %c468] : memref<16x1056xf32, #tpu.memory_space<vmem>>, vector<16x2xf32>
    %175 = arith.maximumf %173, %174 : vector<16x2xf32>
    %c0_179 = arith.constant 0 : index
    %c576 = arith.constant 576 : index
    %176 = vector.load %arg12[%c0_179, %c576] : memref<16x1056xf32, #tpu.memory_space<vmem>>, vector<16x2xf32>
    %c0_180 = arith.constant 0 : index
    %c580 = arith.constant 580 : index
    %177 = vector.load %arg12[%c0_180, %c580] : memref<16x1056xf32, #tpu.memory_space<vmem>>, vector<16x2xf32>
    %178 = arith.maximumf %176, %177 : vector<16x2xf32>
    %179 = arith.maximumf %175, %178 : vector<16x2xf32>
    %c192 = arith.constant 192 : index
    %c0_181 = arith.constant 0 : index
    %180 = vector.load %arg13[%c192, %c0_181] : memref<400x2xf32, #tpu.memory_space<vmem>>, vector<16x2xf32>
    tpu.vector_store %arg13[%c192, %c0_181], %179 {strides = array<i32>} : memref<400x2xf32, #tpu.memory_space<vmem>>, vector<16x2xf32>,
    %c0_182 = arith.constant 0 : index
    %c472 = arith.constant 472 : index
    %181 = vector.load %arg12[%c0_182, %c472] : memref<16x1056xf32, #tpu.memory_space<vmem>>, vector<16x2xf32>
    %c0_183 = arith.constant 0 : index
    %c476 = arith.constant 476 : index
    %182 = vector.load %arg12[%c0_183, %c476] : memref<16x1056xf32, #tpu.memory_space<vmem>>, vector<16x2xf32>
    %183 = arith.maximumf %181, %182 : vector<16x2xf32>
    %c0_184 = arith.constant 0 : index
    %c584 = arith.constant 584 : index
    %184 = vector.load %arg12[%c0_184, %c584] : memref<16x1056xf32, #tpu.memory_space<vmem>>, vector<16x2xf32>
    %c0_185 = arith.constant 0 : index
    %c588 = arith.constant 588 : index
    %185 = vector.load %arg12[%c0_185, %c588] : memref<16x1056xf32, #tpu.memory_space<vmem>>, vector<16x2xf32>
    %186 = arith.maximumf %184, %185 : vector<16x2xf32>
    %187 = arith.maximumf %183, %186 : vector<16x2xf32>
    %c208 = arith.constant 208 : index
    %c0_186 = arith.constant 0 : index
    %188 = vector.load %arg13[%c208, %c0_186] : memref<400x2xf32, #tpu.memory_space<vmem>>, vector<16x2xf32>
    tpu.vector_store %arg13[%c208, %c0_186], %187 {strides = array<i32>} : memref<400x2xf32, #tpu.memory_space<vmem>>, vector<16x2xf32>,
    %c0_187 = arith.constant 0 : index
    %c480 = arith.constant 480 : index
    %189 = vector.load %arg12[%c0_187, %c480] : memref<16x1056xf32, #tpu.memory_space<vmem>>, vector<16x2xf32>
    %c0_188 = arith.constant 0 : index
    %c484 = arith.constant 484 : index
    %190 = vector.load %arg12[%c0_188, %c484] : memref<16x1056xf32, #tpu.memory_space<vmem>>, vector<16x2xf32>
    %191 = arith.maximumf %189, %190 : vector<16x2xf32>
    %c0_189 = arith.constant 0 : index
    %c592 = arith.constant 592 : index
    %192 = vector.load %arg12[%c0_189, %c592] : memref<16x1056xf32, #tpu.memory_space<vmem>>, vector<16x2xf32>
    %c0_190 = arith.constant 0 : index
    %c596 = arith.constant 596 : index
    %193 = vector.load %arg12[%c0_190, %c596] : memref<16x1056xf32, #tpu.memory_space<vmem>>, vector<16x2xf32>
    %194 = arith.maximumf %192, %193 : vector<16x2xf32>
    %195 = arith.maximumf %191, %194 : vector<16x2xf32>
    %c224_191 = arith.constant 224 : index
    %c0_192 = arith.constant 0 : index
    %196 = vector.load %arg13[%c224_191, %c0_192] : memref<400x2xf32, #tpu.memory_space<vmem>>, vector<16x2xf32>
    tpu.vector_store %arg13[%c224_191, %c0_192], %195 {strides = array<i32>} : memref<400x2xf32, #tpu.memory_space<vmem>>, vector<16x2xf32>,
    %c0_193 = arith.constant 0 : index
    %c672 = arith.constant 672 : index
    %197 = vector.load %arg12[%c0_193, %c672] : memref<16x1056xf32, #tpu.memory_space<vmem>>, vector<16x2xf32>
    %c0_194 = arith.constant 0 : index
    %c676 = arith.constant 676 : index
    %198 = vector.load %arg12[%c0_194, %c676] : memref<16x1056xf32, #tpu.memory_space<vmem>>, vector<16x2xf32>
    %199 = arith.maximumf %197, %198 : vector<16x2xf32>
    %c0_195 = arith.constant 0 : index
    %c784 = arith.constant 784 : index
    %200 = vector.load %arg12[%c0_195, %c784] : memref<16x1056xf32, #tpu.memory_space<vmem>>, vector<16x2xf32>
    %c0_196 = arith.constant 0 : index
    %c788 = arith.constant 788 : index
    %201 = vector.load %arg12[%c0_196, %c788] : memref<16x1056xf32, #tpu.memory_space<vmem>>, vector<16x2xf32>
    %202 = arith.maximumf %200, %201 : vector<16x2xf32>
    %203 = arith.maximumf %199, %202 : vector<16x2xf32>
    %c240_197 = arith.constant 240 : index
    %c0_198 = arith.constant 0 : index
    %204 = vector.load %arg13[%c240_197, %c0_198] : memref<400x2xf32, #tpu.memory_space<vmem>>, vector<16x2xf32>
    tpu.vector_store %arg13[%c240_197, %c0_198], %203 {strides = array<i32>} : memref<400x2xf32, #tpu.memory_space<vmem>>, vector<16x2xf32>,
    %c0_199 = arith.constant 0 : index
    %c680 = arith.constant 680 : index
    %205 = vector.load %arg12[%c0_199, %c680] : memref<16x1056xf32, #tpu.memory_space<vmem>>, vector<16x2xf32>
    %c0_200 = arith.constant 0 : index
    %c684 = arith.constant 684 : index
    %206 = vector.load %arg12[%c0_200, %c684] : memref<16x1056xf32, #tpu.memory_space<vmem>>, vector<16x2xf32>
    %207 = arith.maximumf %205, %206 : vector<16x2xf32>
    %c0_201 = arith.constant 0 : index
    %c792 = arith.constant 792 : index
    %208 = vector.load %arg12[%c0_201, %c792] : memref<16x1056xf32, #tpu.memory_space<vmem>>, vector<16x2xf32>
    %c0_202 = arith.constant 0 : index
    %c796 = arith.constant 796 : index
    %209 = vector.load %arg12[%c0_202, %c796] : memref<16x1056xf32, #tpu.memory_space<vmem>>, vector<16x2xf32>
    %210 = arith.maximumf %208, %209 : vector<16x2xf32>
    %211 = arith.maximumf %207, %210 : vector<16x2xf32>
    %c256_203 = arith.constant 256 : index
    %c0_204 = arith.constant 0 : index
    %212 = vector.load %arg13[%c256_203, %c0_204] : memref<400x2xf32, #tpu.memory_space<vmem>>, vector<16x2xf32>
    tpu.vector_store %arg13[%c256_203, %c0_204], %211 {strides = array<i32>} : memref<400x2xf32, #tpu.memory_space<vmem>>, vector<16x2xf32>,
    %c0_205 = arith.constant 0 : index
    %c688 = arith.constant 688 : index
    %213 = vector.load %arg12[%c0_205, %c688] : memref<16x1056xf32, #tpu.memory_space<vmem>>, vector<16x2xf32>
    %c0_206 = arith.constant 0 : index
    %c692 = arith.constant 692 : index
    %214 = vector.load %arg12[%c0_206, %c692] : memref<16x1056xf32, #tpu.memory_space<vmem>>, vector<16x2xf32>
    %215 = arith.maximumf %213, %214 : vector<16x2xf32>
    %c0_207 = arith.constant 0 : index
    %c800 = arith.constant 800 : index
    %216 = vector.load %arg12[%c0_207, %c800] : memref<16x1056xf32, #tpu.memory_space<vmem>>, vector<16x2xf32>
    %c0_208 = arith.constant 0 : index
    %c804 = arith.constant 804 : index
    %217 = vector.load %arg12[%c0_208, %c804] : memref<16x1056xf32, #tpu.memory_space<vmem>>, vector<16x2xf32>
    %218 = arith.maximumf %216, %217 : vector<16x2xf32>
    %219 = arith.maximumf %215, %218 : vector<16x2xf32>
    %c272 = arith.constant 272 : index
    %c0_209 = arith.constant 0 : index
    %220 = vector.load %arg13[%c272, %c0_209] : memref<400x2xf32, #tpu.memory_space<vmem>>, vector<16x2xf32>
    tpu.vector_store %arg13[%c272, %c0_209], %219 {strides = array<i32>} : memref<400x2xf32, #tpu.memory_space<vmem>>, vector<16x2xf32>,
    %c0_210 = arith.constant 0 : index
    %c696 = arith.constant 696 : index
    %221 = vector.load %arg12[%c0_210, %c696] : memref<16x1056xf32, #tpu.memory_space<vmem>>, vector<16x2xf32>
    %c0_211 = arith.constant 0 : index
    %c700 = arith.constant 700 : index
    %222 = vector.load %arg12[%c0_211, %c700] : memref<16x1056xf32, #tpu.memory_space<vmem>>, vector<16x2xf32>
    %223 = arith.maximumf %221, %222 : vector<16x2xf32>
    %c0_212 = arith.constant 0 : index
    %c808 = arith.constant 808 : index
    %224 = vector.load %arg12[%c0_212, %c808] : memref<16x1056xf32, #tpu.memory_space<vmem>>, vector<16x2xf32>
    %c0_213 = arith.constant 0 : index
    %c812 = arith.constant 812 : index
    %225 = vector.load %arg12[%c0_213, %c812] : memref<16x1056xf32, #tpu.memory_space<vmem>>, vector<16x2xf32>
    %226 = arith.maximumf %224, %225 : vector<16x2xf32>
    %227 = arith.maximumf %223, %226 : vector<16x2xf32>
    %c288 = arith.constant 288 : index
    %c0_214 = arith.constant 0 : index
    %228 = vector.load %arg13[%c288, %c0_214] : memref<400x2xf32, #tpu.memory_space<vmem>>, vector<16x2xf32>
    tpu.vector_store %arg13[%c288, %c0_214], %227 {strides = array<i32>} : memref<400x2xf32, #tpu.memory_space<vmem>>, vector<16x2xf32>,
    %c0_215 = arith.constant 0 : index
    %c704 = arith.constant 704 : index
    %229 = vector.load %arg12[%c0_215, %c704] : memref<16x1056xf32, #tpu.memory_space<vmem>>, vector<16x2xf32>
    %c0_216 = arith.constant 0 : index
    %c708 = arith.constant 708 : index
    %230 = vector.load %arg12[%c0_216, %c708] : memref<16x1056xf32, #tpu.memory_space<vmem>>, vector<16x2xf32>
    %231 = arith.maximumf %229, %230 : vector<16x2xf32>
    %c0_217 = arith.constant 0 : index
    %c816 = arith.constant 816 : index
    %232 = vector.load %arg12[%c0_217, %c816] : memref<16x1056xf32, #tpu.memory_space<vmem>>, vector<16x2xf32>
    %c0_218 = arith.constant 0 : index
    %c820 = arith.constant 820 : index
    %233 = vector.load %arg12[%c0_218, %c820] : memref<16x1056xf32, #tpu.memory_space<vmem>>, vector<16x2xf32>
    %234 = arith.maximumf %232, %233 : vector<16x2xf32>
    %235 = arith.maximumf %231, %234 : vector<16x2xf32>
    %c304 = arith.constant 304 : index
    %c0_219 = arith.constant 0 : index
    %236 = vector.load %arg13[%c304, %c0_219] : memref<400x2xf32, #tpu.memory_space<vmem>>, vector<16x2xf32>
    tpu.vector_store %arg13[%c304, %c0_219], %235 {strides = array<i32>} : memref<400x2xf32, #tpu.memory_space<vmem>>, vector<16x2xf32>,
    %c0_220 = arith.constant 0 : index
    %c896 = arith.constant 896 : index
    %237 = vector.load %arg12[%c0_220, %c896] : memref<16x1056xf32, #tpu.memory_space<vmem>>, vector<16x2xf32>
    %c0_221 = arith.constant 0 : index
    %c900 = arith.constant 900 : index
    %238 = vector.load %arg12[%c0_221, %c900] : memref<16x1056xf32, #tpu.memory_space<vmem>>, vector<16x2xf32>
    %239 = arith.maximumf %237, %238 : vector<16x2xf32>
    %c0_222 = arith.constant 0 : index
    %c1008 = arith.constant 1008 : index
    %240 = vector.load %arg12[%c0_222, %c1008] : memref<16x1056xf32, #tpu.memory_space<vmem>>, vector<16x2xf32>
    %c0_223 = arith.constant 0 : index
    %c1012 = arith.constant 1012 : index
    %241 = vector.load %arg12[%c0_223, %c1012] : memref<16x1056xf32, #tpu.memory_space<vmem>>, vector<16x2xf32>
    %242 = arith.maximumf %240, %241 : vector<16x2xf32>
    %243 = arith.maximumf %239, %242 : vector<16x2xf32>
    %c320 = arith.constant 320 : index
    %c0_224 = arith.constant 0 : index
    %244 = vector.load %arg13[%c320, %c0_224] : memref<400x2xf32, #tpu.memory_space<vmem>>, vector<16x2xf32>
    tpu.vector_store %arg13[%c320, %c0_224], %243 {strides = array<i32>} : memref<400x2xf32, #tpu.memory_space<vmem>>, vector<16x2xf32>,
    %c0_225 = arith.constant 0 : index
    %c904 = arith.constant 904 : index
    %245 = vector.load %arg12[%c0_225, %c904] : memref<16x1056xf32, #tpu.memory_space<vmem>>, vector<16x2xf32>
    %c0_226 = arith.constant 0 : index
    %c908 = arith.constant 908 : index
    %246 = vector.load %arg12[%c0_226, %c908] : memref<16x1056xf32, #tpu.memory_space<vmem>>, vector<16x2xf32>
    %247 = arith.maximumf %245, %246 : vector<16x2xf32>
    %c0_227 = arith.constant 0 : index
    %c1016 = arith.constant 1016 : index
    %248 = vector.load %arg12[%c0_227, %c1016] : memref<16x1056xf32, #tpu.memory_space<vmem>>, vector<16x2xf32>
    %c0_228 = arith.constant 0 : index
    %c1020 = arith.constant 1020 : index
    %249 = vector.load %arg12[%c0_228, %c1020] : memref<16x1056xf32, #tpu.memory_space<vmem>>, vector<16x2xf32>
    %250 = arith.maximumf %248, %249 : vector<16x2xf32>
    %251 = arith.maximumf %247, %250 : vector<16x2xf32>
    %c336_229 = arith.constant 336 : index
    %c0_230 = arith.constant 0 : index
    %252 = vector.load %arg13[%c336_229, %c0_230] : memref<400x2xf32, #tpu.memory_space<vmem>>, vector<16x2xf32>
    tpu.vector_store %arg13[%c336_229, %c0_230], %251 {strides = array<i32>} : memref<400x2xf32, #tpu.memory_space<vmem>>, vector<16x2xf32>,
    %c0_231 = arith.constant 0 : index
    %c912 = arith.constant 912 : index
    %253 = vector.load %arg12[%c0_231, %c912] : memref<16x1056xf32, #tpu.memory_space<vmem>>, vector<16x2xf32>
    %c0_232 = arith.constant 0 : index
    %c916 = arith.constant 916 : index
    %254 = vector.load %arg12[%c0_232, %c916] : memref<16x1056xf32, #tpu.memory_space<vmem>>, vector<16x2xf32>
    %255 = arith.maximumf %253, %254 : vector<16x2xf32>
    %c0_233 = arith.constant 0 : index
    %c1024 = arith.constant 1024 : index
    %256 = vector.load %arg12[%c0_233, %c1024] : memref<16x1056xf32, #tpu.memory_space<vmem>>, vector<16x2xf32>
    %c0_234 = arith.constant 0 : index
    %c1028 = arith.constant 1028 : index
    %257 = vector.load %arg12[%c0_234, %c1028] : memref<16x1056xf32, #tpu.memory_space<vmem>>, vector<16x2xf32>
    %258 = arith.maximumf %256, %257 : vector<16x2xf32>
    %259 = arith.maximumf %255, %258 : vector<16x2xf32>
    %c352_235 = arith.constant 352 : index
    %c0_236 = arith.constant 0 : index
    %260 = vector.load %arg13[%c352_235, %c0_236] : memref<400x2xf32, #tpu.memory_space<vmem>>, vector<16x2xf32>
    tpu.vector_store %arg13[%c352_235, %c0_236], %259 {strides = array<i32>} : memref<400x2xf32, #tpu.memory_space<vmem>>, vector<16x2xf32>,
    %c0_237 = arith.constant 0 : index
    %c920 = arith.constant 920 : index
    %261 = vector.load %arg12[%c0_237, %c920] : memref<16x1056xf32, #tpu.memory_space<vmem>>, vector<16x2xf32>
    %c0_238 = arith.constant 0 : index
    %c924 = arith.constant 924 : index
    %262 = vector.load %arg12[%c0_238, %c924] : memref<16x1056xf32, #tpu.memory_space<vmem>>, vector<16x2xf32>
    %263 = arith.maximumf %261, %262 : vector<16x2xf32>
    %c0_239 = arith.constant 0 : index
    %c1032 = arith.constant 1032 : index
    %264 = vector.load %arg12[%c0_239, %c1032] : memref<16x1056xf32, #tpu.memory_space<vmem>>, vector<16x2xf32>
    %c0_240 = arith.constant 0 : index
    %c1036 = arith.constant 1036 : index
    %265 = vector.load %arg12[%c0_240, %c1036] : memref<16x1056xf32, #tpu.memory_space<vmem>>, vector<16x2xf32>
    %266 = arith.maximumf %264, %265 : vector<16x2xf32>
    %267 = arith.maximumf %263, %266 : vector<16x2xf32>
    %c368_241 = arith.constant 368 : index
    %c0_242 = arith.constant 0 : index
    %268 = vector.load %arg13[%c368_241, %c0_242] : memref<400x2xf32, #tpu.memory_space<vmem>>, vector<16x2xf32>
    tpu.vector_store %arg13[%c368_241, %c0_242], %267 {strides = array<i32>} : memref<400x2xf32, #tpu.memory_space<vmem>>, vector<16x2xf32>,
    %c0_243 = arith.constant 0 : index
    %c928 = arith.constant 928 : index
    %269 = vector.load %arg12[%c0_243, %c928] : memref<16x1056xf32, #tpu.memory_space<vmem>>, vector<16x2xf32>
    %c0_244 = arith.constant 0 : index
    %c932 = arith.constant 932 : index
    %270 = vector.load %arg12[%c0_244, %c932] : memref<16x1056xf32, #tpu.memory_space<vmem>>, vector<16x2xf32>
    %271 = arith.maximumf %269, %270 : vector<16x2xf32>
    %c0_245 = arith.constant 0 : index
    %c1040 = arith.constant 1040 : index
    %272 = vector.load %arg12[%c0_245, %c1040] : memref<16x1056xf32, #tpu.memory_space<vmem>>, vector<16x2xf32>
    %c0_246 = arith.constant 0 : index
    %c1044 = arith.constant 1044 : index
    %273 = vector.load %arg12[%c0_246, %c1044] : memref<16x1056xf32, #tpu.memory_space<vmem>>, vector<16x2xf32>
    %274 = arith.maximumf %272, %273 : vector<16x2xf32>
    %275 = arith.maximumf %271, %274 : vector<16x2xf32>
    %c384 = arith.constant 384 : index
    %c0_247 = arith.constant 0 : index
    %276 = vector.load %arg13[%c384, %c0_247] : memref<400x2xf32, #tpu.memory_space<vmem>>, vector<16x2xf32>
    tpu.vector_store %arg13[%c384, %c0_247], %275 {strides = array<i32>} : memref<400x2xf32, #tpu.memory_space<vmem>>, vector<16x2xf32>,
    %c0_248 = arith.constant 0 : index
    %c0_249 = arith.constant 0 : index
    %277 = vector.load %arg6[%c0_248, %c0_249] : memref<10x400xf32, #tpu.memory_space<vmem>>, vector<10x400xf32>
    %c0_250 = arith.constant 0 : index
    %c0_251 = arith.constant 0 : index
    %278 = vector.load %arg13[%c0_250, %c0_251] : memref<400x2xf32, #tpu.memory_space<vmem>>, vector<400x2xf32>
    %cst_252 = arith.constant dense<0.000000e+00> : vector<10x2xf32>
    %279 = tpu.matmul %277, %278, %cst_252 {dimension_numbers = #tpu.dot_dimension_numbers<[1], [0], [0], [1], [0, 0, 1, 1], [], []>} : vector<10x400xf32>, vector<400x2xf32>, vector<10x2xf32> -> vector<10x2xf32>
    %c0_253 = arith.constant 0 : index
    %c0_254 = arith.constant 0 : index
    %280 = vector.load %arg7[%c0_253, %c0_254] : memref<10x1xf32, #tpu.memory_space<vmem>>, vector<10x1xf32>
    %281 = vector.broadcast %280 : vector<10x1xf32> to vector<10x2xf32>
    %282 = arith.addf %279, %281 : vector<10x2xf32>
    %c0_255 = arith.constant 0 : index
    %c0_256 = arith.constant 0 : index
    %c0_257 = arith.constant 0 : index
    %283 = vector.load %arg8[%c0_255, %c0_256, %c0_257] : memref<1x10x2xf32, #tpu.memory_space<vmem>>, vector<1x10x2xf32>
    %284 = vector.shape_cast %283 : vector<1x10x2xf32> to vector<10x2xf32>
    %285 = vector.shape_cast %282 : vector<10x2xf32> to vector<1x10x2xf32>
    tpu.vector_store %arg8[%c0_255, %c0_256, %c0_257], %285 {strides = array<i32>} : memref<1x10x2xf32, #tpu.memory_space<vmem>>, vector<1x10x2xf32>,
    return
  }
  func.func @transform_0(%arg0: i32) -> (i32, i32, i32) {
    %c0_i32 = arith.constant 0 : i32
    %c0_i32_0 = arith.constant 0 : i32
    %c0_i32_1 = arith.constant 0 : i32
    return %arg0, %c0_i32, %c0_i32_0 : i32, i32, i32
  }
  func.func @transform_1(%arg0: i32) -> (i32, i32) {
    %c0_i32 = arith.constant 0 : i32
    %c0_i32_0 = arith.constant 0 : i32
    %c0_i32_1 = arith.constant 0 : i32
    return %c0_i32, %c0_i32_0 : i32, i32
  }
  func.func @transform_2(%arg0: i32) -> (i32, i32) {
    %c0_i32 = arith.constant 0 : i32
    %c0_i32_0 = arith.constant 0 : i32
    %c0_i32_1 = arith.constant 0 : i32
    return %c0_i32, %c0_i32_0 : i32, i32
  }
  func.func @transform_3(%arg0: i32) -> (i32, i32) {
    %c0_i32 = arith.constant 0 : i32
    %c0_i32_0 = arith.constant 0 : i32
    %c0_i32_1 = arith.constant 0 : i32
    return %c0_i32, %c0_i32_0 : i32, i32
  }
  func.func @transform_4(%arg0: i32) -> (i32, i32) {
    %c0_i32 = arith.constant 0 : i32
    %c0_i32_0 = arith.constant 0 : i32
    %c0_i32_1 = arith.constant 0 : i32
    return %c0_i32, %c0_i32_0 : i32, i32
  }
  func.func @transform_5(%arg0: i32) -> (i32, i32) {
    %c0_i32 = arith.constant 0 : i32
    %c0_i32_0 = arith.constant 0 : i32
    %c0_i32_1 = arith.constant 0 : i32
    return %c0_i32, %c0_i32_0 : i32, i32
  }
  func.func @transform_6(%arg0: i32) -> (i32, i32) {
    %c0_i32 = arith.constant 0 : i32
    %c0_i32_0 = arith.constant 0 : i32
    %c0_i32_1 = arith.constant 0 : i32
    return %c0_i32, %c0_i32_0 : i32, i32
  }
  func.func @transform_7(%arg0: i32) -> (i32, i32, i32) {
    %c0_i32 = arith.constant 0 : i32
    %c0_i32_0 = arith.constant 0 : i32
    %c0_i32_1 = arith.constant 0 : i32
    return %arg0, %c0_i32, %c0_i32_0 : i32, i32, i32
  }
}

</mosaic_0001>

<bundles_post_ra>
// kernel: convnet_forward.1
= control target key start
LH: loop header
LB: loop body
LE: loop exit
PB: predicated region body
PF: predicated region fallthrough
CT: control target
= control target key end

     0   :  { %vm167_vm0 = vcmask 1042432   ;;  %vm163_vm1 = vcmask 613376   ;;  %vm492_vm2 = vcmask 521216   ;;  %vm546_vm3 = vcmask 1031168   ;;  %s4452_s22 = smov 112   ;;  %s4453_s23 = smov 24   ;;  %s6635_s0 = inlined_call_operand.vmem [shape: f32[1,75,1600], index: 0, kind: input, shape index: {}]   ;;  %s6636_s1 = inlined_call_operand.vmem [shape: f32[6,75], index: 1, kind: input, shape index: {}]   ;;  %s6637_s2 = inlined_call_operand.vmem [shape: f32[6,1], index: 2, kind: input, shape index: {}]   ;;  %s6638_s4 = inlined_call_operand.vmem [shape: f32[16,1], index: 4, kind: input, shape index: {}]   ;;  %s6639_s3 = inlined_call_operand.vmem [shape: f32[16,150], index: 3, kind: input, shape index: {}]   ;;  %s6640_s5 = inlined_call_operand.vmem [shape: f32[10,400], index: 5, kind: input, shape index: {}]   ;;  %s6641_s6 = inlined_call_operand.vmem [shape: f32[10,1], index: 6, kind: input, shape index: {}]   ;;  %s6642_s7 = inlined_call_operand.vmem [shape: f32[1,10,2], index: 7, kind: output, shape index: {}]  }
   0x1   :  { %v144_v0 = vld [vmem:[%s6635_s0 + $0x3a8] sm:$0x7]  ;;  %v145_v1 = vld [vmem:[%s6635_s0 + $0x3b0] sm:$0x7]  ;;  %v146_v2 = vld [vmem:[%s6635_s0 + $0x3b8] sm:$0x7] }
   0x2   :  { %4359 = vmatpush.msk.msra.mxu0 %vm167_vm0, %v144_v0  ;;  %4361 = vmatpush.msk.msra.mxu1 %vm167_vm0, %v145_v1  ;;  %v147_v3 = vld [vmem:[%s6635_s0 + $0x3c0] sm:$0x7]  ;;  %v132_v5 = vld [vmem:[%s6635_s0 + $0x348] sm:$0xff]  ;;  %v133_v6 = vld [vmem:[%s6635_s0 + $0x350] sm:$0xff]  ;;  %vm624_vm4 = vcmask 588800   ;;  %s4454_s24 = smov 4  }
   0x3   :  { %v131_v4 = vld [vmem:[%s6635_s0 + $0x340] sm:$0xff]  ;;  %4363 = vmatpush.msk.msra.mxu2 %vm167_vm0, %v146_v2  ;;  %4365 = vmatpush.msk.msra.mxu3 %vm167_vm0, %v147_v3  ;;  %v134_v7 = vld [vmem:[%s6635_s0 + $0x358] sm:$0xff]  ;;  %v120_v10 = vld [vmem:[%s6635_s0 + $0x2e8] sm:$0xff]  ;;  %v4449_v2 = vmov 0   ;;  %s4455_s25 = smov 124   ;;  %s4456_s26 = smov 12  }
   0x4   :  { %v118_v8 = vld [vmem:[%s6635_s0 + $0x2d8] sm:$0xff]  ;;  %214 = vmatpush.msra.mxu0 %v131_v4  ;;  %234 = vmatpush.msra.mxu1 %v132_v5  ;;  %v119_v9 = vld [vmem:[%s6635_s0 + $0x2e0] sm:$0xff]  ;;  %v121_v11 = vld [vmem:[%s6635_s0 + $0x2f0] sm:$0xff]  ;;  %s4457_s27 = smov 120   ;;  %s4458_s28 = smov 8   ;;  %vm690_vm5 = vcmask 259072  }
   0x5   :  { %254 = vmatpush.msra.mxu2 %v133_v6  ;;  %274 = vmatpush.msra.mxu3 %v134_v7  ;;  %v105_v12 = vld [vmem:[%s6635_s0 + $0x270] sm:$0xff]  ;;  %v106_v13 = vld [vmem:[%s6635_s0 + $0x278] sm:$0xff]  ;;  %v107_v14 = vld [vmem:[%s6635_s0 + $0x280] sm:$0xff]  ;;  %s4459_s29 = smov 116   ;;  %s4460_s30 = smov 16   ;;  %vm763_vm6 = vcmask 261126  }
   0x6   :  { %215 = vmatpush.msra.mxu0 %v118_v8  ;;  %235 = vmatpush.msra.mxu1 %v119_v9  ;;  %v108_v15 = vld [vmem:[%s6635_s0 + $0x288] sm:$0xff]  ;;  %v93_v17 = vld [vmem:[%s6635_s0 + $0x210] sm:$0xff]  ;;  %v94_v18 = vld [vmem:[%s6635_s0 + $0x218] sm:$0xff]  ;;  %s4461_s8 = smov 44   ;;  %s4462_s9 = smov 32   ;;  %vm773_vm7 = vcmask 257024  }
   0x7   :  { %255 = vmatpush.msra.mxu2 %v120_v10  ;;  %275 = vmatpush.msra.mxu3 %v121_v11  ;;  %v92_v16 = vld [vmem:[%s6635_s0 + $0x208] sm:$0xff]  ;;  %v95_v19 = vld [vmem:[%s6635_s0 + $0x220] sm:$0xff]  ;;  %v81_v22 = vld [vmem:[%s6635_s0 + $0x1b0] sm:$0xff]  ;;  %s4463_s10 = smov 28   ;;  %s4464_s11 = smov 20   ;;  %vm967_vm8 = vcmask 916480  }
   0x8   :  { %216 = vmatpush.msra.mxu0 %v105_v12  ;;  %236 = vmatpush.msra.mxu1 %v106_v13  ;;  %v79_v20 = vld [vmem:[%s6635_s0 + $0x1a0] sm:$0xff]  ;;  %v80_v21 = vld [vmem:[%s6635_s0 + $0x1a8] sm:$0xff]  ;;  %v82_v23 = vld [vmem:[%s6635_s0 + $0x1b8] sm:$0xff]  ;;  %s4465_s12 = smov 48   ;;  %vm1286_vm9 = vcmask 31744   ;;  %vm737_vm10 = vcmask 1014784  }
   0x9   :  { %256 = vmatpush.msra.mxu2 %v107_v14  ;;  %276 = vmatpush.msra.mxu3 %v108_v15  ;;  %v66_v24 = vld [vmem:[%s6635_s0 + $0x138] sm:$0xff]  ;;  %v67_v25 = vld [vmem:[%s6635_s0 + $0x140] sm:$0xff]  ;;  %v68_v26 = vld [vmem:[%s6635_s0 + $0x148] sm:$0xff]  ;;  %vm820_vm11 = vcmask 982016   ;;  %vm903_vm12 = vcmask 949248   ;;  %vm1044_vm13 = vcmask 130048  }
   0xa   :  { %217 = vmatpush.msra.mxu0 %v92_v16  ;;  %237 = vmatpush.msra.mxu1 %v93_v17  ;;  %v69_v27 = vld [vmem:[%s6635_s0 + $0x150] sm:$0xff]  ;;  %v54_v29 = vld [vmem:[%s6635_s0 + $0xd8] sm:$0xff]  ;;  %v55_v30 = vld [vmem:[%s6635_s0 + $0xe0] sm:$0xff]  ;;  %vm1131_vm14 = vcmask 97280   ;;  %vm1218_vm15 = vcmask 64512   ;;  %s4466_s13 = smov 40  }
   0xb   :  { %257 = vmatpush.msra.mxu2 %v94_v18  ;;  %277 = vmatpush.msra.mxu3 %v95_v19  ;;  %v53_v28 = vld [vmem:[%s6635_s0 + $0xd0] sm:$0xff]  ;;  %v56_v31 = vld [vmem:[%s6635_s0 + $0xe8] sm:$0xff]  ;;  %v42_v34 = vld [vmem:[%s6635_s0 + $0x78] sm:$0xff]  ;;  %s4467_s14 = smov 36   ;;  %s4468_s15 = smov 64  }
   0xc   :  { %218 = vmatpush.msra.mxu0 %v79_v20  ;;  %238 = vmatpush.msra.mxu1 %v80_v21  ;;  %v40_v32 = vld [vmem:[%s6635_s0 + $0x68] sm:$0xff]  ;;  %v41_v33 = vld [vmem:[%s6635_s0 + $0x70] sm:$0xff]  ;;  %v43_v35 = vld [vmem:[%s6635_s0 + $0x80] sm:$0xff]  ;;  %s4469_s16 = smov 60   ;;  %s4470_s17 = smov 56  }
   0xd   :  { %258 = vmatpush.msra.mxu2 %v81_v22  ;;  %278 = vmatpush.msra.mxu3 %v82_v23  ;;  %v27_v36 = vld [vmem:[%s6635_s0] sm:$0xff]  ;;  %v28_v37 = vld [vmem:[%s6635_s0 + $0x8] sm:$0xff]  ;;  %v29_v38 = vld [vmem:[%s6635_s0 + $0x10] sm:$0xff] }
   0xe   :  { %219 = vmatpush.msra.mxu0 %v66_v24  ;;  %239 = vmatpush.msra.mxu1 %v67_v25  ;;  %v30_v39 = vld [vmem:[%s6635_s0 + $0x18] sm:$0xff]  ;;  %v4643_v40 = vld [vmem:[%s6636_s1] sm:$0x3f]  ;;  %v148_v41 = vld [vmem:[%s6635_s0 + $0x3c8] sm:$0x7]  ;;  %s4471_s1 = smov 52  }
   0xf   :  { %259 = vmatpush.msra.mxu2 %v68_v26  ;;  %279 = vmatpush.msra.mxu3 %v69_v27  ;;  %v149_v42 = vld [vmem:[%s6635_s0 + $0x3d0] sm:$0x7]  ;;  %v150_v43 = vld [vmem:[%s6635_s0 + $0x3d8] sm:$0x7]  ;;  %v151_v44 = vld [vmem:[%s6635_s0 + $0x3e0] sm:$0x7] }
  0x10   :  { %220 = vmatpush.msra.mxu0 %v53_v28  ;;  %240 = vmatpush.msra.mxu1 %v54_v29  ;;  %v135_v45 = vld [vmem:[%s6635_s0 + $0x360] sm:$0xff]  ;;  %v136_v46 = vld [vmem:[%s6635_s0 + $0x368] sm:$0xff]  ;;  %v137_v47 = vld [vmem:[%s6635_s0 + $0x370] sm:$0xff] }
  0x11   :  { %260 = vmatpush.msra.mxu2 %v55_v30  ;;  %280 = vmatpush.msra.mxu3 %v56_v31  ;;  %v138_v48 = vld [vmem:[%s6635_s0 + $0x378] sm:$0xff]  ;;  %v123_v50 = vld [vmem:[%s6635_s0 + $0x300] sm:$0xff]  ;;  %v124_v51 = vld [vmem:[%s6635_s0 + $0x308] sm:$0xff] }
  0x12   :  { %221 = vmatpush.msra.mxu0 %v40_v32  ;;  %241 = vmatpush.msra.mxu1 %v41_v33  ;;  %v122_v49 = vld [vmem:[%s6635_s0 + $0x2f8] sm:$0xff]  ;;  %v125_v52 = vld [vmem:[%s6635_s0 + $0x310] sm:$0xff]  ;;  %v111_v55 = vld [vmem:[%s6635_s0 + $0x2a0] sm:$0xff] }
  0x13   :  { %261 = vmatpush.msra.mxu2 %v42_v34  ;;  %281 = vmatpush.msra.mxu3 %v43_v35  ;;  %v109_v53 = vld [vmem:[%s6635_s0 + $0x290] sm:$0xff]  ;;  %v110_v54 = vld [vmem:[%s6635_s0 + $0x298] sm:$0xff]  ;;  %v112_v56 = vld [vmem:[%s6635_s0 + $0x2a8] sm:$0xff] }
  0x14   :  { %222 = vmatpush.msra.mxu0 %v27_v36  ;;  %242 = vmatpush.msra.mxu1 %v28_v37  ;;  %v96_v57 = vld [vmem:[%s6635_s0 + $0x228] sm:$0xff]  ;;  %v97_v58 = vld [vmem:[%s6635_s0 + $0x230] sm:$0xff]  ;;  %v98_v59 = vld [vmem:[%s6635_s0 + $0x238] sm:$0xff] }
  0x15   :  { %262 = vmatpush.msra.mxu2 %v29_v38  ;;  %282 = vmatpush.msra.mxu3 %v30_v39  ;;  %v99_v60 = vld [vmem:[%s6635_s0 + $0x240] sm:$0xff]  ;;  %v84_v62 = vld [vmem:[%s6635_s0 + $0x1c8] sm:$0xff]  ;;  %v85_v63 = vld [vmem:[%s6635_s0 + $0x1d0] sm:$0xff] }
  0x16   :  { %4360 = vmatmul.msk.f32.vlgmr.msra.gmra.mxu0 %vm163_vm1, %v4643_v40  ;;  %4362 = vmatmul.msk.f32.vlgmr.msra.gmra.mxu1 %vm163_vm1, %v4643_v40  ;;  %v83_v61 = vld [vmem:[%s6635_s0 + $0x1c0] sm:$0xff]  ;;  %v86_v0 = vld [vmem:[%s6635_s0 + $0x1d8] sm:$0xff]  ;;  %v72_v5 = vld [vmem:[%s6635_s0 + $0x168] sm:$0xff] }
  0x17   :  { %4364 = vmatmul.msk.f32.vlgmr.msra.gmra.mxu2 %vm163_vm1, %v4643_v40  ;;  %4366 = vmatmul.msk.f32.vlgmr.msra.gmra.mxu3 %vm163_vm1, %v4643_v40  ;;  %v157_v1 = vld [vmem:[%s6637_s2] sm:$0x3f]  ;;  %v70_v3 = vld [vmem:[%s6635_s0 + $0x158] sm:$0xff]  ;;  %v73_v6 = vld [vmem:[%s6635_s0 + $0x170] sm:$0xff]  ;;  %s4451_s2 = smov 72  }
  0x18   :  { %4367 = vmatpush.msk.msrb.mxu0 %vm167_vm0, %v148_v41  ;;  %4369 = vmatpush.msk.msrb.mxu1 %vm167_vm0, %v149_v42  ;;  %v71_v4 = vld [vmem:[%s6635_s0 + $0x160] sm:$0xff]  ;;  %v57_v7 = vld [vmem:[%s6635_s0 + $0xf0] sm:$0xff]  ;;  %v58_v8 = vld [vmem:[%s6635_s0 + $0xf8] sm:$0xff] }
  0x19   :  { %4371 = vmatpush.msk.msrb.mxu2 %vm167_vm0, %v150_v43  ;;  %4373 = vmatpush.msk.msrb.mxu3 %vm167_vm0, %v151_v44  ;;  %v59_v9 = vld [vmem:[%s6635_s0 + $0x100] sm:$0xff]  ;;  %v60_v10 = vld [vmem:[%s6635_s0 + $0x108] sm:$0xff]  ;;  %v45_v12 = vld [vmem:[%s6635_s0 + $0x90] sm:$0xff] }
  0x1a   :  { %294 = vmatpush.msrb.mxu0 %v135_v45  ;;  %314 = vmatpush.msrb.mxu1 %v136_v46  ;;  %v44_v11 = vld [vmem:[%s6635_s0 + $0x88] sm:$0xff]  ;;  %v46_v13 = vld [vmem:[%s6635_s0 + $0x98] sm:$0xff]  ;;  %v47_v14 = vld [vmem:[%s6635_s0 + $0xa0] sm:$0xff] }
  0x1b   :  { %334 = vmatpush.msrb.mxu2 %v137_v47  ;;  %354 = vmatpush.msrb.mxu3 %v138_v48  ;;  %v31_v15 = vld [vmem:[%s6635_s0 + $0x20] sm:$0xff]  ;;  %v32_v16 = vld [vmem:[%s6635_s0 + $0x28] sm:$0xff]  ;;  %v33_v17 = vld [vmem:[%s6635_s0 + $0x30] sm:$0xff] }
  0x1c   :  { %295 = vmatpush.msrb.mxu0 %v122_v49  ;;  %315 = vmatpush.msrb.mxu1 %v123_v50  ;;  %v34_v18 = vld [vmem:[%s6635_s0 + $0x38] sm:$0xff]  ;;  %v152_v19 = vld [vmem:[%s6635_s0 + $0x3e8] sm:$0x7]  ;;  %v153_v20 = vld [vmem:[%s6635_s0 + $0x3f0] sm:$0x7] }
  0x1d   :  { %335 = vmatpush.msrb.mxu2 %v124_v51  ;;  %355 = vmatpush.msrb.mxu3 %v125_v52  ;;  %v154_v21 = vld [vmem:[%s6635_s0 + $0x3f8] sm:$0x7]  ;;  %v155_v22 = vld [vmem:[%s6635_s0 + $0x400] sm:$0x7]  ;;  %v140_v24 = vld [vmem:[%s6635_s0 + $0x388] sm:$0xff] }
  0x1e   :  { %296 = vmatpush.msrb.mxu0 %v109_v53  ;;  %316 = vmatpush.msrb.mxu1 %v110_v54  ;;  %v139_v23 = vld [vmem:[%s6635_s0 + $0x380] sm:$0xff]  ;;  %v141_v25 = vld [vmem:[%s6635_s0 + $0x390] sm:$0xff]  ;;  %v142_v26 = vld [vmem:[%s6635_s0 + $0x398] sm:$0xff] }
  0x1f   :  { %336 = vmatpush.msrb.mxu2 %v111_v55  ;;  %356 = vmatpush.msrb.mxu3 %v112_v56  ;;  %v126_v27 = vld [vmem:[%s6635_s0 + $0x318] sm:$0xff]  ;;  %v127_v28 = vld [vmem:[%s6635_s0 + $0x320] sm:$0xff]  ;;  %v128_v29 = vld [vmem:[%s6635_s0 + $0x328] sm:$0xff] }
  0x20   :  { %297 = vmatpush.msrb.mxu0 %v96_v57  ;;  %317 = vmatpush.msrb.mxu1 %v97_v58  ;;  %v129_v30 = vld [vmem:[%s6635_s0 + $0x330] sm:$0xff]  ;;  %v114_v32 = vld [vmem:[%s6635_s0 + $0x2b8] sm:$0xff]  ;;  %v115_v33 = vld [vmem:[%s6635_s0 + $0x2c0] sm:$0xff] }
  0x21   :  { %337 = vmatpush.msrb.mxu2 %v98_v59  ;;  %357 = vmatpush.msrb.mxu3 %v99_v60  ;;  %v113_v31 = vld [vmem:[%s6635_s0 + $0x2b0] sm:$0xff]  ;;  %v116_v34 = vld [vmem:[%s6635_s0 + $0x2c8] sm:$0xff]  ;;  %v102_v37 = vld [vmem:[%s6635_s0 + $0x258] sm:$0xff] }
  0x22   :  { %4441 = vset.pattern.permute.xlu0 %v4449_v2  ;;  %298 = vmatpush.msrb.mxu0 %v83_v61  ;;  %v100_v35 = vld [vmem:[%s6635_s0 + $0x248] sm:$0xff]  ;;  %v101_v36 = vld [vmem:[%s6635_s0 + $0x250] sm:$0xff]  ;;  %v103_v38 = vld [vmem:[%s6635_s0 + $0x260] sm:$0xff] }
  0x23   :  { %318 = vmatpush.msrb.mxu1 %v84_v62  ;;  %338 = vmatpush.msrb.mxu2 %v85_v63  ;;  %v87_v39 = vld [vmem:[%s6635_s0 + $0x1e0] sm:$0xff]  ;;  %v88_v41 = vld [vmem:[%s6635_s0 + $0x1e8] sm:$0xff]  ;;  %v89_v42 = vld [vmem:[%s6635_s0 + $0x1f0] sm:$0xff] }
  0x24   :  { %358 = vmatpush.msrb.mxu3 %v86_v0  ;;  %160 = vperm.xlu0 %4441, %v157_v1   ;;  %v90_v43 = vld [vmem:[%s6635_s0 + $0x1f8] sm:$0xff]  ;;  %v75_v45 = vld [vmem:[%s6635_s0 + $0x180] sm:$0xff]  ;;  %v76_v46 = vld [vmem:[%s6635_s0 + $0x188] sm:$0xff] }
  0x25   :  { %299 = vmatpush.msrb.mxu0 %v70_v3  ;;  %319 = vmatpush.msrb.mxu1 %v71_v4  ;;  %v74_v44 = vld [vmem:[%s6635_s0 + $0x178] sm:$0xff]  ;;  %v77_v47 = vld [vmem:[%s6635_s0 + $0x190] sm:$0xff]  ;;  %v63_v50 = vld [vmem:[%s6635_s0 + $0x120] sm:$0xff] }
  0x26   :  { %339 = vmatpush.msrb.mxu2 %v72_v5  ;;  %359 = vmatpush.msrb.mxu3 %v73_v6  ;;  %v61_v48 = vld [vmem:[%s6635_s0 + $0x110] sm:$0xff]  ;;  %v62_v49 = vld [vmem:[%s6635_s0 + $0x118] sm:$0xff]  ;;  %v64_v51 = vld [vmem:[%s6635_s0 + $0x128] sm:$0xff] }
  0x27   :  { %300 = vmatpush.msrb.mxu0 %v57_v7  ;;  %320 = vmatpush.msrb.mxu1 %v58_v8  ;;  %v48_v52 = vld [vmem:[%s6635_s0 + $0xa8] sm:$0xff]  ;;  %v49_v53 = vld [vmem:[%s6635_s0 + $0xb0] sm:$0xff]  ;;  %v50_v54 = vld [vmem:[%s6635_s0 + $0xb8] sm:$0xff] }
  0x28   :  { %340 = vmatpush.msrb.mxu2 %v59_v9  ;;  %360 = vmatpush.msrb.mxu3 %v60_v10  ;;  %v51_v55 = vld [vmem:[%s6635_s0 + $0xc0] sm:$0xff]  ;;  %v36_v57 = vld [vmem:[%s6635_s0 + $0x48] sm:$0xff]  ;;  %v37_v58 = vld [vmem:[%s6635_s0 + $0x50] sm:$0xff] }
  0x29   :  { %301 = vmatpush.msrb.mxu0 %v44_v11  ;;  %321 = vmatpush.msrb.mxu1 %v45_v12  ;;  %v35_v56 = vld [vmem:[%s6635_s0 + $0x40] sm:$0xff]  ;;  %v38_v59 = vld [vmem:[%s6635_s0 + $0x58] sm:$0xff]  ;;  %v156_v60 = vld [vmem:[%s6635_s0 + $0x408] sm:$0x7] }
  0x2a   :  { %341 = vmatpush.msrb.mxu2 %v46_v13  ;;  %361 = vmatpush.msrb.mxu3 %v47_v14  ;;  %v143_v61 = vld [vmem:[%s6635_s0 + $0x3a0] sm:$0xff]  ;;  %v130_v62 = vld [vmem:[%s6635_s0 + $0x338] sm:$0xff]  ;;  %v117_v63 = vld [vmem:[%s6635_s0 + $0x2d0] sm:$0xff] }
  0x2b   :  { %302 = vmatpush.msrb.mxu0 %v31_v15  ;;  %322 = vmatpush.msrb.mxu1 %v32_v16  ;;  %v104_v0 = vld [vmem:[%s6635_s0 + $0x268] sm:$0xff]  ;;  %v91_v1 = vld [vmem:[%s6635_s0 + $0x200] sm:$0xff]  ;;  %v65_v3 = vld [vmem:[%s6635_s0 + $0x130] sm:$0xff] }
  0x2c   :  { %342 = vmatpush.msrb.mxu2 %v33_v17  ;;  %362 = vmatpush.msrb.mxu3 %v34_v18  ;;  %v52_v4 = vld [vmem:[%s6635_s0 + $0xc8] sm:$0xff]  ;;  %v39_v5 = vld [vmem:[%s6635_s0 + $0x60] sm:$0xff] }
  0x2d   :  { %4368 = vmatmul.msk.f32.vlgmr.msrb.gmra.mxu0 %vm163_vm1, %v4643_v40  ;;  %4370 = vmatmul.msk.f32.vlgmr.msrb.gmra.mxu1 %vm163_vm1, %v4643_v40 }
  0x2e   :  { %4372 = vmatmul.msk.f32.vlgmr.msrb.gmra.mxu2 %vm163_vm1, %v4643_v40  ;;  %4374 = vmatmul.msk.f32.vlgmr.msrb.gmra.mxu3 %vm163_vm1, %v4643_v40 }
  0x2f   :  { %4375 = vmatpush.msk.msra.mxu0 %vm167_vm0, %v152_v19  ;;  %4377 = vmatpush.msk.msra.mxu1 %vm167_vm0, %v153_v20 }
  0x30   :  { %4379 = vmatpush.msk.msra.mxu2 %vm167_vm0, %v154_v21  ;;  %4381 = vmatpush.msk.msra.mxu3 %vm167_vm0, %v155_v22 }
  0x31   :  { %374 = vmatpush.msra.mxu0 %v139_v23  ;;  %394 = vmatpush.msra.mxu1 %v140_v24 }
  0x32   :  { %414 = vmatpush.msra.mxu2 %v141_v25  ;;  %434 = vmatpush.msra.mxu3 %v142_v26 }
  0x33   :  { %375 = vmatpush.msra.mxu0 %v126_v27  ;;  %395 = vmatpush.msra.mxu1 %v127_v28 }
  0x34   :  { %415 = vmatpush.msra.mxu2 %v128_v29  ;;  %435 = vmatpush.msra.mxu3 %v129_v30 }
  0x35   :  { %376 = vmatpush.msra.mxu0 %v113_v31  ;;  %396 = vmatpush.msra.mxu1 %v114_v32 }
  0x36   :  { %416 = vmatpush.msra.mxu2 %v115_v33  ;;  %436 = vmatpush.msra.mxu3 %v116_v34 }
  0x37   :  { %377 = vmatpush.msra.mxu0 %v100_v35  ;;  %397 = vmatpush.msra.mxu1 %v101_v36 }
  0x38   :  { %417 = vmatpush.msra.mxu2 %v102_v37  ;;  %437 = vmatpush.msra.mxu3 %v103_v38 }
  0x39   :  { %378 = vmatpush.msra.mxu0 %v87_v39  ;;  %398 = vmatpush.msra.mxu1 %v88_v41 }
  0x3a   :  { %418 = vmatpush.msra.mxu2 %v89_v42  ;;  %438 = vmatpush.msra.mxu3 %v90_v43 }
  0x3b   :  { %379 = vmatpush.msra.mxu0 %v74_v44  ;;  %399 = vmatpush.msra.mxu1 %v75_v45 }
  0x3c   :  { %419 = vmatpush.msra.mxu2 %v76_v46  ;;  %439 = vmatpush.msra.mxu3 %v77_v47 }
  0x3d   :  { %380 = vmatpush.msra.mxu0 %v61_v48  ;;  %400 = vmatpush.msra.mxu1 %v62_v49 }
  0x3e   :  { %420 = vmatpush.msra.mxu2 %v63_v50  ;;  %440 = vmatpush.msra.mxu3 %v64_v51 }
  0x3f   :  { %381 = vmatpush.msra.mxu0 %v48_v52  ;;  %401 = vmatpush.msra.mxu1 %v49_v53 }
  0x40   :  { %421 = vmatpush.msra.mxu2 %v50_v54  ;;  %441 = vmatpush.msra.mxu3 %v51_v55 }
  0x41   :  { %382 = vmatpush.msra.mxu0 %v35_v56  ;;  %402 = vmatpush.msra.mxu1 %v36_v57 }
  0x42   :  { %422 = vmatpush.msra.mxu2 %v37_v58  ;;  %442 = vmatpush.msra.mxu3 %v38_v59 }
  0x43   :  { %4376 = vmatmul.msk.f32.vlgmr.msra.gmra.mxu0 %vm163_vm1, %v4643_v40  ;;  %4378 = vmatmul.msk.f32.vlgmr.msra.gmra.mxu1 %vm163_vm1, %v4643_v40 }
  0x44   :  { %4380 = vmatmul.msk.f32.vlgmr.msra.gmra.mxu2 %vm163_vm1, %v4643_v40  ;;  %4382 = vmatmul.msk.f32.vlgmr.msra.gmra.mxu3 %vm163_vm1, %v4643_v40 }
  0x45   :  { %4383 = vmatpush.msk.msrb.mxu0 %vm167_vm0, %v156_v60  ;;  %4442 = vset.pattern.permute.xlu2 %v4449_v2  ;;  %v78_v2 = vld [vmem:[%s6635_s0 + $0x198] sm:$0xff]  ;;  %s4450_s0 = smov 126   ;;  %vm1413_vm0 = vcmask 261120  }
  0x47   :  { %454 = vmatpush.msrb.mxu0 %v143_v61 }
  0x49   :  { %455 = vmatpush.msrb.mxu0 %v130_v62 }
  0x4b   :  { %456 = vmatpush.msrb.mxu0 %v117_v63 }
  0x4d   :  { %457 = vmatpush.msrb.mxu0 %v104_v0 }
  0x4f   :  { %458 = vmatpush.msrb.mxu0 %v91_v1 }
  0x51   :  { %459 = vmatpush.msrb.mxu0 %v78_v2 }
  0x53   :  { %460 = vmatpush.msrb.mxu0 %v65_v3 }
  0x55   :  { %461 = vmatpush.msrb.mxu0 %v52_v4 }
  0x57   :  { %462 = vmatpush.msrb.mxu0 %v39_v5 }
  0x58   :  { %4384 = vmatmul.msk.f32.vlgmr.msrb.gmra.mxu0 %vm163_vm1, %v4643_v40  ;;  %vm1567_vm1 = vcmask 195584  }
  0x93   :  { %v224_v6 = vpop.f32.mrf.mxu0  ;;  %v244_v7 = vpop.f32.mrf.mxu1 }
  0x96   :  { %v4955_v8 = vpop.permute.xlu0 %160 }
  0x97   :  { %v225_v9 = vadd.f32 %v224_v6, %v4955_v8  ;;  %v245_v10 = vadd.f32 %v244_v7, %v4955_v8 }
  0x99   :  { %v467_v11 = vmax.f32 %v225_v9, 0.0  ;;  %v468_v12 = vmax.f32 %v245_v10, 0.0 }
  0x9a   :  { %v264_v13 = vpop.f32.mrf.mxu2  ;;  %v284_v14 = vpop.f32.mrf.mxu3 }
  0x9b   :  { %480 = vst [vmem:[#allocation2] sm:$0x3f] %v467_v11  ;;  %v265_v15 = vadd.f32 %v264_v13, %v4955_v8  ;;  %v285_v16 = vadd.f32 %v284_v14, %v4955_v8 }
  0x9c   :  { %481 = vst [vmem:[#allocation2 + $0x8] sm:$0x3f] %v468_v12 }
  0x9d   :  { %v469_v17 = vmax.f32 %v265_v15, 0.0  ;;  %v470_v40 = vmax.f32 %v285_v16, 0.0 }
  0x9f   :  { %482 = vst [vmem:[#allocation2 + $0x10] sm:$0x3f] %v469_v17 }
  0xa0   :  { %483 = vst [vmem:[#allocation2 + $0x18] sm:$0x3f] %v470_v40 }
  0xa2   :  { %v4961_v18 = vld [vmem:[#allocation2] sm:$0x3f] }
  0xa3   :  { %v4963_v19 = vld [vmem:[#allocation2 + $0x8] sm:$0x3f]  ;;  %520 = vrot.lane.b32.xlu0 %v4961_v18, %s4450_s0 }
  0xa4   :  { %522 = vrot.lane.b32.xlu1 %v4963_v19, %s4450_s0 }
  0xa6   :  { %v4975_v25 = vld [vmem:[#allocation2 + $0x10] sm:$0x3f] }
  0xa7   :  { %v4969_v20 = vld [vmem:[#allocation2 + $0x18] sm:$0x3f] }
  0xa8   :  { %526 = vrot.lane.b32.xlu2 %v4969_v20, %s4450_s0 }
  0xaa   :  { %v304_v21 = vpop.f32.mrf.mxu0  ;;  %v324_v22 = vpop.f32.mrf.mxu1 }
  0xab   :  { %v305_v23 = vadd.f32 %v304_v21, %v4955_v8  ;;  %v325_v24 = vadd.f32 %v324_v22, %v4955_v8 }
  0xac   :  { %524 = vrot.lane.b32.xlu1 %v4975_v25, %s4450_s0 }
  0xad   :  { %v471_v26 = vmax.f32 %v305_v23, 0.0  ;;  %v472_v27 = vmax.f32 %v325_v24, 0.0 }
  0xaf   :  { %484 = vst [vmem:[#allocation2 + $0x20] sm:$0x3f] %v471_v26 }
  0xb0   :  { %485 = vst [vmem:[#allocation2 + $0x28] sm:$0x3f] %v472_v27 }
  0xb1   :  { %v344_v28 = vpop.f32.mrf.mxu2  ;;  %v364_v29 = vpop.f32.mrf.mxu3 }
  0xb2   :  { %v345_v30 = vadd.f32 %v344_v28, %v4955_v8  ;;  %v365_v31 = vadd.f32 %v364_v29, %v4955_v8 }
  0xb4   :  { %v473_v32 = vmax.f32 %v345_v30, 0.0  ;;  %v474_v33 = vmax.f32 %v365_v31, 0.0 }
  0xb6   :  { %486 = vst [vmem:[#allocation2 + $0x30] sm:$0x3f] %v473_v32  ;;  %v498_v34 = vld [vmem:[#allocation2 + $0x20] sm:$0x3f] }
  0xb7   :  { %487 = vst [vmem:[#allocation2 + $0x38] sm:$0x3f] %v474_v33  ;;  %528 = vrot.lane.b32.xlu2 %v498_v34, %s4450_s0  ;;  %v4982_v35 = vld [vmem:[#allocation2 + $0x28] sm:$0x3f] }
  0xb8   :  { %530 = vrot.lane.b32.xlu0 %v4982_v35, %s4450_s0 }
  0xbd   :  { %v4986_v36 = vld [vmem:[#allocation2 + $0x30] sm:$0x3f] }
  0xbe   :  { %532 = vrot.lane.b32.xlu1 %v4986_v36, %s4450_s0  ;;  %v4990_v37 = vld [vmem:[#allocation2 + $0x38] sm:$0x3f] }
  0xbf   :  { %534 = vrot.lane.b32.xlu2 %v4990_v37, %s4450_s0 }
  0xc0   :  { %v404_v38 = vpop.f32.mrf.mxu1  ;;  %v384_v39 = vpop.f32.mrf.mxu0 }
  0xc1   :  { %v405_v41 = vadd.f32 %v404_v38, %v4955_v8  ;;  %v385_v42 = vadd.f32 %v384_v39, %v4955_v8 }
  0xc3   :  { %v476_v43 = vmax.f32 %v405_v41, 0.0  ;;  %v475_v44 = vmax.f32 %v385_v42, 0.0 }
  0xc5   :  { %489 = vst [vmem:[#allocation2 + $0x48] sm:$0x3f] %v476_v43 }
  0xc6   :  { %488 = vst [vmem:[#allocation2 + $0x40] sm:$0x3f] %v475_v44 }
  0xc7   :  { %v424_v45 = vpop.f32.mrf.mxu2  ;;  %v444_v46 = vpop.f32.mrf.mxu3 }
  0xc8   :  { %v425_v47 = vadd.f32 %v424_v45, %v4955_v8  ;;  %v445_v48 = vadd.f32 %v444_v46, %v4955_v8 }
  0xca   :  { %v477_v49 = vmax.f32 %v425_v47, 0.0  ;;  %v478_v50 = vmax.f32 %v445_v48, 0.0 }
  0xcc   :  { %490 = vst [vmem:[#allocation2 + $0x50] sm:$0x3f] %v477_v49  ;;  %v503_v51 = vld [vmem:[#allocation2 + $0x48] sm:$0x3f] }
  0xcd   :  { %491 = vst [vmem:[#allocation2 + $0x58] sm:$0x3f] %v478_v50  ;;  %538 = vrot.lane.b32.xlu1 %v503_v51, %s4450_s0  ;;  %v502_v52 = vld [vmem:[#allocation2 + $0x40] sm:$0x3f] }
  0xce   :  { %536 = vrot.lane.b32.xlu0 %v502_v52, %s4450_s0 }
  0xd3   :  { %v504_v53 = vld [vmem:[#allocation2 + $0x50] sm:$0x3f] }
  0xd4   :  { %540 = vrot.lane.b32.xlu2 %v504_v53, %s4450_s0  ;;  %v505_v55 = vld [vmem:[#allocation2 + $0x58] sm:$0x3f] }
  0xd5   :  { %v464_v54 = vpop.f32.mrf.mxu0 }
  0xd6   :  { %v465_v56 = vadd.f32 %v464_v54, %v4955_v8  ;;  %542 = vrot.lane.b32.xlu0 %v505_v55, %s4450_s0 }
  0xd8   :  { %v479_v57 = vmax.f32 %v465_v56, 0.0 }
  0xda   :  { %493 = vst.msk [vmem:[#allocation2 + $0x60] sm:$0x3f] %vm492_vm2, %v479_v57  ;;  %vm1499_vm2 = vcmask 228352  }
  0xe1   :  { %v506_v58 = vld [vmem:[#allocation2 + $0x60] sm:$0x3f] }
  0xe2   :  { %544 = vrot.lane.b32.xlu1 %v506_v58, %s4450_s0 }
 0x102   :  { %v527_v59 = vpop.permute.xlu2 %526 }
 0x111   :  { %v529_v0 = vpop.permute.xlu2 %528 }
 0x112   :  { %v550_v1 = vsel %vm546_vm3, %v527_v59, %v529_v0 }
 0x113   :  { %v5013_v7 = vmax.f32 %v4969_v20, %v550_v1 }
 0x115   :  { %v521_v60 = vpop.permute.xlu0 %520 }
 0x116   :  { %v523_v61 = vpop.permute.xlu1 %522 }
 0x117   :  { %v547_v62 = vsel %vm546_vm3, %v521_v60, %v523_v61 }
 0x118   :  { %v571_v63 = vmax.f32 %v4961_v18, %v547_v62 }
 0x119   :  { %v535_v11 = vpop.permute.xlu2 %534 }
 0x11a   :  { %598 = vrot.lane.b32.xlu2 %v571_v63, %s4451_s2 }
 0x11e   :  { %v525_v2 = vpop.permute.xlu1 %524 }
 0x11f   :  { %v548_v3 = vsel %vm546_vm3, %v523_v61, %v525_v2  ;;  %v549_v4 = vsel %vm546_vm3, %v525_v2, %v527_v59 }
 0x120   :  { %v573_v5 = vmax.f32 %v4975_v25, %v549_v4  ;;  %v572_v6 = vmax.f32 %v4963_v19, %v548_v3 }
 0x122   :  { %602 = vrot.lane.b32.xlu1 %v573_v5, %s4451_s2  ;;  %600 = vrot.lane.b32.xlu0 %v572_v6, %s4451_s2 }
 0x123   :  { %604 = vrot.lane.b32.xlu2 %v5013_v7, %s4451_s2 }
 0x12a   :  { %v531_v8 = vpop.permute.xlu0 %530 }
 0x12b   :  { %v551_v9 = vsel %vm546_vm3, %v529_v0, %v531_v8 }
 0x12c   :  { %v5020_v10 = vmax.f32 %v498_v34, %v551_v9 }
 0x12e   :  { %606 = vrot.lane.b32.xlu0 %v5020_v10, %s4451_s2  ;;  %v541_v17 = vpop.permute.xlu2 %540 }
 0x130   :  { %v533_v12 = vpop.permute.xlu1 %532 }
 0x131   :  { %v552_v13 = vsel %vm546_vm3, %v531_v8, %v533_v12  ;;  %v553_v14 = vsel %vm546_vm3, %v533_v12, %v535_v11 }
 0x132   :  { %v5027_v15 = vmax.f32 %v4986_v36, %v553_v14  ;;  %v5030_v16 = vmax.f32 %v4982_v35, %v552_v13 }
 0x134   :  { %610 = vrot.lane.b32.xlu2 %v5027_v15, %s4451_s2  ;;  %608 = vrot.lane.b32.xlu1 %v5030_v16, %s4451_s2 }
 0x13f   :  { %v539_v40 = vpop.permute.xlu1 %538 }
 0x140   :  { %v556_v18 = vsel %vm546_vm3, %v539_v40, %v541_v17  ;;  %v537_v19 = vpop.permute.xlu0 %536 }
 0x141   :  { %v554_v20 = vsel %vm546_vm3, %v535_v11, %v537_v19  ;;  %v555_v21 = vsel %vm546_vm3, %v537_v19, %v539_v40  ;;  %v5039_v22 = vmax.f32 %v503_v51, %v556_v18 }
 0x142   :  { %v5041_v23 = vmax.f32 %v502_v52, %v555_v21  ;;  %v5044_v24 = vmax.f32 %v4990_v37, %v554_v20 }
 0x143   :  { %616 = vrot.lane.b32.xlu2 %v5039_v22, %s4451_s2 }
 0x144   :  { %614 = vrot.lane.b32.xlu1 %v5041_v23, %s4451_s2  ;;  %612 = vrot.lane.b32.xlu0 %v5044_v24, %s4451_s2 }
 0x148   :  { %v543_v25 = vpop.permute.xlu0 %542 }
 0x149   :  { %v557_v26 = vsel %vm546_vm3, %v541_v17, %v543_v25 }
 0x14a   :  { %v5053_v27 = vmax.f32 %v504_v53, %v557_v26 }
 0x14c   :  { %618 = vrot.lane.b32.xlu0 %v5053_v27, %s4451_s2 }
 0x154   :  { %v545_v28 = vpop.permute.xlu1 %544 }
 0x155   :  { %v558_v29 = vsel %vm546_vm3, %v543_v25, %v545_v28  ;;  %v584_v30 = vmax.f32 %v506_v58, %v545_v28  ;;  %vm6643_vm3 = vcmask 359424  }
 0x156   :  { %v5058_v31 = vmax.f32 %v505_v55, %v558_v29 }
 0x157   :  { %622 = vrot.lane.b32.xlu2 %v584_v30, %s4451_s2 }
 0x158   :  { %620 = vrot.lane.b32.xlu1 %v5058_v31, %s4451_s2 }
 0x174   :  { %v599_v32 = vpop.permute.xlu2 %598 }
 0x17d   :  { %v605_v33 = vpop.permute.xlu2 %604 }
 0x18e   :  { %v611_v49 = vpop.permute.xlu2 %610 }
 0x194   :  { %v603_v34 = vpop.permute.xlu1 %602  ;;  %v601_v35 = vpop.permute.xlu0 %600 }
 0x195   :  { %v627_v36 = vsel %vm624_vm4, %v603_v34, %v605_v33  ;;  %v625_v37 = vsel %vm624_vm4, %v599_v32, %v601_v35  ;;  %v626_v38 = vsel %vm624_vm4, %v601_v35, %v603_v34 }
 0x196   :  { %v651_v39 = vmax.f32 %v573_v5, %v627_v36  ;;  %v649_v41 = vmax.f32 %v571_v63, %v625_v37  ;;  %v650_v42 = vmax.f32 %v572_v6, %v626_v38 }
 0x198   :  { %663 = vst [vmem:[#allocation3 + $0x58] sm:$0x3f] %v651_v39 }
 0x199   :  { %661 = vst [vmem:[#allocation3 + $0x30] sm:$0x3f] %v649_v41 }
 0x19a   :  { %662 = vst [vmem:[#allocation3] sm:$0x3f] %v650_v42 }
 0x19d   :  { %v617_v2 = vpop.permute.xlu2 %616 }
 0x19f   :  { %v933_v56 = vld [vmem:[#allocation3 + $0x58] sm:$0x3f] }
 0x1a0   :  { %v607_v43 = vpop.permute.xlu0 %606  ;;  %v931_v44 = vld [vmem:[#allocation3 + $0x30] sm:$0x3f]  ;;  %v1248_v21 = vld [vmem:[#allocation3 + $0x58] sm:$0x3f] }
 0x1a1   :  { %v628_v45 = vsel %vm624_vm4, %v605_v33, %v607_v43  ;;  %v1527_v46 = vld [vmem:[#allocation3] sm:$0x3f]  ;;  %949 = vrot.lane.b32.xlu0 %v931_v44, %s4452_s22  ;;  %v1246_v55 = vld [vmem:[#allocation3 + $0x30] sm:$0x3f]  ;;  %v1840_v26 = vld [vmem:[#allocation3 + $0x58] sm:$0x3f] }
 0x1a2   :  { %v932_v47 = vld [vmem:[#allocation3] sm:$0x3f]  ;;  %v652_v48 = vmax.f32 %v5013_v7, %v628_v45  ;;  %1547 = vrot.lane.b32.xlu2 %v1527_v46, %s4453_s23  ;;  %v692_v58 = vld [vmem:[#allocation3 + $0x30] sm:$0x3f]  ;;  %v694_v35 = vld [vmem:[#allocation3 + $0x58] sm:$0x3f] }
 0x1a3   :  { %951 = vrot.lane.b32.xlu1 %v932_v47, %s4452_s22  ;;  %v1247_v57 = vld [vmem:[#allocation3] sm:$0x3f]  ;;  %v710_v61 = vrot.slane %v692_v58, 2  ;;  %v775_v1 = vld [vmem:[#allocation3 + $0x30] sm:$0x3f]  ;;  %v712_v38 = vrot.slane %v694_v35, 2 }
 0x1a4   :  { %664 = vst [vmem:[#allocation3 + $0x18] sm:$0x3f] %v652_v48  ;;  %v1082_v59 = vld [vmem:[#allocation3] sm:$0x3f]  ;;  %v1168_v3 = vld [vmem:[#allocation3 + $0x30] sm:$0x3f] }
 0x1a5   :  { %v693_v60 = vld [vmem:[#allocation3] sm:$0x3f]  ;;  %v1102_v62 = vrot.slane %v1082_v59, 4  ;;  %v1188_v14 = vrot.slane %v1168_v3, 6  ;;  %v994_v34 = vld [vmem:[#allocation3 + $0x30] sm:$0x3f] }
 0x1a6   :  { %v609_v50 = vpop.permute.xlu1 %608  ;;  %v711_v63 = vrot.slane %v693_v60, 2  ;;  %v776_v0 = vld [vmem:[#allocation3] sm:$0x3f]  ;;  %v1081_v36 = vld [vmem:[#allocation3 + $0x30] sm:$0x3f]  ;;  %v1014_v37 = vrot.slane %v994_v34, 2 }
 0x1a7   :  { %v629_v51 = vsel %vm624_vm4, %v607_v43, %v609_v50  ;;  %v630_v52 = vsel %vm624_vm4, %v609_v50, %v611_v49  ;;  %v794_v6 = vrot.slane %v776_v0, 4  ;;  %v859_v17 = vld [vmem:[#allocation3] sm:$0x3f]  ;;  %v1101_v39 = vrot.slane %v1081_v36, 4  ;;  %v777_v42 = vld [vmem:[#allocation3 + $0x58] sm:$0x3f] }
 0x1a8   :  { %v653_v53 = vmax.f32 %v5020_v10, %v629_v51  ;;  %v654_v54 = vmax.f32 %v5030_v16, %v630_v52  ;;  %v793_v10 = vrot.slane %v775_v1, 4  ;;  %v858_v16 = vld [vmem:[#allocation3 + $0x30] sm:$0x3f]  ;;  %v877_v20 = vrot.slane %v859_v17, 6  ;;  %v1169_v41 = vld [vmem:[#allocation3] sm:$0x3f] }
 0x1a9   :  { %1266 = vrot.lane.b32.xlu0 %v1246_v55, %s4454_s24  ;;  %v1368_v43 = vld [vmem:[#allocation3] sm:$0x3f]  ;;  %v795_v44 = vrot.slane %v777_v42, 4  ;;  %v860_v45 = vld [vmem:[#allocation3 + $0x58] sm:$0x3f] }
 0x1aa   :  { %665 = vst [vmem:[#allocation3 + $0x50] sm:$0x3f] %v653_v53  ;;  %953 = vrot.lane.b32.xlu2 %v933_v56, %s4452_s22  ;;  %v1449_v46 = vld [vmem:[#allocation3] sm:$0x3f]  ;;  %v878_v47 = vrot.slane %v860_v45, 6 }
 0x1ab   :  { %1268 = vrot.lane.b32.xlu1 %v1247_v57, %s4454_s24  ;;  %666 = vst [vmem:[#allocation3 + $0x20] sm:$0x3f] %v654_v54  ;;  %v934_v25 = vld [vmem:[#allocation3 + $0x18] sm:$0x3f]  ;;  %v1469_v48 = vrot.slane %v1449_v46, 6 }
 0x1ac   :  { %v996_v51 = vld [vmem:[#allocation3 + $0x58] sm:$0x3f]  ;;  %v1595_v57 = vld [vmem:[#allocation3] sm:$0x3f] }
 0x1ad   :  { %v1016_v53 = vrot.slane %v996_v51, 2  ;;  %v1528_v54 = vld [vmem:[#allocation3 + $0x58] sm:$0x3f]  ;;  %v1682_v58 = vld [vmem:[#allocation3] sm:$0x3f]  ;;  %v1615_v60 = vrot.slane %v1595_v57, 2 }
 0x1ae   :  { %v1529_v56 = vld [vmem:[#allocation3 + $0x18] sm:$0x3f] }
 0x1af   :  { %v1171_v59 = vld [vmem:[#allocation3 + $0x18] sm:$0x3f] }
 0x1b0   :  { %v1084_v0 = vld [vmem:[#allocation3 + $0x18] sm:$0x3f] }
 0x1b1   :  { %719 = vrot.lane.b32.xlu0 %v710_v61, %s4455_s25  ;;  %v623_v28 = vpop.permute.xlu2 %622  ;;  %v1702_v61 = vrot.slane %v1682_v58, 4  ;;  %v1841_v3 = vld [vmem:[#allocation3 + $0x18] sm:$0x3f]  ;;  %v1317_v35 = vld [vmem:[#allocation3 + $0x50] sm:$0x3f] }
 0x1b2   :  { %1113 = vrot.lane.b32.xlu2 %v1102_v62, %s4456_s26  ;;  %v1191_v62 = vrot.slane %v1171_v59, 6  ;;  %v997_v34 = vld [vmem:[#allocation3 + $0x18] sm:$0x3f]  ;;  %v1250_v45 = vld [vmem:[#allocation3 + $0x50] sm:$0x3f] }
 0x1b3   :  { %721 = vrot.lane.b32.xlu1 %v711_v63, %s4455_s25  ;;  %v1369_v63 = vld [vmem:[#allocation3 + $0x58] sm:$0x3f]  ;;  %v678_v57 = vld [vmem:[#allocation3 + $0x20] sm:$0x3f] }
 0x1b4   :  { %v1387_v1 = vrot.slane %v1369_v63, 4  ;;  %v675_v42 = vld [vmem:[#allocation3 + $0x58] sm:$0x3f]  ;;  %v936_v59 = vld [vmem:[#allocation3 + $0x20] sm:$0x3f] }
 0x1b5   :  { %684 = vst [vmem:[#allocation4 + $0x10] sm:$0x3f] %v675_v42 }
 0x1b6   :  { %v615_v4 = vpop.permute.xlu1 %614  ;;  %v613_v5 = vpop.permute.xlu0 %612  ;;  %687 = vst [vmem:[#allocation4 + $0x28] sm:$0x3f] %v678_v57 }
 0x1b7   :  { %v633_v7 = vsel %vm624_vm4, %v615_v4, %v617_v2  ;;  %v631_v8 = vsel %vm624_vm4, %v611_v49, %v613_v5  ;;  %v632_v9 = vsel %vm624_vm4, %v613_v5, %v615_v4  ;;  %v1249_v49 = vld [vmem:[#allocation3 + $0x18] sm:$0x3f] }
 0x1b8   :  { %v657_v11 = vmax.f32 %v5041_v23, %v633_v7  ;;  %v655_v12 = vmax.f32 %v5027_v15, %v631_v8  ;;  %v656_v13 = vmax.f32 %v5044_v24, %v632_v9  ;;  %v876_v15 = vrot.slane %v858_v16, 6  ;;  %v995_v23 = vld [vmem:[#allocation3] sm:$0x3f]  ;;  %v695_v5 = vld [vmem:[#allocation3 + $0x18] sm:$0x3f] }
 0x1b9   :  { %802 = vrot.lane.b32.xlu0 %v793_v10, %s4457_s27  ;;  %v1015_v24 = vrot.slane %v995_v23, 2  ;;  %v1170_v7 = vld [vmem:[#allocation3 + $0x58] sm:$0x3f]  ;;  %v713_v8 = vrot.slane %v695_v5, 2  ;;  %v696_v5 = vld [vmem:[#allocation3 + $0x50] sm:$0x3f] }
 0x1ba   :  { %669 = vst [vmem:[#allocation3 + $0x28] sm:$0x3f] %v657_v11  ;;  %1198 = vrot.lane.b32.xlu2 %v1188_v14, %s4458_s28  ;;  %v1190_v10 = vrot.slane %v1170_v7, 6  ;;  %v1596_v14 = vld [vmem:[#allocation3 + $0x58] sm:$0x3f] }
 0x1bb   :  { %804 = vrot.lane.b32.xlu1 %v794_v6, %s4457_s27  ;;  %667 = vst [vmem:[#allocation3 + $0x8] sm:$0x3f] %v655_v12  ;;  %v1450_v6 = vld [vmem:[#allocation3 + $0x58] sm:$0x3f] }
 0x1bc   :  { %668 = vst [vmem:[#allocation3 + $0x38] sm:$0x3f] %v656_v13  ;;  %v1470_v9 = vrot.slane %v1450_v6, 6  ;;  %v778_v12 = vld [vmem:[#allocation3 + $0x18] sm:$0x3f] }
 0x1bd   :  { %v1597_v13 = vld [vmem:[#allocation3 + $0x18] sm:$0x3f]  ;;  %v796_v16 = vrot.slane %v778_v12, 4 }
 0x1be   :  { %v619_v40 = vpop.permute.xlu0 %618  ;;  %v1617_v17 = vrot.slane %v1597_v13, 2  ;;  %v677_v13 = vld [vmem:[#allocation3 + $0x50] sm:$0x3f] }
 0x1bf   :  { %v634_v18 = vsel %vm624_vm4, %v617_v2, %v619_v40  ;;  %v1104_v2 = vrot.slane %v1084_v0, 4  ;;  %686 = vst [vmem:[#allocation4 + $0x20] sm:$0x3f] %v677_v13  ;;  %v1085_v13 = vld [vmem:[#allocation3 + $0x50] sm:$0x3f] }
 0x1c0   :  { %v658_v19 = vmax.f32 %v5039_v22, %v634_v18 }
 0x1c1   :  { %885 = vrot.lane.b32.xlu0 %v876_v15, %s4459_s29  ;;  %v681_v50 = vld [vmem:[#allocation3 + $0x28] sm:$0x3f]  ;;  %v861_v15 = vld [vmem:[#allocation3 + $0x18] sm:$0x3f] }
 0x1c2   :  { %670 = vst [vmem:[#allocation3 + $0x48] sm:$0x3f] %v658_v19  ;;  %1270 = vrot.lane.b32.xlu2 %v1248_v21, %s4454_s24  ;;  %v1314_v19 = vld [vmem:[#allocation3] sm:$0x3f]  ;;  %v1683_v21 = vld [vmem:[#allocation3 + $0x58] sm:$0x3f] }
 0x1c3   :  { %887 = vrot.lane.b32.xlu1 %v877_v20, %s4459_s29  ;;  %691 = vst.msk [vmem:[#allocation4 + $0x40] sm:$0x3f] %vm690_vm5, %v681_v50  ;;  %v1315_v20 = vld [vmem:[#allocation3 + $0x58] sm:$0x3f]  ;;  %v1332_v23 = vrot.slane %v1314_v19, 2 }
 0x1c4   :  { %v1083_v50 = vld [vmem:[#allocation3 + $0x58] sm:$0x3f]  ;;  %v1321_v51 = vld [vmem:[#allocation3 + $0x28] sm:$0x3f] }
 0x1c5   :  { %1359 = vst [vmem:[#allocation4 + $0x1f8] sm:$0xf] %v1332_v23  ;;  %v1339_v58 = vrot.slane %v1321_v51, 2  ;;  %v679_v12 = vld [vmem:[#allocation3 + $0x8] sm:$0x3f] }
 0x1c6   :  { %1350 = vst [vmem:[#allocation4 + $0x1b0] sm:$0xc0] %v1332_v23 }
 0x1c7   :  { %1366 = vst [vmem:[#allocation4 + $0x230] sm:$0xf] %v1339_v58 }
 0x1c8   :  { %1357 = vst [vmem:[#allocation4 + $0x1e8] sm:$0xc0] %v1339_v58  ;;  %v1531_v58 = vld [vmem:[#allocation3 + $0x20] sm:$0x3f] }
 0x1c9   :  { %955 = vrot.lane.b32.xlu0 %v934_v25, %s4452_s22  ;;  %v1322_v52 = vld [vmem:[#allocation3 + $0x48] sm:$0x3f]  ;;  %v1333_v25 = vrot.slane %v1315_v20, 2  ;;  %688 = vst [vmem:[#allocation4 + $0x30] sm:$0x3f] %v679_v12 }
 0x1ca   :  { %v621_v29 = vpop.permute.xlu1 %620  ;;  %1858 = vrot.lane.b32.xlu2 %v1840_v26, %s4461_s8  ;;  %v1340_v55 = vrot.slane %v1322_v52, 2  ;;  %v879_v26 = vrot.slane %v861_v15, 6  ;;  %v779_v20 = vld [vmem:[#allocation3 + $0x50] sm:$0x3f] }
 0x1cb   :  { %1026 = vrot.lane.b32.xlu1 %v1015_v24, %s4460_s30  ;;  %v635_v22 = vsel %vm624_vm4, %v619_v40, %v621_v29  ;;  %v636_v30 = vsel %vm624_vm4, %v621_v29, %v623_v28  ;;  %v1616_v40 = vrot.slane %v1596_v14, 2  ;;  %v1316_v24 = vld [vmem:[#allocation3 + $0x18] sm:$0x3f]  ;;  %v1703_v28 = vrot.slane %v1683_v21, 4  ;;  %1360 = vst [vmem:[#allocation4 + $0x200] sm:$0xf] %v1333_v25 }
 0x1cc   :  { %v659_v32 = vmax.f32 %v5053_v27, %v635_v22  ;;  %v660_v33 = vmax.f32 %v5058_v31, %v636_v30  ;;  %v1189_v27 = vrot.slane %v1169_v41, 6  ;;  %v1386_v31 = vrot.slane %v1368_v43, 4  ;;  %1358 = vst.msk [vmem:[#allocation4 + $0x1f0] sm:$0xc0] %vm763_vm6, %v1340_v55  ;;  %v935_v22 = vld [vmem:[#allocation3 + $0x50] sm:$0x3f] }
 0x1cd   :  { %1367 = vst.msk [vmem:[#allocation4 + $0x238] sm:$0xf] %vm773_vm7, %v1340_v55  ;;  %v1334_v29 = vrot.slane %v1316_v24, 2  ;;  %v674_v41 = vld [vmem:[#allocation3] sm:$0x3f]  ;;  %v1017_v43 = vrot.slane %v997_v34, 2 }
 0x1ce   :  { %671 = vst [vmem:[#allocation3 + $0x10] sm:$0x3f] %v659_v32  ;;  %v1320_v55 = vld [vmem:[#allocation3 + $0x38] sm:$0x3f]  ;;  %v797_v23 = vrot.slane %v779_v20, 4  ;;  %vm1645_vm4 = vcmask 162816  }
 0x1cf   :  { %672 = vst [vmem:[#allocation3 + $0x40] sm:$0x3f] %v660_v33  ;;  %v1530_v24 = vld [vmem:[#allocation3 + $0x50] sm:$0x3f] }
 0x1d0   :  { %1351 = vst [vmem:[#allocation4 + $0x1b8] sm:$0xc0] %v1333_v25  ;;  %v862_v34 = vld [vmem:[#allocation3 + $0x50] sm:$0x3f] }
 0x1d1   :  { %1024 = vrot.lane.b32.xlu0 %v1014_v37, %s4460_s30  ;;  %1361 = vst [vmem:[#allocation4 + $0x208] sm:$0xf] %v1334_v29 }
 0x1d2   :  { %723 = vrot.lane.b32.xlu2 %v712_v38, %s4455_s25  ;;  %v1768_v38 = vld [vmem:[#allocation3 + $0x58] sm:$0x3f]  ;;  %1352 = vst [vmem:[#allocation4 + $0x1c0] sm:$0xc0] %v1334_v29 }
 0x1d3   :  { %1111 = vrot.lane.b32.xlu1 %v1101_v39, %s4456_s26  ;;  %v673_v39 = vld [vmem:[#allocation3 + $0x30] sm:$0x3f]  ;;  %683 = vst [vmem:[#allocation4 + $0x8] sm:$0x3f] %v674_v41  ;;  %v1684_v29 = vld [vmem:[#allocation3 + $0x18] sm:$0x3f] }
 0x1d4   :  { %682 = vst [vmem:[#allocation4] sm:$0x3f] %v673_v39 }
 0x1d9   :  { %1200 = vrot.lane.b32.xlu0 %v1189_v27, %s4458_s28  ;;  %v1335_v27 = vrot.slane %v1317_v35, 2  ;;  %v1704_v35 = vrot.slane %v1684_v29, 4  ;;  %v1599_v29 = vld [vmem:[#allocation3 + $0x20] sm:$0x3f] }
 0x1da   :  { %806 = vrot.lane.b32.xlu2 %v795_v44, %s4457_s27  ;;  %v1319_v44 = vld [vmem:[#allocation3 + $0x8] sm:$0x3f] }
 0x1db   :  { %1395 = vrot.lane.b32.xlu1 %v1386_v31, %s4462_s9  ;;  %v1786_v31 = vrot.slane %v1768_v38, 6  ;;  %v1337_v46 = vrot.slane %v1319_v44, 2  ;;  %1362 = vst [vmem:[#allocation4 + $0x210] sm:$0xf] %v1335_v27  ;;  %v780_v44 = vld [vmem:[#allocation3 + $0x20] sm:$0x3f] }
 0x1dc   :  { %1353 = vst [vmem:[#allocation4 + $0x1c8] sm:$0xc0] %v1335_v27 }
 0x1dd   :  { %1364 = vst [vmem:[#allocation4 + $0x220] sm:$0xf] %v1337_v46 }
 0x1de   :  { %1355 = vst [vmem:[#allocation4 + $0x1d8] sm:$0xc0] %v1337_v46  ;;  %v798_v46 = vrot.slane %v780_v44, 4 }
 0x1e1   :  { %1272 = vrot.lane.b32.xlu0 %v1249_v49, %s4454_s24 }
 0x1e2   :  { %889 = vrot.lane.b32.xlu2 %v878_v47, %s4459_s29 }
 0x1e3   :  { %1479 = vrot.lane.b32.xlu1 %v1469_v48, %s4463_s10 }
 0x1e9   :  { %1549 = vrot.lane.b32.xlu0 %v1528_v54, %s4453_s23  ;;  %v676_v54 = vld [vmem:[#allocation3 + $0x18] sm:$0x3f] }
 0x1ea   :  { %1028 = vrot.lane.b32.xlu2 %v1016_v53, %s4460_s30  ;;  %685 = vst [vmem:[#allocation4 + $0x18] sm:$0x3f] %v676_v54  ;;  %v863_v54 = vld [vmem:[#allocation3 + $0x20] sm:$0x3f] }
 0x1eb   :  { %1551 = vrot.lane.b32.xlu1 %v1529_v56, %s4453_s23  ;;  %v1103_v56 = vrot.slane %v1083_v50, 4 }
 0x1f1   :  { %1625 = vrot.lane.b32.xlu0 %v1615_v60, %s4464_s11  ;;  %v1842_v60 = vld [vmem:[#allocation3 + $0x50] sm:$0x3f] }
 0x1f2   :  { %1204 = vrot.lane.b32.xlu2 %v1191_v62, %s4458_s28  ;;  %v1318_v62 = vld [vmem:[#allocation3 + $0x20] sm:$0x3f] }
 0x1f3   :  { %1712 = vrot.lane.b32.xlu1 %v1702_v61, %s4460_s30  ;;  %v1338_v61 = vrot.slane %v1320_v55, 2  ;;  %v1336_v6 = vrot.slane %v1318_v62, 2  ;;  %v1173_v55 = vld [vmem:[#allocation3 + $0x20] sm:$0x3f] }
 0x1f4   :  { %v1193_v57 = vrot.slane %v1173_v55, 6 }
 0x1f5   :  { %1365 = vst [vmem:[#allocation4 + $0x228] sm:$0xf] %v1338_v61 }
 0x1f6   :  { %1356 = vst [vmem:[#allocation4 + $0x1e0] sm:$0xc0] %v1338_v61 }
 0x1f7   :  { %1363 = vst [vmem:[#allocation4 + $0x218] sm:$0xf] %v1336_v6 }
 0x1f8   :  { %1354 = vst [vmem:[#allocation4 + $0x1d0] sm:$0xc0] %v1336_v6 }
 0x1f9   :  { %1860 = vrot.lane.b32.xlu0 %v1841_v3, %s4461_s8 }
 0x1fa   :  { %1397 = vrot.lane.b32.xlu2 %v1387_v1, %s4462_s9 }
 0x1fb   :  { %1117 = vrot.lane.b32.xlu1 %v1104_v2, %s4456_s26  ;;  %v1370_v2 = vld [vmem:[#allocation3 + $0x18] sm:$0x3f] }
 0x1fc   :  { %v5123_v4 = vpop.permute.xlu2 %1547  ;;  %v1388_v7 = vrot.slane %v1370_v2, 4  ;;  %v1371_v2 = vld [vmem:[#allocation3 + $0x50] sm:$0x3f] }
 0x1fd   :  { %v1389_v6 = vrot.slane %v1371_v2, 4 }
 0x201   :  { %725 = vrot.lane.b32.xlu0 %v713_v8, %s4455_s25  ;;  %v714_v8 = vrot.slane %v696_v5, 2 }
 0x202   :  { %1481 = vrot.lane.b32.xlu2 %v1470_v9, %s4463_s10  ;;  %v680_v9 = vld [vmem:[#allocation3 + $0x38] sm:$0x3f] }
 0x203   :  { %1202 = vrot.lane.b32.xlu1 %v1190_v10, %s4458_s28  ;;  %v1251_v10 = vld [vmem:[#allocation3 + $0x20] sm:$0x3f]  ;;  %689 = vst [vmem:[#allocation4 + $0x38] sm:$0x3f] %v680_v9 }
 0x204   :  { %v5128_v11 = vpop.permute.xlu2 %953 }
 0x209   :  { %808 = vrot.lane.b32.xlu0 %v796_v16, %s4457_s27 }
 0x20a   :  { %1629 = vrot.lane.b32.xlu2 %v1617_v17, %s4464_s11 }
 0x20b   :  { %1627 = vrot.lane.b32.xlu1 %v1616_v40, %s4464_s11  ;;  %v1451_v40 = vld [vmem:[#allocation3 + $0x18] sm:$0x3f] }
 0x20c   :  { %v5133_v18 = vpop.permute.xlu2 %1113  ;;  %v1471_v21 = vrot.slane %v1451_v40, 6  ;;  %v1105_v40 = vrot.slane %v1085_v13, 4 }
 0x211   :  { %891 = vrot.lane.b32.xlu0 %v879_v26, %s4459_s29 }
 0x212   :  { %1714 = vrot.lane.b32.xlu2 %v1703_v28, %s4460_s30 }
 0x213   :  { %957 = vrot.lane.b32.xlu1 %v935_v22, %s4452_s22  ;;  %v950_v30 = vpop.permute.xlu0 %949 }
 0x214   :  { %v5138_v33 = vpop.permute.xlu2 %1198 }
 0x215   :  { %v952_v32 = vpop.permute.xlu1 %951 }
 0x216   :  { %v969_v36 = vsel %vm967_vm8, %v952_v32, %v5128_v11  ;;  %v968_v37 = vsel %vm967_vm8, %v950_v30, %v952_v32  ;;  %v697_v32 = vld [vmem:[#allocation3 + $0x20] sm:$0x3f] }
 0x217   :  { %986 = vst [vmem:[#allocation4 + $0xe0] sm:$0x3f] %v969_v36  ;;  %v715_v36 = vrot.slane %v697_v32, 2  ;;  %v1619_v32 = vrot.slane %v1599_v29, 2 }
 0x218   :  { %985 = vst [vmem:[#allocation4 + $0xd8] sm:$0x3f] %v968_v37  ;;  %v880_v37 = vrot.slane %v862_v34, 6 }
 0x219   :  { %1030 = vrot.lane.b32.xlu0 %v1017_v43, %s4460_s30  ;;  %v1769_v43 = vld [vmem:[#allocation3 + $0x18] sm:$0x3f] }
 0x21a   :  { %1795 = vrot.lane.b32.xlu2 %v1786_v31, %s4465_s12  ;;  %v998_v31 = vld [vmem:[#allocation3 + $0x50] sm:$0x3f] }
 0x21b   :  { %1274 = vrot.lane.b32.xlu1 %v1250_v45, %s4454_s24  ;;  %v1267_v47 = vpop.permute.xlu0 %1266  ;;  %v1787_v45 = vrot.slane %v1769_v43, 6  ;;  %v937_v43 = vld [vmem:[#allocation3 + $0x8] sm:$0x3f] }
 0x21c   :  { %v5146_v49 = vpop.permute.xlu2 %1270 }
 0x21d   :  { %v1269_v48 = vpop.permute.xlu1 %1268 }
 0x21e   :  { %v1288_v52 = vsel %vm1286_vm9, %v1269_v48, %v5146_v49  ;;  %v1287_v53 = vsel %vm1286_vm9, %v1267_v47, %v1269_v48  ;;  %v1018_v47 = vrot.slane %v998_v31, 2 }
 0x21f   :  { %1306 = vst [vmem:[#allocation4 + $0x1b8] sm:$0x3f] %v1288_v52 }
 0x220   :  { %1305 = vst [vmem:[#allocation4 + $0x1b0] sm:$0x3f] %v1287_v53 }
 0x221   :  { %1115 = vrot.lane.b32.xlu0 %v1103_v56, %s4456_s26  ;;  %v881_v56 = vrot.slane %v863_v54, 6 }
 0x222   :  { %959 = vrot.lane.b32.xlu2 %v936_v59, %s4452_s22 }
 0x223   :  { %1862 = vrot.lane.b32.xlu1 %v1842_v60, %s4461_s8  ;;  %v720_v63 = vpop.permute.xlu0 %719 }
 0x224   :  { %v5154_v1 = vpop.permute.xlu2 %1858 }
 0x225   :  { %v722_v0 = vpop.permute.xlu1 %721 }
 0x226   :  { %v738_v3 = vsel %vm737_vm10, %v720_v63, %v722_v0  ;;  %v1086_v63 = vld [vmem:[#allocation3 + $0x20] sm:$0x3f] }
 0x227   :  { %755 = vst [vmem:[#allocation4] sm:$0xc0] %v738_v3 }
 0x228   :  { %765 = vst [vmem:[#allocation4 + $0x48] sm:$0xf] %v738_v3  ;;  %v1106_v3 = vrot.slane %v1086_v63, 4 }
 0x229   :  { %1399 = vrot.lane.b32.xlu0 %v1388_v7, %s4462_s9 }
 0x22a   :  { %1276 = vrot.lane.b32.xlu2 %v1251_v10, %s4454_s24  ;;  %v1172_v10 = vld [vmem:[#allocation3 + $0x50] sm:$0x3f] }
 0x22b   :  { %727 = vrot.lane.b32.xlu1 %v714_v8, %s4455_s25  ;;  %v803_v14 = vpop.permute.xlu0 %802 }
 0x22c   :  { %v5160_v17 = vpop.permute.xlu2 %723 }
 0x22d   :  { %v805_v16 = vpop.permute.xlu1 %804  ;;  %v739_v15 = vsel %vm737_vm10, %v722_v0, %v5160_v17  ;;  %v999_v0 = vld [vmem:[#allocation3 + $0x20] sm:$0x3f] }
 0x22e   :  { %v821_v19 = vsel %vm820_vm11, %v803_v14, %v805_v16  ;;  %756 = vst [vmem:[#allocation4 + $0x8] sm:$0xc0] %v739_v15  ;;  %v1019_v5 = vrot.slane %v999_v0, 2  ;;  %v1452_v14 = vld [vmem:[#allocation3 + $0x50] sm:$0x3f] }
 0x22f   :  { %766 = vst [vmem:[#allocation4 + $0x50] sm:$0xf] %v739_v15  ;;  %v1472_v15 = vrot.slane %v1452_v14, 6  ;;  %v938_v0 = vld [vmem:[#allocation3 + $0x38] sm:$0x3f] }
 0x230   :  { %838 = vst [vmem:[#allocation4 + $0x48] sm:$0xf0] %v821_v19 }
 0x231   :  { %848 = vst [vmem:[#allocation4 + $0x90] sm:$0x3] %v821_v19  ;;  %1483 = vrot.lane.b32.xlu0 %v1471_v21, %s4463_s10 }
 0x232   :  { %1553 = vrot.lane.b32.xlu2 %v1530_v24, %s4453_s23 }
 0x233   :  { %810 = vrot.lane.b32.xlu1 %v797_v23, %s4457_s27  ;;  %v886_v25 = vpop.permute.xlu0 %885  ;;  %v1598_v23 = vld [vmem:[#allocation3 + $0x50] sm:$0x3f] }
 0x234   :  { %v5168_v28 = vpop.permute.xlu2 %806 }
 0x235   :  { %v888_v26 = vpop.permute.xlu1 %887  ;;  %v822_v22 = vsel %vm820_vm11, %v805_v16, %v5168_v28  ;;  %v1192_v16 = vrot.slane %v1172_v10, 6  ;;  %v1533_v10 = vld [vmem:[#allocation3 + $0x38] sm:$0x3f] }
 0x236   :  { %v904_v30 = vsel %vm903_vm12, %v886_v25, %v888_v26  ;;  %839 = vst [vmem:[#allocation4 + $0x50] sm:$0xf0] %v822_v22 }
 0x237   :  { %849 = vst [vmem:[#allocation4 + $0x98] sm:$0x3] %v822_v22  ;;  %v1618_v22 = vrot.slane %v1598_v23, 2 }
 0x238   :  { %921 = vst [vmem:[#allocation4 + $0x90] sm:$0xfc] %v904_v30 }
 0x239   :  { %1716 = vrot.lane.b32.xlu0 %v1704_v35, %s4460_s30 }
 0x23a   :  { %729 = vrot.lane.b32.xlu2 %v715_v36, %s4455_s25  ;;  %v1453_v36 = vld [vmem:[#allocation3 + $0x20] sm:$0x3f] }
 0x23b   :  { %893 = vrot.lane.b32.xlu1 %v880_v37, %s4459_s29  ;;  %v5176_v38 = vpop.permute.xlu0 %955  ;;  %v1685_v37 = vld [vmem:[#allocation3 + $0x50] sm:$0x3f] }
 0x23c   :  { %v5178_v41 = vpop.permute.xlu2 %889  ;;  %v970_v42 = vsel %vm967_vm8, %v5128_v11, %v5176_v38 }
 0x23d   :  { %v1027_v39 = vpop.permute.xlu1 %1026  ;;  %v905_v27 = vsel %vm903_vm12, %v888_v26, %v5178_v41  ;;  %987 = vst [vmem:[#allocation4 + $0xe8] sm:$0x3f] %v970_v42  ;;  %v1372_v26 = vld [vmem:[#allocation3 + $0x20] sm:$0x3f]  ;;  %v1705_v42 = vrot.slane %v1685_v37, 4 }
 0x23e   :  { %922 = vst [vmem:[#allocation4 + $0x98] sm:$0xfc] %v905_v27  ;;  %v1390_v30 = vrot.slane %v1372_v26, 4 }
 0x241   :  { %1797 = vrot.lane.b32.xlu0 %v1787_v45, %s4465_s12 }
 0x242   :  { %812 = vrot.lane.b32.xlu2 %v798_v46, %s4457_s27 }
 0x243   :  { %1032 = vrot.lane.b32.xlu1 %v1018_v47, %s4460_s30  ;;  %v1025_v11 = vpop.permute.xlu0 %1024  ;;  %v1686_v47 = vld [vmem:[#allocation3 + $0x20] sm:$0x3f] }
 0x244   :  { %v5188_v48 = vpop.permute.xlu2 %1028  ;;  %v1045_v51 = vsel %vm1044_vm13, %v1025_v11, %v1027_v39  ;;  %v1770_v11 = vld [vmem:[#allocation3 + $0x50] sm:$0x3f] }
 0x245   :  { %v1112_v50 = vpop.permute.xlu1 %1111  ;;  %v1046_v52 = vsel %vm1044_vm13, %v1027_v39, %v5188_v48  ;;  %1063 = vst [vmem:[#allocation4 + $0xd8] sm:$0xc0] %v1045_v51  ;;  %v1473_v39 = vrot.slane %v1453_v36, 6  ;;  %v1174_v36 = vld [vmem:[#allocation3 + $0x8] sm:$0x3f] }
 0x246   :  { %v1132_v53 = vsel %vm1131_vm14, %v1112_v50, %v5133_v18  ;;  %1064 = vst [vmem:[#allocation4 + $0xe0] sm:$0xc0] %v1046_v52  ;;  %v1706_v50 = vrot.slane %v1686_v47, 4 }
 0x247   :  { %1073 = vst [vmem:[#allocation4 + $0x128] sm:$0xf] %v1046_v52  ;;  %v1252_v52 = vld [vmem:[#allocation3 + $0x8] sm:$0x3f] }
 0x248   :  { %1150 = vst [vmem:[#allocation4 + $0x120] sm:$0xf0] %v1132_v53 }
 0x249   :  { %1159 = vst [vmem:[#allocation4 + $0x168] sm:$0x3] %v1132_v53  ;;  %1555 = vrot.lane.b32.xlu0 %v1531_v58, %s4453_s23 }
 0x24a   :  { %1072 = vst [vmem:[#allocation4 + $0x120] sm:$0xf] %v1045_v51  ;;  %895 = vrot.lane.b32.xlu2 %v881_v56, %s4459_s29  ;;  %v1788_v51 = vrot.slane %v1770_v11, 6  ;;  %v698_v56 = vld [vmem:[#allocation3 + $0x8] sm:$0x3f] }
 0x24b   :  { %1208 = vrot.lane.b32.xlu1 %v1193_v57, %s4458_s28  ;;  %v5198_v59 = vpop.permute.xlu0 %1200  ;;  %v782_v11 = vld [vmem:[#allocation3 + $0x38] sm:$0x3f] }
 0x24c   :  { %v5200_v61 = vpop.permute.xlu2 %1204  ;;  %v1219_v62 = vsel %vm1218_vm15, %v5138_v33, %v5198_v59 }
 0x24d   :  { %v1396_v60 = vpop.permute.xlu1 %1395  ;;  %1237 = vst [vmem:[#allocation4 + $0x168] sm:$0xfc] %v1219_v62  ;;  %v716_v62 = vrot.slane %v698_v56, 2 }
 0x251   :  { %1121 = vrot.lane.b32.xlu0 %v1106_v3, %s4456_s26 }
 0x252   :  { %1034 = vrot.lane.b32.xlu2 %v1019_v5, %s4460_s30  ;;  %v781_v5 = vld [vmem:[#allocation3 + $0x8] sm:$0x3f] }
 0x253   :  { %1401 = vrot.lane.b32.xlu1 %v1389_v6, %s4462_s9  ;;  %v5208_v7 = vpop.permute.xlu0 %1272 }
 0x254   :  { %v5210_v9 = vpop.permute.xlu2 %1397  ;;  %v1289_v33 = vsel %vm1286_vm9, %v5146_v49, %v5208_v7 }
 0x255   :  { %v1480_v8 = vpop.permute.xlu1 %1479  ;;  %v1414_v12 = vsel %vm1413_vm0, %v1396_v60, %v5210_v9  ;;  %1307 = vst [vmem:[#allocation4 + $0x1c0] sm:$0x3f] %v1289_v33  ;;  %v1771_v60 = vld [vmem:[#allocation3 + $0x20] sm:$0x3f]  ;;  %v799_v33 = vrot.slane %v781_v5, 4 }
 0x256   :  { %1431 = vst [vmem:[#allocation4 + $0x1f8] sm:$0xf0] %v1414_v12  ;;  %v1789_v63 = vrot.slane %v1771_v60, 6 }
 0x257   :  { %1440 = vst [vmem:[#allocation4 + $0x240] sm:$0x3] %v1414_v12  ;;  %v1253_v12 = vld [vmem:[#allocation3 + $0x38] sm:$0x3f] }
 0x259   :  { %1206 = vrot.lane.b32.xlu0 %v1192_v16, %s4458_s28 }
 0x25a   :  { %1119 = vrot.lane.b32.xlu2 %v1105_v40, %s4456_s26  ;;  %v864_v40 = vld [vmem:[#allocation3 + $0x8] sm:$0x3f] }
 0x25b   :  { %1485 = vrot.lane.b32.xlu1 %v1472_v15, %s4463_s10  ;;  %v1550_v49 = vpop.permute.xlu0 %1549  ;;  %v882_v23 = vrot.slane %v864_v40, 6 }
 0x25c   :  { %v5222_v20 = vpop.permute.xlu2 %1481  ;;  %v1568_v21 = vsel %vm1567_vm1, %v5123_v4, %v1550_v49 }
 0x25d   :  { %v5220_v19 = vpop.permute.xlu1 %1551  ;;  %v1500_v24 = vsel %vm1499_vm2, %v1480_v8, %v5222_v20  ;;  %1586 = vst [vmem:[#allocation4 + $0x288] sm:$0x3f] %v1568_v21  ;;  %v1088_v21 = vld [vmem:[#allocation3 + $0x38] sm:$0x3f] }
 0x25e   :  { %v1569_v25 = vsel %vm1567_vm1, %v1550_v49, %v5220_v19  ;;  %1518 = vst [vmem:[#allocation4 + $0x240] sm:$0xfc] %v1500_v24  ;;  %v1108_v24 = vrot.slane %v1088_v21, 4 }
 0x25f   :  { %1587 = vst [vmem:[#allocation4 + $0x290] sm:$0x3f] %v1569_v25  ;;  %v1532_v25 = vld [vmem:[#allocation3 + $0x8] sm:$0x3f] }
 0x261   :  { %1631 = vrot.lane.b32.xlu0 %v1618_v22, %s4464_s11  ;;  %v1000_v22 = vld [vmem:[#allocation3 + $0x8] sm:$0x3f] }
 0x262   :  { %1403 = vrot.lane.b32.xlu2 %v1390_v30, %s4462_s9  ;;  %v1020_v37 = vrot.slane %v1000_v22, 2 }
 0x263   :  { %1633 = vrot.lane.b32.xlu1 %v1619_v32, %s4464_s11  ;;  %v1626_v4 = vpop.permute.xlu0 %1625 }
 0x264   :  { %v5233_v35 = vpop.permute.xlu2 %1629 }
 0x265   :  { %v1713_v34 = vpop.permute.xlu1 %1712 }
 0x269   :  { %961 = vrot.lane.b32.xlu0 %v937_v43, %s4452_s22 }
 0x26a   :  { %1487 = vrot.lane.b32.xlu2 %v1473_v39, %s4463_s10 }
 0x26b   :  { %1718 = vrot.lane.b32.xlu1 %v1705_v42, %s4460_s30  ;;  %v5238_v27 = vpop.permute.xlu0 %1860 }
 0x26c   :  { %v5240_v44 = vpop.permute.xlu2 %1714  ;;  %v1877_v45 = vsel %vm6643_vm3, %v5154_v1, %v5238_v27 }
 0x26d   :  { %v5242_v31 = vpop.permute.xlu1 %1117  ;;  %v1732_v46 = vsel %vm1044_vm13, %v1713_v34, %v5240_v44  ;;  %1894 = vst [vmem:[#allocation4 + $0x360] sm:$0x3f] %v1877_v45  ;;  %v699_v34 = vld [vmem:[#allocation3 + $0x38] sm:$0x3f] }
 0x26e   :  { %1750 = vst [vmem:[#allocation4 + $0x2d0] sm:$0xf0] %v1732_v46  ;;  %v717_v39 = vrot.slane %v699_v34, 2 }
 0x26f   :  { %1759 = vst [vmem:[#allocation4 + $0x318] sm:$0x3] %v1732_v46  ;;  %v1175_v46 = vld [vmem:[#allocation3 + $0x38] sm:$0x3f] }
 0x271   :  { %1278 = vrot.lane.b32.xlu0 %v1252_v52, %s4454_s24  ;;  %v800_v52 = vrot.slane %v782_v11, 4  ;;  %v866_v11 = vld [vmem:[#allocation3 + $0x28] sm:$0x3f] }
 0x272   :  { %1720 = vrot.lane.b32.xlu2 %v1706_v50, %s4460_s30  ;;  %v1600_v50 = vld [vmem:[#allocation3 + $0x8] sm:$0x3f] }
 0x273   :  { %1799 = vrot.lane.b32.xlu1 %v1788_v51, %s4465_s12  ;;  %v5252_v53 = vpop.permute.xlu0 %725  ;;  %v1195_v51 = vrot.slane %v1175_v46, 6 }
 0x274   :  { %v5254_v1 = vpop.permute.xlu2 %1795  ;;  %v740_v55 = vsel %vm737_vm10, %v5160_v17, %v5252_v53 }
 0x275   :  { %v1203_v54 = vpop.permute.xlu1 %1202  ;;  %757 = vst [vmem:[#allocation4 + $0x10] sm:$0xc0] %v740_v55 }
 0x276   :  { %v1220_v57 = vsel %vm1218_vm15, %v5198_v59, %v1203_v54  ;;  %v1221_v58 = vsel %vm1218_vm15, %v1203_v54, %v5200_v61  ;;  %767 = vst [vmem:[#allocation4 + $0x58] sm:$0xf] %v740_v55  ;;  %v1620_v54 = vrot.slane %v1600_v50, 2  ;;  %v1455_v50 = vld [vmem:[#allocation3 + $0x38] sm:$0x3f] }
 0x277   :  { %1238 = vst [vmem:[#allocation4 + $0x170] sm:$0xfc] %v1220_v57  ;;  %v1373_v57 = vld [vmem:[#allocation3 + $0x8] sm:$0x3f] }
 0x278   :  { %1239 = vst [vmem:[#allocation4 + $0x178] sm:$0xfc] %v1221_v58 }
 0x279   :  { %731 = vrot.lane.b32.xlu0 %v716_v62, %s4455_s25  ;;  %v865_v62 = vld [vmem:[#allocation3 + $0x38] sm:$0x3f] }
 0x27a   :  { %1801 = vrot.lane.b32.xlu2 %v1789_v63, %s4465_s12  ;;  %v1391_v63 = vrot.slane %v1373_v57, 4 }
 0x27b   :  { %963 = vrot.lane.b32.xlu1 %v938_v0, %s4452_s22  ;;  %v5266_v17 = vpop.permute.xlu0 %808  ;;  %v883_v0 = vrot.slane %v865_v62, 6  ;;  %v1002_v62 = vld [vmem:[#allocation3 + $0x28] sm:$0x3f] }
 0x27c   :  { %v5268_v59 = vpop.permute.xlu2 %959  ;;  %v823_v3 = vsel %vm820_vm11, %v5168_v28, %v5266_v17 }
 0x27d   :  { %v1628_v2 = vpop.permute.xlu1 %1627  ;;  %840 = vst [vmem:[#allocation4 + $0x58] sm:$0xf0] %v823_v3 }
 0x27e   :  { %v1646_v6 = vsel %vm1645_vm4, %v1626_v4, %v1628_v2  ;;  %v1647_v8 = vsel %vm1645_vm4, %v1628_v2, %v5233_v35  ;;  %850 = vst [vmem:[#allocation4 + $0xa0] sm:$0x3] %v823_v3  ;;  %v939_v2 = vld [vmem:[#allocation3 + $0x28] sm:$0x3f] }
 0x27f   :  { %1664 = vst [vmem:[#allocation4 + $0x288] sm:$0xc0] %v1646_v6 }
 0x280   :  { %1665 = vst [vmem:[#allocation4 + $0x290] sm:$0xc0] %v1647_v8 }
 0x281   :  { %1673 = vst [vmem:[#allocation4 + $0x2d0] sm:$0xf] %v1646_v6  ;;  %814 = vrot.lane.b32.xlu0 %v799_v33, %s4457_s27  ;;  %v1454_v6 = vld [vmem:[#allocation3 + $0x8] sm:$0x3f] }
 0x282   :  { %1674 = vst [vmem:[#allocation4 + $0x2d8] sm:$0xf] %v1647_v8  ;;  %1559 = vrot.lane.b32.xlu2 %v1533_v10, %s4453_s23  ;;  %v1001_v10 = vld [vmem:[#allocation3 + $0x38] sm:$0x3f] }
 0x283   :  { %1280 = vrot.lane.b32.xlu1 %v1253_v12, %s4454_s24  ;;  %v5279_v28 = vpop.permute.xlu0 %891  ;;  %v1474_v12 = vrot.slane %v1454_v6, 6 }
 0x284   :  { %v5281_v13 = vpop.permute.xlu2 %1276  ;;  %v906_v16 = vsel %vm903_vm12, %v5178_v41, %v5279_v28 }
 0x285   :  { %v958_v14 = vpop.permute.xlu1 %957  ;;  %923 = vst [vmem:[#allocation4 + $0xa0] sm:$0xfc] %v906_v16  ;;  %v1254_v16 = vld [vmem:[#allocation3 + $0x28] sm:$0x3f] }
 0x286   :  { %v971_v15 = vsel %vm967_vm8, %v5176_v38, %v958_v14  ;;  %v972_v49 = vsel %vm967_vm8, %v958_v14, %v5268_v59  ;;  %v1021_v14 = vrot.slane %v1001_v10, 2 }
 0x287   :  { %988 = vst [vmem:[#allocation4 + $0xf0] sm:$0x3f] %v971_v15 }
 0x288   :  { %989 = vst [vmem:[#allocation4 + $0xf8] sm:$0x3f] %v972_v49  ;;  %v1601_v49 = vld [vmem:[#allocation3 + $0x38] sm:$0x3f] }
 0x289   :  { %897 = vrot.lane.b32.xlu0 %v882_v23, %s4459_s29 }
 0x28a   :  { %1125 = vrot.lane.b32.xlu2 %v1108_v24, %s4456_s26  ;;  %v700_v24 = vld [vmem:[#allocation3 + $0x28] sm:$0x3f] }
 0x28b   :  { %1557 = vrot.lane.b32.xlu1 %v1532_v25, %s4453_s23  ;;  %v5293_v41 = vpop.permute.xlu0 %1030  ;;  %v1087_v25 = vld [vmem:[#allocation3 + $0x8] sm:$0x3f] }
 0x28c   :  { %v5295_v26 = vpop.permute.xlu2 %1553  ;;  %v1047_v29 = vsel %vm1044_vm13, %v5188_v48, %v5293_v41  ;;  %v1194_v48 = vrot.slane %v1174_v36, 6  ;;  %v1107_v22 = vrot.slane %v1087_v25, 4 }
 0x28d   :  { %v1275_v38 = vpop.permute.xlu1 %1274  ;;  %v1570_v30 = vsel %vm1567_vm1, %v5220_v19, %v5295_v26  ;;  %1065 = vst [vmem:[#allocation4 + $0xe8] sm:$0xc0] %v1047_v29 }
 0x28e   :  { %v1290_v32 = vsel %vm1286_vm9, %v5208_v7, %v1275_v38  ;;  %v1291_v4 = vsel %vm1286_vm9, %v1275_v38, %v5281_v13  ;;  %1588 = vst [vmem:[#allocation4 + $0x298] sm:$0x3f] %v1570_v30  ;;  %v1621_v38 = vrot.slane %v1601_v49, 2 }
 0x28f   :  { %1308 = vst [vmem:[#allocation4 + $0x1c8] sm:$0x3f] %v1290_v32 }
 0x290   :  { %1309 = vst [vmem:[#allocation4 + $0x1d0] sm:$0x3f] %v1291_v4  ;;  %v1687_v4 = vld [vmem:[#allocation3 + $0x8] sm:$0x3f] }
 0x291   :  { %1074 = vst [vmem:[#allocation4 + $0x130] sm:$0xf] %v1047_v29  ;;  %1036 = vrot.lane.b32.xlu0 %v1020_v37, %s4460_s30  ;;  %v718_v29 = vrot.slane %v700_v24, 2  ;;  %v783_v37 = vld [vmem:[#allocation3 + $0x28] sm:$0x3f] }
 0x292   :  { %1210 = vrot.lane.b32.xlu2 %v1194_v48, %s4458_s28  ;;  %v1003_v24 = vld [vmem:[#allocation3 + $0x48] sm:$0x3f] }
 0x293   :  { %733 = vrot.lane.b32.xlu1 %v717_v39, %s4455_s25  ;;  %v1116_v7 = vpop.permute.xlu0 %1115  ;;  %v1374_v39 = vld [vmem:[#allocation3 + $0x38] sm:$0x3f] }
 0x294   :  { %v5310_v19 = vpop.permute.xlu2 %729  ;;  %v1133_v43 = vsel %vm1131_vm14, %v5133_v18, %v1116_v7  ;;  %v1134_v45 = vsel %vm1131_vm14, %v1116_v7, %v5242_v31  ;;  %v1707_v7 = vrot.slane %v1687_v4, 4 }
 0x295   :  { %v5312_v42 = vpop.permute.xlu1 %1862  ;;  %1151 = vst [vmem:[#allocation4 + $0x128] sm:$0xf0] %v1133_v43 }
 0x296   :  { %v1878_v47 = vsel %vm6643_vm3, %v5238_v27, %v5312_v42  ;;  %1152 = vst [vmem:[#allocation4 + $0x130] sm:$0xf0] %v1134_v45  ;;  %vm1813_vm3 = vcmask 392192  }
 0x297   :  { %1895 = vst [vmem:[#allocation4 + $0x368] sm:$0x3f] %v1878_v47  ;;  %v1772_v47 = vld [vmem:[#allocation3 + $0x8] sm:$0x3f] }
 0x298   :  { %1160 = vst [vmem:[#allocation4 + $0x170] sm:$0x3] %v1133_v43  ;;  %v801_v43 = vrot.slane %v783_v37, 4 }
 0x299   :  { %1161 = vst [vmem:[#allocation4 + $0x178] sm:$0x3] %v1134_v45  ;;  %1212 = vrot.lane.b32.xlu0 %v1195_v51, %s4458_s28  ;;  %v1392_v45 = vrot.slane %v1374_v39, 4  ;;  %v1790_v51 = vrot.slane %v1772_v47, 6  ;;  %v1456_v39 = vld [vmem:[#allocation3 + $0x28] sm:$0x3f] }
 0x29a   :  { %1635 = vrot.lane.b32.xlu2 %v1620_v54, %s4464_s11  ;;  %v1475_v54 = vrot.slane %v1455_v50, 6 }
 0x29b   :  { %816 = vrot.lane.b32.xlu1 %v800_v52, %s4457_s27  ;;  %v5324_v18 = vpop.permute.xlu0 %1399  ;;  %v884_v52 = vrot.slane %v866_v11, 6  ;;  %v1376_v11 = vld [vmem:[#allocation3 + $0x48] sm:$0x3f] }
 0x29c   :  { %v5326_v55 = vpop.permute.xlu2 %812  ;;  %v1415_v56 = vsel %vm1413_vm0, %v5210_v9, %v5324_v18 }
 0x29d   :  { %v728_v27 = vpop.permute.xlu1 %727  ;;  %1432 = vst [vmem:[#allocation4 + $0x200] sm:$0xf0] %v1415_v56 }
 0x29e   :  { %v741_v58 = vsel %vm737_vm10, %v5252_v53, %v728_v27  ;;  %v742_v60 = vsel %vm737_vm10, %v728_v27, %v5310_v19  ;;  %1441 = vst [vmem:[#allocation4 + $0x248] sm:$0x3] %v1415_v56 }
 0x29f   :  { %758 = vst [vmem:[#allocation4 + $0x18] sm:$0xc0] %v741_v58 }
 0x2a0   :  { %759 = vst [vmem:[#allocation4 + $0x20] sm:$0xc0] %v742_v60 }
 0x2a1   :  { %768 = vst [vmem:[#allocation4 + $0x60] sm:$0xf] %v741_v58  ;;  %1405 = vrot.lane.b32.xlu0 %v1391_v63, %s4462_s9  ;;  %v1688_v63 = vld [vmem:[#allocation3 + $0x38] sm:$0x3f] }
 0x2a2   :  { %769 = vst [vmem:[#allocation4 + $0x68] sm:$0xf] %v742_v60  ;;  %965 = vrot.lane.b32.xlu2 %v939_v2, %s4452_s22  ;;  %v1708_v2 = vrot.slane %v1688_v63, 4 }
 0x2a3   :  { %899 = vrot.lane.b32.xlu1 %v883_v0, %s4459_s29  ;;  %v5338_v9 = vpop.permute.xlu0 %1483  ;;  %v1022_v0 = vrot.slane %v1002_v62, 2  ;;  %v1457_v62 = vld [vmem:[#allocation3 + $0x48] sm:$0x3f] }
 0x2a4   :  { %v5340_v53 = vpop.permute.xlu2 %895  ;;  %v1501_v5 = vsel %vm1499_vm2, %v5222_v20, %v5338_v9 }
 0x2a5   :  { %v811_v3 = vpop.permute.xlu1 %810  ;;  %1519 = vst [vmem:[#allocation4 + $0x248] sm:$0xfc] %v1501_v5 }
 0x2a6   :  { %v824_v8 = vsel %vm820_vm11, %v5266_v17, %v811_v3  ;;  %v825_v33 = vsel %vm820_vm11, %v811_v3, %v5326_v55  ;;  %v1255_v3 = vld [vmem:[#allocation3 + $0x48] sm:$0x3f] }
 0x2a7   :  { %841 = vst [vmem:[#allocation4 + $0x60] sm:$0xf0] %v824_v8 }
 0x2a8   :  { %842 = vst [vmem:[#allocation4 + $0x68] sm:$0xf0] %v825_v33 }
 0x2a9   :  { %851 = vst [vmem:[#allocation4 + $0xa8] sm:$0x3] %v824_v8  ;;  %1489 = vrot.lane.b32.xlu0 %v1474_v12, %s4463_s10 }
 0x2aa   :  { %852 = vst [vmem:[#allocation4 + $0xb0] sm:$0x3] %v825_v33  ;;  %1282 = vrot.lane.b32.xlu2 %v1254_v16, %s4454_s24  ;;  %v1177_v16 = vld [vmem:[#allocation3 + $0x48] sm:$0x3f] }
 0x2ab   :  { %1038 = vrot.lane.b32.xlu1 %v1021_v14, %s4460_s30  ;;  %v5352_v20 = vpop.permute.xlu0 %1716  ;;  %v1773_v14 = vld [vmem:[#allocation3 + $0x38] sm:$0x3f]  ;;  %v1197_v49 = vrot.slane %v1177_v16, 6 }
 0x2ac   :  { %v5354_v17 = vpop.permute.xlu2 %1034  ;;  %v1733_v15 = vsel %vm1044_vm13, %v5240_v44, %v5352_v20 }
 0x2ad   :  { %v894_v40 = vpop.permute.xlu1 %893  ;;  %1751 = vst [vmem:[#allocation4 + $0x2d8] sm:$0xf0] %v1733_v15 }
 0x2ae   :  { %v907_v21 = vsel %vm903_vm12, %v5279_v28, %v894_v40  ;;  %v908_v23 = vsel %vm903_vm12, %v894_v40, %v5340_v53  ;;  %1760 = vst [vmem:[#allocation4 + $0x320] sm:$0x3] %v1733_v15  ;;  %v1791_v40 = vrot.slane %v1773_v14, 6  ;;  %v1534_v15 = vld [vmem:[#allocation3 + $0x28] sm:$0x3f] }
 0x2af   :  { %924 = vst [vmem:[#allocation4 + $0xa8] sm:$0xfc] %v907_v21 }
 0x2b0   :  { %925 = vst [vmem:[#allocation4 + $0xb0] sm:$0xfc] %v908_v23 }
 0x2b1   :  { %1637 = vrot.lane.b32.xlu0 %v1621_v38, %s4464_s11  ;;  %v1375_v38 = vld [vmem:[#allocation3 + $0x28] sm:$0x3f] }
 0x2b2   :  { %735 = vrot.lane.b32.xlu2 %v718_v29, %s4455_s25  ;;  %v1023_v29 = vrot.slane %v1003_v24, 2 }
 0x2b3   :  { %1123 = vrot.lane.b32.xlu1 %v1107_v22, %s4456_s26  ;;  %v5366_v44 = vpop.permute.xlu0 %1797  ;;  %v1393_v22 = vrot.slane %v1375_v38, 4 }
 0x2b4   :  { %v1120_v28 = vpop.permute.xlu2 %1119  ;;  %v1814_v32 = vsel %vm1813_vm3, %v5254_v1, %v5366_v44 }
 0x2b5   :  { %v1033_v30 = vpop.permute.xlu1 %1032  ;;  %v1135_v34 = vsel %vm1131_vm14, %v5242_v31, %v1120_v28  ;;  %1831 = vst [vmem:[#allocation4 + $0x318] sm:$0xfc] %v1814_v32 }
 0x2b6   :  { %v1048_v36 = vsel %vm1044_vm13, %v5293_v41, %v1033_v30  ;;  %1153 = vst [vmem:[#allocation4 + $0x138] sm:$0xf0] %v1135_v34  ;;  %v1049_v48 = vsel %vm1044_vm13, %v1033_v30, %v5354_v17 }
 0x2b7   :  { %1162 = vst [vmem:[#allocation4 + $0x180] sm:$0x3] %v1135_v34  ;;  %v1089_v34 = vld [vmem:[#allocation3 + $0x28] sm:$0x3f] }
 0x2b8   :  { %1066 = vst [vmem:[#allocation4 + $0xf0] sm:$0xc0] %v1048_v36 }
 0x2b9   :  { %1067 = vst [vmem:[#allocation4 + $0xf8] sm:$0xc0] %v1049_v48  ;;  %1722 = vrot.lane.b32.xlu0 %v1707_v7, %s4460_s30  ;;  %v1109_v7 = vrot.slane %v1089_v34, 4 }
 0x2ba   :  { %1075 = vst [vmem:[#allocation4 + $0x138] sm:$0xf] %v1048_v36  ;;  %818 = vrot.lane.b32.xlu2 %v801_v43, %s4457_s27  ;;  %v1476_v43 = vrot.slane %v1456_v39, 6 }
 0x2bb   :  { %1407 = vrot.lane.b32.xlu1 %v1392_v45, %s4462_s9  ;;  %1076 = vst [vmem:[#allocation4 + $0x140] sm:$0xf] %v1049_v48  ;;  %v5380_v31 = vpop.permute.xlu0 %1555  ;;  %v1090_v48 = vld [vmem:[#allocation3 + $0x48] sm:$0x3f] }
 0x2bc   :  { %v5382_v1 = vpop.permute.xlu2 %1403  ;;  %v1571_v46 = vsel %vm1567_vm1, %v5295_v26, %v5380_v31  ;;  %v1110_v45 = vrot.slane %v1090_v48, 4  ;;  %v1604_v48 = vld [vmem:[#allocation3 + $0x10] sm:$0x3f] }
 0x2bd   :  { %v5384_v41 = vpop.permute.xlu1 %1208  ;;  %1589 = vst [vmem:[#allocation4 + $0x2a0] sm:$0x3f] %v1571_v46 }
 0x2c1   :  { %1803 = vrot.lane.b32.xlu0 %v1790_v51, %s4465_s12 }
 0x2c2   :  { %901 = vrot.lane.b32.xlu2 %v884_v52, %s4459_s29  ;;  %v1176_v52 = vld [vmem:[#allocation3 + $0x28] sm:$0x3f] }
 0x2c3   :  { %1491 = vrot.lane.b32.xlu1 %v1475_v54, %s4463_s10  ;;  %v5392_v27 = vpop.permute.xlu0 %1121  ;;  %v1394_v54 = vrot.slane %v1376_v11, 4 }
 0x2c4   :  { %v5394_v56 = vpop.permute.xlu2 %1487  ;;  %v1136_v26 = vsel %vm1131_vm14, %v1120_v28, %v5392_v27  ;;  %v1535_v28 = vld [vmem:[#allocation3 + $0x48] sm:$0x3f] }
 0x2c5   :  { %v1402_v57 = vpop.permute.xlu1 %1401  ;;  %1154 = vst [vmem:[#allocation4 + $0x140] sm:$0xf0] %v1136_v26 }
 0x2c6   :  { %v1416_v58 = vsel %vm1413_vm0, %v5324_v18, %v1402_v57  ;;  %v1417_v60 = vsel %vm1413_vm0, %v1402_v57, %v5382_v1  ;;  %1163 = vst [vmem:[#allocation4 + $0x188] sm:$0x3] %v1136_v26  ;;  %v1196_v57 = vrot.slane %v1176_v52, 6  ;;  %v1536_v26 = vld [vmem:[#allocation3 + $0x10] sm:$0x3f] }
 0x2c7   :  { %1433 = vst [vmem:[#allocation4 + $0x208] sm:$0xf0] %v1416_v58 }
 0x2c8   :  { %1434 = vst [vmem:[#allocation4 + $0x210] sm:$0xf0] %v1417_v60 }
 0x2c9   :  { %1442 = vst [vmem:[#allocation4 + $0x250] sm:$0x3] %v1416_v58  ;;  %1284 = vrot.lane.b32.xlu0 %v1255_v3, %s4454_s24  ;;  %v1602_v3 = vld [vmem:[#allocation3 + $0x28] sm:$0x3f] }
 0x2ca   :  { %1443 = vst [vmem:[#allocation4 + $0x258] sm:$0x3] %v1417_v60  ;;  %1040 = vrot.lane.b32.xlu2 %v1022_v0, %s4460_s30 }
 0x2cb   :  { %1724 = vrot.lane.b32.xlu1 %v1708_v2, %s4460_s30  ;;  %v1207_v18 = vpop.permute.xlu0 %1206  ;;  %v1603_v2 = vld [vmem:[#allocation3 + $0x48] sm:$0x3f] }
 0x2cc   :  { %v5405_v5 = vpop.permute.xlu2 %1720  ;;  %v1222_v8 = vsel %vm1218_vm15, %v5200_v61, %v1207_v18  ;;  %v1223_v12 = vsel %vm1218_vm15, %v1207_v18, %v5384_v41  ;;  %v1477_v18 = vrot.slane %v1457_v62, 6 }
 0x2cd   :  { %v1486_v6 = vpop.permute.xlu1 %1485  ;;  %1240 = vst [vmem:[#allocation4 + $0x180] sm:$0xfc] %v1222_v8  ;;  %v1622_v8 = vrot.slane %v1602_v3, 2 }
 0x2ce   :  { %v1502_v33 = vsel %vm1499_vm2, %v5338_v9, %v1486_v6  ;;  %v1503_v10 = vsel %vm1499_vm2, %v1486_v6, %v5394_v56  ;;  %1241 = vst [vmem:[#allocation4 + $0x188] sm:$0xfc] %v1223_v12  ;;  %v1623_v6 = vrot.slane %v1603_v2, 2  ;;  %v1690_v12 = vld [vmem:[#allocation3 + $0x48] sm:$0x3f] }
 0x2cf   :  { %1520 = vst [vmem:[#allocation4 + $0x250] sm:$0xfc] %v1502_v33 }
 0x2d0   :  { %1521 = vst [vmem:[#allocation4 + $0x258] sm:$0xfc] %v1503_v10 }
 0x2d1   :  { %1561 = vrot.lane.b32.xlu0 %v1534_v15, %s4453_s23  ;;  %v1458_v15 = vld [vmem:[#allocation3 + $0x10] sm:$0x3f] }
 0x2d2   :  { %1216 = vrot.lane.b32.xlu2 %v1197_v49, %s4458_s28  ;;  %v1710_v49 = vrot.slane %v1690_v12, 4 }
 0x2d3   :  { %1805 = vrot.lane.b32.xlu1 %v1791_v40, %s4465_s12  ;;  %v1632_v61 = vpop.permute.xlu0 %1631  ;;  %v1689_v40 = vld [vmem:[#allocation3 + $0x28] sm:$0x3f] }
 0x2d4   :  { %v5418_v9 = vpop.permute.xlu2 %1801  ;;  %v1648_v23 = vsel %vm1645_vm4, %v5233_v35, %v1632_v61 }
 0x2d5   :  { %v5420_v21 = vpop.permute.xlu1 %1633  ;;  %1666 = vst [vmem:[#allocation4 + $0x298] sm:$0xc0] %v1648_v23 }
 0x2d6   :  { %v1649_v25 = vsel %vm1645_vm4, %v1632_v61, %v5420_v21  ;;  %1675 = vst [vmem:[#allocation4 + $0x2e0] sm:$0xf] %v1648_v23  ;;  %v1709_v61 = vrot.slane %v1689_v40, 4  ;;  %v1478_v23 = vrot.slane %v1458_v15, 6 }
 0x2d7   :  { %1667 = vst [vmem:[#allocation4 + $0x2a0] sm:$0xc0] %v1649_v25 }
 0x2d8   :  { %1676 = vst [vmem:[#allocation4 + $0x2e8] sm:$0xf] %v1649_v25  ;;  %v1775_v25 = vld [vmem:[#allocation3 + $0x48] sm:$0x3f] }
 0x2d9   :  { %1042 = vrot.lane.b32.xlu0 %v1023_v29, %s4460_s30 }
 0x2da   :  { %1409 = vrot.lane.b32.xlu2 %v1393_v22, %s4462_s9 }
 0x2db   :  { %1563 = vrot.lane.b32.xlu1 %v1535_v28, %s4453_s23  ;;  %v962_v30 = vpop.permute.xlu0 %961  ;;  %v1774_v28 = vld [vmem:[#allocation3 + $0x28] sm:$0x3f] }
 0x2dc   :  { %v5429_v32 = vpop.permute.xlu2 %1559  ;;  %v973_v4 = vsel %vm967_vm8, %v5268_v59, %v962_v30  ;;  %v1792_v34 = vrot.slane %v1774_v28, 6 }
 0x2dd   :  { %v1719_v35 = vpop.permute.xlu1 %1718  ;;  %990 = vst [vmem:[#allocation4 + $0x100] sm:$0x3f] %v973_v4  ;;  %v1793_v4 = vrot.slane %v1775_v25, 6 }
 0x2de   :  { %v1734_v36 = vsel %vm1044_vm13, %v5352_v20, %v1719_v35  ;;  %v1735_v37 = vsel %vm1044_vm13, %v1719_v35, %v5405_v5 }
 0x2df   :  { %1752 = vst [vmem:[#allocation4 + $0x2e0] sm:$0xf0] %v1734_v36 }
 0x2e0   :  { %1753 = vst [vmem:[#allocation4 + $0x2e8] sm:$0xf0] %v1735_v37 }
 0x2e1   :  { %1761 = vst [vmem:[#allocation4 + $0x328] sm:$0x3] %v1734_v36  ;;  %1127 = vrot.lane.b32.xlu0 %v1109_v7, %s4456_s26 }
 0x2e2   :  { %1762 = vst [vmem:[#allocation4 + $0x330] sm:$0x3] %v1735_v37  ;;  %1493 = vrot.lane.b32.xlu2 %v1476_v43, %s4463_s10 }
 0x2e3   :  { %1129 = vrot.lane.b32.xlu1 %v1110_v45, %s4456_s26  ;;  %v1279_v59 = vpop.permute.xlu0 %1278  ;;  %v1776_v45 = vld [vmem:[#allocation3 + $0x10] sm:$0x3f] }
 0x2e4   :  { %v5440_v46 = vpop.permute.xlu2 %1125  ;;  %v1292_v47 = vsel %vm1286_vm9, %v5281_v13, %v1279_v59 }
 0x2e5   :  { %v1800_v20 = vpop.permute.xlu1 %1799  ;;  %1310 = vst [vmem:[#allocation4 + $0x1d8] sm:$0x3f] %v1292_v47  ;;  %v1843_v47 = vld [vmem:[#allocation3 + $0x20] sm:$0x3f] }
 0x2e6   :  { %v1815_v50 = vsel %vm1813_vm3, %v5366_v44, %v1800_v20  ;;  %v1816_v51 = vsel %vm1813_vm3, %v1800_v20, %v5418_v9  ;;  %v1794_v20 = vrot.slane %v1776_v45, 6 }
 0x2e7   :  { %1832 = vst [vmem:[#allocation4 + $0x320] sm:$0xfc] %v1815_v50 }
 0x2e8   :  { %1833 = vst [vmem:[#allocation4 + $0x328] sm:$0xfc] %v1816_v51 }
 0x2e9   :  { %1411 = vrot.lane.b32.xlu0 %v1394_v54, %s4462_s9 }
 0x2ea   :  { %1565 = vrot.lane.b32.xlu2 %v1536_v26, %s4453_s23  ;;  %v1846_v26 = vld [vmem:[#allocation3 + $0x28] sm:$0x3f] }
 0x2eb   :  { %1214 = vrot.lane.b32.xlu1 %v1196_v57, %s4458_s28  ;;  %v5451_v13 = vpop.permute.xlu0 %731  ;;  %v1844_v57 = vld [vmem:[#allocation3 + $0x8] sm:$0x3f] }
 0x2ec   :  { %v5453_v44 = vpop.permute.xlu2 %1210  ;;  %v743_v60 = vsel %vm737_vm10, %v5310_v19, %v5451_v13 }
 0x2ed   :  { %v964_v58 = vpop.permute.xlu1 %963  ;;  %v1224_v0 = vsel %vm1218_vm15, %v5384_v41, %v5453_v44  ;;  %760 = vst [vmem:[#allocation4 + $0x28] sm:$0xc0] %v743_v60 }
 0x2ee   :  { %v974_v63 = vsel %vm967_vm8, %v962_v30, %v964_v58  ;;  %1242 = vst [vmem:[#allocation4 + $0x190] sm:$0xfc] %v1224_v0  ;;  %v1691_v30 = vld [vmem:[#allocation3 + $0x10] sm:$0x3f]  ;;  %v1903_v0 = vld [vmem:[#allocation3 + $0x58] sm:$0x3f] }
 0x2ef   :  { %991 = vst [vmem:[#allocation4 + $0x108] sm:$0x3f] %v974_v63  ;;  %v1711_v36 = vrot.slane %v1691_v30, 4  ;;  %v1921_v3 = vrot.slane %v1903_v0, 2 }
 0x2f0   :  { %770 = vst [vmem:[#allocation4 + $0x70] sm:$0xf] %v743_v60 }
 0x2f1   :  { %1495 = vrot.lane.b32.xlu0 %v1477_v18, %s4463_s10  ;;  %v1847_v18 = vld [vmem:[#allocation3 + $0x48] sm:$0x3f] }
 0x2f2   :  { %1641 = vrot.lane.b32.xlu2 %v1623_v6, %s4464_s11  ;;  %v1848_v6 = vld [vmem:[#allocation3 + $0x10] sm:$0x3f] }
 0x2f3   :  { %1639 = vrot.lane.b32.xlu1 %v1622_v8, %s4464_s11  ;;  %v5465_v19 = vpop.permute.xlu0 %814 }
 0x2f4   :  { %v5467_v10 = vpop.permute.xlu2 %1635  ;;  %v826_v41 = vsel %vm820_vm11, %v5326_v55, %v5465_v19 }
 0x2f5   :  { %v1281_v33 = vpop.permute.xlu1 %1280  ;;  %v1650_v16 = vsel %vm1645_vm4, %v5420_v21, %v5467_v10  ;;  %843 = vst [vmem:[#allocation4 + $0x70] sm:$0xf0] %v826_v41 }
 0x2f6   :  { %v1293_v14 = vsel %vm1286_vm9, %v1279_v59, %v1281_v33  ;;  %1668 = vst [vmem:[#allocation4 + $0x2a8] sm:$0xc0] %v1650_v16  ;;  %v1624_v59 = vrot.slane %v1604_v48, 2  ;;  %v1911_v48 = vld [vmem:[#allocation3 + $0x10] sm:$0x3f] }
 0x2f7   :  { %1311 = vst [vmem:[#allocation4 + $0x1e0] sm:$0x3f] %v1293_v14  ;;  %v1906_v14 = vld [vmem:[#allocation3 + $0x20] sm:$0x3f]  ;;  %v1929_v45 = vrot.slane %v1911_v48, 2 }
 0x2f8   :  { %1677 = vst [vmem:[#allocation4 + $0x2f0] sm:$0xf] %v1650_v16  ;;  %v1905_v16 = vld [vmem:[#allocation3 + $0x50] sm:$0x3f]  ;;  %v2070_v48 = vld [vmem:[#allocation3 + $0x38] sm:$0x3f] }
 0x2f9   :  { %853 = vst [vmem:[#allocation4 + $0xb8] sm:$0x3] %v826_v41  ;;  %1728 = vrot.lane.b32.xlu0 %v1710_v49, %s4460_s30  ;;  %v1924_v49 = vrot.slane %v1906_v14, 2  ;;  %v2065_v14 = vld [vmem:[#allocation3 + $0x58] sm:$0x3f] }
 0x2fa   :  { %1726 = vrot.lane.b32.xlu2 %v1709_v61, %s4460_s30  ;;  %v1923_v61 = vrot.slane %v1905_v16, 2  ;;  %v1992_v16 = vld [vmem:[#allocation3 + $0x10] sm:$0x3f] }
 0x2fb   :  { %1497 = vrot.lane.b32.xlu1 %v1478_v23, %s4463_s10  ;;  %v5479_v55 = vpop.permute.xlu0 %897 }
 0x2fc   :  { %v966_v21 = vpop.permute.xlu2 %965  ;;  %v909_v35 = vsel %vm903_vm12, %v5340_v53, %v5479_v55 }
 0x2fd   :  { %v1558_v24 = vpop.permute.xlu1 %1557  ;;  %v975_v22 = vsel %vm967_vm8, %v964_v58, %v966_v21  ;;  %993 = vst.msk [vmem:[#allocation4 + $0x118] sm:$0x3f] %vm690_vm5, %v966_v21  ;;  %vm846_vm8 = vcmask 261124   ;;  %v1907_v21 = vld [vmem:[#allocation3 + $0x8] sm:$0x3f] }
 0x2fe   :  { %v1572_v38 = vsel %vm1567_vm1, %v5380_v31, %v1558_v24  ;;  %v1573_v29 = vsel %vm1567_vm1, %v1558_v24, %v5429_v32  ;;  %992 = vst [vmem:[#allocation4 + $0x110] sm:$0x3f] %v975_v22  ;;  %v1908_v22 = vld [vmem:[#allocation3 + $0x38] sm:$0x3f]  ;;  %v1925_v30 = vrot.slane %v1907_v21, 2 }
 0x2ff   :  { %1590 = vst [vmem:[#allocation4 + $0x2a8] sm:$0x3f] %v1572_v38  ;;  %v2066_v21 = vld [vmem:[#allocation3 + $0x18] sm:$0x3f] }
 0x300   :  { %1591 = vst [vmem:[#allocation4 + $0x2b0] sm:$0x3f] %v1573_v29  ;;  %v1909_v29 = vld [vmem:[#allocation3 + $0x28] sm:$0x3f] }
 0x301   :  { %926 = vst [vmem:[#allocation4 + $0xb8] sm:$0xfc] %v909_v35  ;;  %1809 = vrot.lane.b32.xlu0 %v1793_v4, %s4465_s12  ;;  %v1927_v35 = vrot.slane %v1909_v29, 2  ;;  %v1926_v4 = vrot.slane %v1908_v22, 2  ;;  %v2068_v29 = vld [vmem:[#allocation3 + $0x20] sm:$0x3f] }
 0x302   :  { %1807 = vrot.lane.b32.xlu2 %v1792_v34, %s4465_s12  ;;  %v2067_v22 = vld [vmem:[#allocation3 + $0x50] sm:$0x3f] }
 0x303   :  { %1730 = vrot.lane.b32.xlu1 %v1711_v36, %s4460_s30  ;;  %v5493_v31 = vpop.permute.xlu0 %1036 }
 0x304   :  { %v5495_v39 = vpop.permute.xlu2 %1282  ;;  %v1050_v53 = vsel %vm1044_vm13, %v5354_v17, %v5493_v31 }
 0x305   :  { %v734_v37 = vpop.permute.xlu1 %733  ;;  %v1294_v43 = vsel %vm1286_vm9, %v1281_v33, %v5495_v39  ;;  %1068 = vst [vmem:[#allocation4 + $0x100] sm:$0xc0] %v1050_v53  ;;  %v1904_v33 = vld [vmem:[#allocation3 + $0x18] sm:$0x3f] }
 0x306   :  { %v744_v7 = vsel %vm737_vm10, %v5451_v13, %v734_v37  ;;  %1312 = vst [vmem:[#allocation4 + $0x1e8] sm:$0x3f] %v1294_v43  ;;  %v1845_v13 = vld [vmem:[#allocation3 + $0x38] sm:$0x3f]  ;;  %v1922_v15 = vrot.slane %v1904_v33, 2 }
 0x307   :  { %761 = vst [vmem:[#allocation4 + $0x30] sm:$0xc0] %v744_v7 }
 0x308   :  { %771 = vst [vmem:[#allocation4 + $0x78] sm:$0xf] %v744_v7 }
 0x309   :  { %1077 = vst [vmem:[#allocation4 + $0x148] sm:$0xf] %v1050_v53  ;;  %1643 = vrot.lane.b32.xlu0 %v1624_v59, %s4464_s11  ;;  %v1984_v53 = vld [vmem:[#allocation3 + $0x58] sm:$0x3f] }
 0x30a   :  { %1864 = vrot.lane.b32.xlu2 %v1843_v47, %s4461_s8  ;;  %v2002_v43 = vrot.slane %v1984_v53, 4  ;;  %v2071_v53 = vld [vmem:[#allocation3 + $0x28] sm:$0x3f] }
 0x30b   :  { %1811 = vrot.lane.b32.xlu1 %v1794_v20, %s4465_s12  ;;  %v5507_v17 = vpop.permute.xlu0 %1212 }
 0x30c   :  { %v736_v50 = vpop.permute.xlu2 %735  ;;  %v1225_v54 = vsel %vm1218_vm15, %v5453_v44, %v5507_v17 }
 0x30d   :  { %v817_v11 = vpop.permute.xlu1 %816  ;;  %v745_v52 = vsel %vm737_vm10, %v734_v37, %v736_v50  ;;  %764 = vst.msk [vmem:[#allocation4 + $0x40] sm:$0xc0] %vm763_vm6, %v736_v50  ;;  %vm856_vm10 = vcmask 254976  }
 0x30e   :  { %v827_v51 = vsel %vm820_vm11, %v5465_v19, %v817_v11  ;;  %762 = vst [vmem:[#allocation4 + $0x38] sm:$0xc0] %v745_v52 }
 0x30f   :  { %844 = vst [vmem:[#allocation4 + $0x78] sm:$0xf0] %v827_v51 }
 0x310   :  { %854 = vst [vmem:[#allocation4 + $0xc0] sm:$0x3] %v827_v51 }
 0x311   :  { %772 = vst [vmem:[#allocation4 + $0x80] sm:$0xf] %v745_v52  ;;  %1866 = vrot.lane.b32.xlu0 %v1844_v57, %s4461_s8  ;;  %v1987_v52 = vld [vmem:[#allocation3 + $0x20] sm:$0x3f] }
 0x312   :  { %774 = vst.msk [vmem:[#allocation4 + $0x88] sm:$0xf] %vm773_vm7, %v736_v50  ;;  %1870 = vrot.lane.b32.xlu2 %v1846_v26, %s4461_s8  ;;  %v2005_v26 = vrot.slane %v1987_v52, 4 }
 0x313   :  { %1868 = vrot.lane.b32.xlu1 %v1845_v13, %s4461_s8  ;;  %1243 = vst [vmem:[#allocation4 + $0x198] sm:$0xfc] %v1225_v54  ;;  %v5520_v58 = vpop.permute.xlu0 %1405  ;;  %v1986_v54 = vld [vmem:[#allocation3 + $0x50] sm:$0x3f] }
 0x314   :  { %v819_v62 = vpop.permute.xlu2 %818  ;;  %v1418_v2 = vsel %vm1413_vm0, %v5382_v1, %v5520_v58  ;;  %v2004_v13 = vrot.slane %v1986_v54, 4  ;;  %v2073_v54 = vld [vmem:[#allocation3 + $0x10] sm:$0x3f] }
 0x315   :  { %v900_v60 = vpop.permute.xlu1 %899  ;;  %v828_v63 = vsel %vm820_vm11, %v817_v11, %v819_v62  ;;  %847 = vst.msk [vmem:[#allocation4 + $0x88] sm:$0xf0] %vm846_vm8, %v819_v62  ;;  %vm929_vm11 = vcmask 261122   ;;  %v1985_v11 = vld [vmem:[#allocation3 + $0x18] sm:$0x3f] }
 0x316   :  { %v910_v44 = vsel %vm903_vm12, %v5479_v55, %v900_v60  ;;  %845 = vst [vmem:[#allocation4 + $0x80] sm:$0xf0] %v828_v63  ;;  %v2003_v57 = vrot.slane %v1985_v11, 4  ;;  %v2072_v11 = vld [vmem:[#allocation3 + $0x48] sm:$0x3f] }
 0x317   :  { %927 = vst [vmem:[#allocation4 + $0xc0] sm:$0xfc] %v910_v44  ;;  %v1988_v44 = vld [vmem:[#allocation3 + $0x8] sm:$0x3f] }
 0x318   :  { %855 = vst [vmem:[#allocation4 + $0xc8] sm:$0x3] %v828_v63 }
 0x319   :  { %857 = vst.msk [vmem:[#allocation4 + $0xd0] sm:$0x3] %vm856_vm10, %v819_v62  ;;  %1872 = vrot.lane.b32.xlu0 %v1847_v18, %s4461_s8  ;;  %v2006_v18 = vrot.slane %v1988_v44, 4 }
 0x31a   :  { %1435 = vst [vmem:[#allocation4 + $0x218] sm:$0xf0] %v1418_v2  ;;  %1930 = vrot.lane.b32.xlu2 %v1921_v3, %s4466_s13  ;;  %v1989_v3 = vld [vmem:[#allocation3 + $0x38] sm:$0x3f] }
 0x31b   :  { %1874 = vrot.lane.b32.xlu1 %v1848_v6, %s4461_s8  ;;  %1444 = vst [vmem:[#allocation4 + $0x260] sm:$0x3] %v1418_v2  ;;  %v5533_v8 = vpop.permute.xlu0 %1489  ;;  %v1990_v2 = vld [vmem:[#allocation3 + $0x28] sm:$0x3f] }
 0x31c   :  { %v902_v1 = vpop.permute.xlu2 %901  ;;  %v1504_v40 = vsel %vm1499_vm2, %v5394_v56, %v5533_v8  ;;  %v2008_v6 = vrot.slane %v1990_v2, 4  ;;  %v2138_v2 = vld [vmem:[#allocation3 + $0x20] sm:$0x3f] }
 0x31d   :  { %v1039_v19 = vpop.permute.xlu1 %1038  ;;  %v911_v12 = vsel %vm903_vm12, %v900_v60, %v902_v1  ;;  %930 = vst.msk [vmem:[#allocation4 + $0xd0] sm:$0xfc] %vm929_vm11, %v902_v1 }
 0x31e   :  { %v1051_v41 = vsel %vm1044_vm13, %v5493_v31, %v1039_v19  ;;  %928 = vst [vmem:[#allocation4 + $0xc8] sm:$0xfc] %v911_v12  ;;  %v1910_v31 = vld [vmem:[#allocation3 + $0x48] sm:$0x3f] }
 0x31f   :  { %1069 = vst [vmem:[#allocation4 + $0x108] sm:$0xc0] %v1051_v41  ;;  %v1928_v7 = vrot.slane %v1910_v31, 2 }
 0x320   :  { %1078 = vst [vmem:[#allocation4 + $0x150] sm:$0xf] %v1051_v41  ;;  %v1991_v41 = vld [vmem:[#allocation3 + $0x48] sm:$0x3f] }
 0x321   :  { %1522 = vst [vmem:[#allocation4 + $0x260] sm:$0xfc] %v1504_v40  ;;  %1932 = vrot.lane.b32.xlu0 %v1922_v15, %s4466_s13  ;;  %v2009_v40 = vrot.slane %v1991_v41, 4  ;;  %v2083_v15 = vrot.slane %v2065_v14, 6  ;;  %v2199_v14 = vld [vmem:[#allocation3 + $0x18] sm:$0x3f] }
 0x322   :  { %1936 = vrot.lane.b32.xlu2 %v1924_v49, %s4466_s13  ;;  %v2010_v49 = vrot.slane %v1992_v16, 4  ;;  %v2217_v16 = vrot.slane %v2199_v14, 2 }
 0x323   :  { %1934 = vrot.lane.b32.xlu1 %v1923_v61, %s4466_s13  ;;  %v5545_v23 = vpop.permute.xlu0 %1637 }
 0x324   :  { %v5547_v55 = vpop.permute.xlu2 %1040  ;;  %v1651_v56 = vsel %vm1645_vm4, %v5467_v10, %v5545_v23 }
 0x325   :  { %v1124_v24 = vpop.permute.xlu1 %1123  ;;  %v1052_v25 = vsel %vm1044_vm13, %v1039_v19, %v5547_v55  ;;  %1669 = vst [vmem:[#allocation4 + $0x2b0] sm:$0xc0] %v1651_v56 }
 0x326   :  { %v1137_v38 = vsel %vm1131_vm14, %v5392_v27, %v1124_v24  ;;  %1070 = vst [vmem:[#allocation4 + $0x110] sm:$0xc0] %v1052_v25  ;;  %v1138_v28 = vsel %vm1131_vm14, %v1124_v24, %v5440_v46 }
 0x327   :  { %1079 = vst [vmem:[#allocation4 + $0x158] sm:$0xf] %v1052_v25 }
 0x328   :  { %1155 = vst [vmem:[#allocation4 + $0x148] sm:$0xf0] %v1137_v38 }
 0x329   :  { %1156 = vst [vmem:[#allocation4 + $0x150] sm:$0xf0] %v1138_v28  ;;  %1938 = vrot.lane.b32.xlu0 %v1925_v30, %s4466_s13  ;;  %v2086_v30 = vrot.slane %v2068_v29, 6  ;;  %v2201_v29 = vld [vmem:[#allocation3 + $0x20] sm:$0x3f] }
 0x32a   :  { %1164 = vst [vmem:[#allocation4 + $0x190] sm:$0x3] %v1137_v38  ;;  %1942 = vrot.lane.b32.xlu2 %v1927_v35, %s4466_s13  ;;  %v2085_v35 = vrot.slane %v2067_v22, 6 }
 0x32b   :  { %1940 = vrot.lane.b32.xlu1 %v1926_v4, %s4466_s13  ;;  %1165 = vst [vmem:[#allocation4 + $0x198] sm:$0x3] %v1138_v28  ;;  %v1723_v27 = vpop.permute.xlu0 %1722  ;;  %v2084_v28 = vrot.slane %v2066_v21, 6  ;;  %v2200_v21 = vld [vmem:[#allocation3 + $0x50] sm:$0x3f] }
 0x32c   :  { %1678 = vst [vmem:[#allocation4 + $0x2f8] sm:$0xf] %v1651_v56  ;;  %v5561_v34 = vpop.permute.xlu2 %1216  ;;  %v1736_v36 = vsel %vm1044_vm13, %v5405_v5, %v1723_v27  ;;  %v2218_v22 = vrot.slane %v2200_v21, 2 }
 0x32d   :  { %v1408_v10 = vpop.permute.xlu1 %1407  ;;  %1754 = vst [vmem:[#allocation4 + $0x2f0] sm:$0xf0] %v1736_v36 }
 0x32e   :  { %v1419_v37 = vsel %vm1413_vm0, %v5520_v58, %v1408_v10  ;;  %1763 = vst [vmem:[#allocation4 + $0x338] sm:$0x3] %v1736_v36  ;;  %v2069_v36 = vld [vmem:[#allocation3 + $0x8] sm:$0x3f] }
 0x32f   :  { %1436 = vst [vmem:[#allocation4 + $0x220] sm:$0xf0] %v1419_v37 }
 0x330   :  { %1445 = vst [vmem:[#allocation4 + $0x268] sm:$0x3] %v1419_v37 }
 0x331   :  { %1944 = vrot.lane.b32.xlu0 %v1928_v7, %s4466_s13  ;;  %v2087_v7 = vrot.slane %v2069_v36, 6 }
 0x332   :  { %2011 = vrot.lane.b32.xlu2 %v2002_v43, %s4467_s14  ;;  %v2089_v43 = vrot.slane %v2071_v53, 6 }
 0x333   :  { %1946 = vrot.lane.b32.xlu1 %v1929_v45, %s4466_s13  ;;  %v1804_v5 = vpop.permute.xlu0 %1803  ;;  %v2088_v45 = vrot.slane %v2070_v48, 6 }
 0x334   :  { %v5570_v20 = vpop.permute.xlu2 %1409  ;;  %v1817_v47 = vsel %vm1813_vm3, %v5418_v9, %v1804_v5 }
 0x335   :  { %v1492_v59 = vpop.permute.xlu1 %1491  ;;  %v1420_v51 = vsel %vm1413_vm0, %v1408_v10, %v5570_v20  ;;  %1834 = vst [vmem:[#allocation4 + $0x330] sm:$0xfc] %v1817_v47 }
 0x336   :  { %v1505_v50 = vsel %vm1499_vm2, %v5533_v8, %v1492_v59  ;;  %1437 = vst [vmem:[#allocation4 + $0x228] sm:$0xf0] %v1420_v51  ;;  %v2007_v8 = vrot.slane %v1989_v3, 4 }
 0x337   :  { %1523 = vst [vmem:[#allocation4 + $0x268] sm:$0xfc] %v1505_v50 }
 0x338   :  { %1446 = vst [vmem:[#allocation4 + $0x270] sm:$0x3] %v1420_v51 }
 0x339   :  { %2013 = vrot.lane.b32.xlu0 %v2003_v57, %s4467_s14  ;;  %v2090_v57 = vrot.slane %v2072_v11, 6  ;;  %v2280_v11 = vld [vmem:[#allocation3 + $0x18] sm:$0x3f] }
 0x33a   :  { %2017 = vrot.lane.b32.xlu2 %v2005_v26, %s4467_s14  ;;  %v2091_v26 = vrot.slane %v2073_v54, 6 }
 0x33b   :  { %2015 = vrot.lane.b32.xlu1 %v2004_v13, %s4467_s14  ;;  %v1285_v9 = vpop.permute.xlu0 %1284 }
 0x33c   :  { %v5581_v60 = vpop.permute.xlu2 %1493  ;;  %v1295_v62 = vsel %vm1286_vm9, %v5495_v39, %v1285_v9  ;;  %vm6644_vm9 = vcmask 359424  }
 0x33d   :  { %v1725_v58 = vpop.permute.xlu1 %1724  ;;  %v1506_v0 = vsel %vm1499_vm2, %v1492_v59, %v5581_v60  ;;  %1313 = vst.msk [vmem:[#allocation4 + $0x1f0] sm:$0x3f] %vm690_vm5, %v1295_v62  ;;  %vm6645_vm12 = vmmov %vm6644_vm9 }
 0x33e   :  { %v1737_v63 = vsel %vm1044_vm13, %v1723_v27, %v1725_v58  ;;  %1524 = vst [vmem:[#allocation4 + $0x270] sm:$0xfc] %v1506_v0  ;;  %v2139_v0 = vld [vmem:[#allocation3 + $0x8] sm:$0x3f] }
 0x33f   :  { %1755 = vst [vmem:[#allocation4 + $0x2f8] sm:$0xf0] %v1737_v63 }
 0x340   :  { %1764 = vst [vmem:[#allocation4 + $0x340] sm:$0x3] %v1737_v63  ;;  %v2137_v63 = vld [vmem:[#allocation3 + $0x50] sm:$0x3f] }
 0x341   :  { %2019 = vrot.lane.b32.xlu0 %v2006_v18, %s4467_s14 }
 0x342   :  { %2023 = vrot.lane.b32.xlu2 %v2008_v6, %s4467_s14  ;;  %v2140_v6 = vld [vmem:[#allocation3 + $0x38] sm:$0x3f] }
 0x343   :  { %2021 = vrot.lane.b32.xlu1 %v2007_v8, %s4467_s14  ;;  %v1562_v39 = vpop.permute.xlu0 %1561  ;;  %v2142_v8 = vld [vmem:[#allocation3 + $0x48] sm:$0x3f] }
 0x344   :  { %v1566_v1 = vpop.permute.xlu2 %1565  ;;  %v1574_v33 = vsel %vm1567_vm1, %v5429_v32, %v1562_v39 }
 0x345   :  { %v1806_v19 = vpop.permute.xlu1 %1805  ;;  %1592 = vst [vmem:[#allocation4 + $0x2b8] sm:$0x3f] %v1574_v33 }
 0x346   :  { %v1818_v12 = vsel %vm1813_vm3, %v1804_v5, %v1806_v19 }
 0x347   :  { %1835 = vst [vmem:[#allocation4 + $0x338] sm:$0xfc] %v1818_v12 }
 0x349   :  { %2025 = vrot.lane.b32.xlu0 %v2009_v40, %s4467_s14  ;;  %v2143_v40 = vld [vmem:[#allocation3 + $0x10] sm:$0x3f] }
 0x34a   :  { %2092 = vrot.lane.b32.xlu2 %v2083_v15, %s4462_s9  ;;  %v2144_v15 = vld [vmem:[#allocation3 + $0x40] sm:$0x3f] }
 0x34b   :  { %2027 = vrot.lane.b32.xlu1 %v2010_v49, %s4467_s14  ;;  %v1043_v61 = vpop.permute.xlu0 %1042  ;;  %s4473_s14 = smov 96  }
 0x34c   :  { %v5598_v56 = vpop.permute.xlu2 %1641  ;;  %v1053_v32 = vsel %vm1044_vm13, %v5547_v55, %v1043_v61 }
 0x34d   :  { %v1564_v24 = vpop.permute.xlu1 %1563  ;;  %1071 = vst.msk [vmem:[#allocation4 + $0x118] sm:$0xc0] %vm763_vm6, %v1053_v32 }
 0x34e   :  { %v1575_v25 = vsel %vm1567_vm1, %v1562_v39, %v1564_v24  ;;  %v1576_v38 = vsel %vm1567_vm1, %v1564_v24, %v1566_v1  ;;  %1080 = vst.msk [vmem:[#allocation4 + $0x160] sm:$0xf] %vm773_vm7, %v1053_v32  ;;  %v2141_v39 = vld [vmem:[#allocation3 + $0x28] sm:$0x3f]  ;;  %vm6648_vm1 = vmmov %vm6644_vm9 }
 0x34f   :  { %1593 = vst [vmem:[#allocation4 + $0x2c0] sm:$0x3f] %v1575_v25 }
 0x350   :  { %1594 = vst.msk [vmem:[#allocation4 + $0x2c8] sm:$0x3f] %vm690_vm5, %v1576_v38  ;;  %v2202_v38 = vld [vmem:[#allocation3 + $0x8] sm:$0x3f] }
 0x351   :  { %2094 = vrot.lane.b32.xlu0 %v2084_v28, %s4462_s9  ;;  %v2220_v28 = vrot.slane %v2202_v38, 2 }
 0x352   :  { %2098 = vrot.lane.b32.xlu2 %v2086_v30, %s4462_s9  ;;  %v2219_v30 = vrot.slane %v2201_v29, 2 }
 0x353   :  { %2096 = vrot.lane.b32.xlu1 %v2085_v35, %s4462_s9  ;;  %v1128_v55 = vpop.permute.xlu0 %1127 }
 0x354   :  { %v5610_v4 = vpop.permute.xlu2 %1726  ;;  %v1139_v10 = vsel %vm1131_vm14, %v5440_v46, %v1128_v55 }
 0x355   :  { %v1130_v27 = vpop.permute.xlu1 %1129  ;;  %v1738_v31 = vsel %vm1044_vm13, %v1725_v58, %v5610_v4  ;;  %1157 = vst [vmem:[#allocation4 + $0x158] sm:$0xf0] %v1139_v10 }
 0x356   :  { %v1140_v37 = vsel %vm1131_vm14, %v1128_v55, %v1130_v27  ;;  %1756 = vst [vmem:[#allocation4 + $0x300] sm:$0xf0] %v1738_v31  ;;  %v2203_v27 = vld [vmem:[#allocation3 + $0x38] sm:$0x3f]  ;;  %vm6646_vm14 = vmmov %vm6644_vm9 }
 0x357   :  { %1765 = vst [vmem:[#allocation4 + $0x348] sm:$0x3] %v1738_v31  ;;  %v2205_v31 = vld [vmem:[#allocation3 + $0x48] sm:$0x3f]  ;;  %v2221_v53 = vrot.slane %v2203_v27, 2 }
 0x358   :  { %1158 = vst.msk [vmem:[#allocation4 + $0x160] sm:$0xf0] %vm846_vm8, %v1140_v37  ;;  %v2223_v48 = vrot.slane %v2205_v31, 2 }
 0x359   :  { %1166 = vst [vmem:[#allocation4 + $0x1a0] sm:$0x3] %v1139_v10  ;;  %2100 = vrot.lane.b32.xlu0 %v2087_v7, %s4462_s9 }
 0x35a   :  { %1167 = vst.msk [vmem:[#allocation4 + $0x1a8] sm:$0x3] %vm856_vm10, %v1140_v37  ;;  %2104 = vrot.lane.b32.xlu2 %v2089_v43, %s4462_s9  ;;  %v2204_v37 = vld [vmem:[#allocation3 + $0x28] sm:$0x3f] }
 0x35b   :  { %2102 = vrot.lane.b32.xlu1 %v2088_v45, %s4462_s9  ;;  %v1412_v46 = vpop.permute.xlu0 %1411  ;;  %v2222_v7 = vrot.slane %v2204_v37, 2 }
 0x35c   :  { %v1808_v5 = vpop.permute.xlu2 %1807  ;;  %v1421_v47 = vsel %vm1413_vm0, %v5570_v20, %v1412_v46  ;;  %1439 = vst.msk [vmem:[#allocation4 + $0x238] sm:$0xf0] %vm846_vm8, %v1412_v46  ;;  %v2136_v20 = vld [vmem:[#allocation3 + $0x18] sm:$0x3f] }
 0x35d   :  { %v1215_v59 = vpop.permute.xlu1 %1214  ;;  %v1819_v50 = vsel %vm1813_vm3, %v1806_v19, %v1808_v5  ;;  %1438 = vst [vmem:[#allocation4 + $0x230] sm:$0xf0] %v1421_v47 }
 0x35e   :  { %v1226_v51 = vsel %vm1218_vm15, %v5507_v17, %v1215_v59  ;;  %v1227_v52 = vsel %vm1218_vm15, %v1215_v59, %v5561_v34  ;;  %1836 = vst [vmem:[#allocation4 + $0x340] sm:$0xfc] %v1819_v50  ;;  %vm6647_vm15 = vmmov %vm6644_vm9  ;;  %v2206_v59 = vld [vmem:[#allocation3 + $0x10] sm:$0x3f]  ;;  %v2207_v50 = vld [vmem:[#allocation3 + $0x40] sm:$0x3f] }
 0x35f   :  { %1244 = vst [vmem:[#allocation4 + $0x1a0] sm:$0xfc] %v1226_v51  ;;  %v2224_v51 = vrot.slane %v2206_v59, 2  ;;  %v2225_v54 = vrot.slane %v2207_v50, 2 }
 0x360   :  { %1245 = vst.msk [vmem:[#allocation4 + $0x1a8] sm:$0xfc] %vm929_vm11, %v1227_v52  ;;  %v2298_v52 = vrot.slane %v2280_v11, 4 }
 0x361   :  { %1447 = vst [vmem:[#allocation4 + $0x278] sm:$0x3] %v1421_v47  ;;  %2106 = vrot.lane.b32.xlu0 %v2090_v57, %s4462_s9 }
 0x362   :  { %1448 = vst.msk [vmem:[#allocation4 + $0x280] sm:$0x3] %vm856_vm10, %v1412_v46  ;;  %2154 = vrot.lane.b32.xlu2 %v2136_v20, %s4468_s15 }
 0x363   :  { %2108 = vrot.lane.b32.xlu1 %v2091_v26, %s4462_s9  ;;  %v1496_v17 = vpop.permute.xlu0 %1495 }
 0x364   :  { %v5635_v34 = vpop.permute.xlu2 %1864  ;;  %v1507_v9 = vsel %vm1499_vm2, %v5581_v60, %v1496_v17 }
 0x365   :  { %v1640_v13 = vpop.permute.xlu1 %1639  ;;  %v1879_v58 = vsel %vm6644_vm9, %v5312_v42, %v5635_v34  ;;  %1525 = vst [vmem:[#allocation4 + $0x278] sm:$0xfc] %v1507_v9  ;;  %vm2029_vm9 = vcmask 293888  }
 0x366   :  { %v1652_v62 = vsel %vm1645_vm4, %v5545_v23, %v1640_v13  ;;  %v1653_v44 = vsel %vm1645_vm4, %v1640_v13, %v5598_v56  ;;  %1896 = vst [vmem:[#allocation4 + $0x370] sm:$0x3f] %v1879_v58  ;;  %v2283_v58 = vld [vmem:[#allocation3 + $0x8] sm:$0x3f] }
 0x367   :  { %1670 = vst [vmem:[#allocation4 + $0x2b8] sm:$0xc0] %v1652_v62 }
 0x368   :  { %1671 = vst [vmem:[#allocation4 + $0x2c0] sm:$0xc0] %v1653_v44 }
 0x369   :  { %1679 = vst [vmem:[#allocation4 + $0x300] sm:$0xf] %v1652_v62  ;;  %2156 = vrot.lane.b32.xlu0 %v2137_v63, %s4468_s15  ;;  %v2282_v62 = vld [vmem:[#allocation3 + $0x20] sm:$0x3f]  ;;  %v2301_v63 = vrot.slane %v2283_v58, 4 }
 0x36a   :  { %1680 = vst [vmem:[#allocation4 + $0x308] sm:$0xf] %v1653_v44  ;;  %2160 = vrot.lane.b32.xlu2 %v2139_v0, %s4468_s15  ;;  %v2300_v0 = vrot.slane %v2282_v62, 4 }
 0x36b   :  { %2158 = vrot.lane.b32.xlu1 %v2138_v2, %s4468_s15  ;;  %v1729_v42 = vpop.permute.xlu0 %1728 }
 0x36c   :  { %v5649_v23 = vpop.permute.xlu2 %1870  ;;  %v1739_v3 = vsel %vm1044_vm13, %v5610_v4, %v1729_v42 }
 0x36d   :  { %v1498_v60 = vpop.permute.xlu1 %1497  ;;  %1757 = vst [vmem:[#allocation4 + $0x308] sm:$0xf0] %v1739_v3 }
 0x36e   :  { %v1508_v18 = vsel %vm1499_vm2, %v1496_v17, %v1498_v60  ;;  %1766 = vst [vmem:[#allocation4 + $0x350] sm:$0x3] %v1739_v3  ;;  %vm6649_vm2 = vmmov %vm6648_vm1  ;;  %v2284_v3 = vld [vmem:[#allocation3 + $0x38] sm:$0x3f] }
 0x36f   :  { %1526 = vst.msk [vmem:[#allocation4 + $0x280] sm:$0xfc] %vm929_vm11, %v1508_v18 }
 0x371   :  { %2162 = vrot.lane.b32.xlu0 %v2140_v6, %s4468_s15 }
 0x372   :  { %2166 = vrot.lane.b32.xlu2 %v2142_v8, %s4468_s15  ;;  %v2286_v8 = vld [vmem:[#allocation3 + $0x48] sm:$0x3f] }
 0x373   :  { %2164 = vrot.lane.b32.xlu1 %v2141_v39, %s4468_s15  ;;  %v1810_v19 = vpop.permute.xlu0 %1809  ;;  %v2285_v39 = vld [vmem:[#allocation3 + $0x28] sm:$0x3f] }
 0x374   :  { %v5658_v1 = vpop.permute.xlu2 %1930  ;;  %v1820_v41 = vsel %vm1813_vm3, %v1808_v5, %v1810_v19 }
 0x375   :  { %v1731_v33 = vpop.permute.xlu1 %1730  ;;  %1837 = vst [vmem:[#allocation4 + $0x348] sm:$0xfc] %v1820_v41 }
 0x376   :  { %v1740_v12 = vsel %vm1044_vm13, %v1729_v42, %v1731_v33  ;;  %v2303_v33 = vrot.slane %v2285_v39, 4  ;;  %v2437_v39 = vld [vmem:[#allocation3 + $0x38] sm:$0x3f] }
 0x377   :  { %1758 = vst.msk [vmem:[#allocation4 + $0x310] sm:$0xf0] %vm846_vm8, %v1740_v12 }
 0x378   :  { %1767 = vst.msk [vmem:[#allocation4 + $0x358] sm:$0x3] %vm856_vm10, %v1740_v12 }
 0x379   :  { %2168 = vrot.lane.b32.xlu0 %v2143_v40, %s4468_s15  ;;  %v2287_v40 = vld [vmem:[#allocation3 + $0x10] sm:$0x3f] }
 0x37a   :  { %2226 = vrot.lane.b32.xlu2 %v2217_v16, %s4469_s16 }
 0x37b   :  { %2170 = vrot.lane.b32.xlu1 %v2144_v15, %s4468_s15  ;;  %v1644_v49 = vpop.permute.xlu0 %1643 }
 0x37c   :  { %v5667_v61 = vpop.permute.xlu2 %1936  ;;  %v1654_v32 = vsel %vm1645_vm4, %v5598_v56, %v1644_v49  ;;  %vm1948_vm4 = vcmask 326656   ;;  %v2361_v49 = vld [vmem:[#allocation3 + $0x18] sm:$0x3f] }
 0x37d   :  { %v1812_v24 = vpop.permute.xlu1 %1811  ;;  %1672 = vst.msk [vmem:[#allocation4 + $0x2c8] sm:$0xc0] %vm763_vm6, %v1654_v32 }
 0x37e   :  { %v1821_v25 = vsel %vm1813_vm3, %v1810_v19, %v1812_v24  ;;  %1839 = vst.msk [vmem:[#allocation4 + $0x358] sm:$0xfc] %vm929_vm11, %v1812_v24  ;;  %v2302_v19 = vrot.slane %v2284_v3, 4  ;;  %v2305_v24 = vrot.slane %v2287_v40, 4  ;;  %v2440_v40 = vld [vmem:[#allocation3 + $0x10] sm:$0x3f] }
 0x37f   :  { %1838 = vst [vmem:[#allocation4 + $0x350] sm:$0xfc] %v1821_v25 }
 0x380   :  { %1681 = vst.msk [vmem:[#allocation4 + $0x310] sm:$0xf] %vm773_vm7, %v1654_v32  ;;  %v2379_v32 = vrot.slane %v2361_v49, 6 }
 0x381   :  { %2228 = vrot.lane.b32.xlu0 %v2218_v22, %s4469_s16 }
 0x382   :  { %2232 = vrot.lane.b32.xlu2 %v2220_v28, %s4469_s16  ;;  %v2362_v28 = vld [vmem:[#allocation3 + $0x50] sm:$0x3f] }
 0x383   :  { %2230 = vrot.lane.b32.xlu1 %v2219_v30, %s4469_s16  ;;  %v1867_v56 = vpop.permute.xlu0 %1866 }
 0x384   :  { %v5678_v35 = vpop.permute.xlu2 %1942  ;;  %v1880_v4 = vsel %vm6645_vm12, %v5635_v34, %v1867_v56  ;;  %v2281_v34 = vld [vmem:[#allocation3 + $0x50] sm:$0x3f]  ;;  %vm2172_vm12 = vcmask 523264  }
 0x385   :  { %v1869_v55 = vpop.permute.xlu1 %1868  ;;  %1897 = vst [vmem:[#allocation4 + $0x378] sm:$0x3f] %v1880_v4  ;;  %v2299_v44 = vrot.slane %v2281_v34, 4  ;;  %v2380_v4 = vrot.slane %v2362_v28, 6  ;;  %v2433_v34 = vld [vmem:[#allocation3 + $0x18] sm:$0x3f] }
 0x386   :  { %v1882_v10 = vsel %vm6646_vm14, %v1869_v55, %v5649_v23  ;;  %v1881_v36 = vsel %vm6647_vm15, %v1867_v56, %v1869_v55  ;;  %v2363_v55 = vld [vmem:[#allocation3 + $0x20] sm:$0x3f]  ;;  %vm2244_vm14 = vcmask 490496  }
 0x387   :  { %1899 = vst [vmem:[#allocation4 + $0x388] sm:$0x3f] %v1882_v10  ;;  %v2381_v10 = vrot.slane %v2363_v55, 6 }
 0x388   :  { %1898 = vst [vmem:[#allocation4 + $0x380] sm:$0x3f] %v1881_v36 }
 0x389   :  { %2234 = vrot.lane.b32.xlu0 %v2221_v53, %s4469_s16 }
 0x38a   :  { %2238 = vrot.lane.b32.xlu2 %v2223_v48, %s4469_s16  ;;  %v2365_v48 = vld [vmem:[#allocation3 + $0x38] sm:$0x3f] }
 0x38b   :  { %2236 = vrot.lane.b32.xlu1 %v2222_v7, %s4469_s16  ;;  %v1873_v43 = vpop.permute.xlu0 %1872 }
 0x38c   :  { %v5688_v45 = vpop.permute.xlu2 %2011  ;;  %v1883_v5 = vsel %vm6648_vm1, %v5649_v23, %v1873_v43 }
 0x38d   :  { %v1875_v46 = vpop.permute.xlu1 %1874  ;;  %1900 = vst [vmem:[#allocation4 + $0x390] sm:$0x3f] %v1883_v5  ;;  %v2383_v5 = vrot.slane %v2365_v48, 6 }
 0x38e   :  { %1902 = vst.msk [vmem:[#allocation4 + $0x3a0] sm:$0x3f] %vm690_vm5, %v1875_v46  ;;  %v1884_v47 = vsel %vm6649_vm2, %v1873_v43, %v1875_v46  ;;  %v2366_v46 = vld [vmem:[#allocation3 + $0x28] sm:$0x3f] }
 0x38f   :  { %1901 = vst [vmem:[#allocation4 + $0x398] sm:$0x3f] %v1884_v47  ;;  %v2384_v47 = vrot.slane %v2366_v46, 6 }
 0x391   :  { %2240 = vrot.lane.b32.xlu0 %v2224_v51, %s4469_s16 }
 0x392   :  { %2307 = vrot.lane.b32.xlu2 %v2298_v52, %s4470_s17 }
 0x393   :  { %2242 = vrot.lane.b32.xlu1 %v2225_v54, %s4469_s16  ;;  %v1933_v57 = vpop.permute.xlu0 %1932  ;;  %v2368_v54 = vld [vmem:[#allocation3 + $0x10] sm:$0x3f] }
 0x394   :  { %v5697_v26 = vpop.permute.xlu2 %2017  ;;  %v1949_v17 = vsel %vm1948_vm4, %v5658_v1, %v1933_v57  ;;  %v2304_v1 = vrot.slane %v2286_v8, 4 }
 0x395   :  { %v1935_v20 = vpop.permute.xlu1 %1934  ;;  %1966 = vst [vmem:[#allocation4 + $0x360] sm:$0xc0] %v1949_v17 }
 0x396   :  { %v1951_v13 = vsel %vm1948_vm4, %v1935_v20, %v5667_v61  ;;  %v1950_v9 = vsel %vm1948_vm4, %v1933_v57, %v1935_v20  ;;  %1975 = vst [vmem:[#allocation4 + $0x3a8] sm:$0xf] %v1949_v17  ;;  %v2386_v20 = vrot.slane %v2368_v54, 6 }
 0x397   :  { %1968 = vst [vmem:[#allocation4 + $0x370] sm:$0xc0] %v1951_v13 }
 0x398   :  { %1977 = vst [vmem:[#allocation4 + $0x3b8] sm:$0xf] %v1951_v13 }
 0x399   :  { %1967 = vst [vmem:[#allocation4 + $0x368] sm:$0xc0] %v1950_v9  ;;  %2309 = vrot.lane.b32.xlu0 %v2299_v44, %s4470_s17 }
 0x39a   :  { %1976 = vst [vmem:[#allocation4 + $0x3b0] sm:$0xf] %v1950_v9  ;;  %2313 = vrot.lane.b32.xlu2 %v2301_v63, %s4470_s17 }
 0x39b   :  { %2311 = vrot.lane.b32.xlu1 %v2300_v0, %s4470_s17  ;;  %v1939_v2 = vpop.permute.xlu0 %1938  ;;  %v2434_v0 = vld [vmem:[#allocation3 + $0x50] sm:$0x3f] }
 0x39c   :  { %v5707_v42 = vpop.permute.xlu2 %2023  ;;  %v1952_v60 = vsel %vm1948_vm4, %v5667_v61, %v1939_v2  ;;  %v2288_v61 = vld [vmem:[#allocation3 + $0x40] sm:$0x3f] }
 0x39d   :  { %v1941_v23 = vpop.permute.xlu1 %1940  ;;  %1969 = vst [vmem:[#allocation4 + $0x378] sm:$0xc0] %v1952_v60  ;;  %v2306_v21 = vrot.slane %v2288_v61, 4 }
 0x39e   :  { %v1954_v18 = vsel %vm1948_vm4, %v1941_v23, %v5678_v35  ;;  %v1953_v6 = vsel %vm1948_vm4, %v1939_v2, %v1941_v23  ;;  %1978 = vst [vmem:[#allocation4 + $0x3c0] sm:$0xf] %v1952_v60  ;;  %v2436_v2 = vld [vmem:[#allocation3 + $0x8] sm:$0x3f] }
 0x39f   :  { %1971 = vst [vmem:[#allocation4 + $0x388] sm:$0xc0] %v1954_v18 }
 0x3a0   :  { %1980 = vst [vmem:[#allocation4 + $0x3d0] sm:$0xf] %v1954_v18 }
 0x3a1   :  { %1970 = vst [vmem:[#allocation4 + $0x380] sm:$0xc0] %v1953_v6  ;;  %2315 = vrot.lane.b32.xlu0 %v2302_v19, %s4470_s17  ;;  %v2439_v19 = vld [vmem:[#allocation3 + $0x48] sm:$0x3f] }
 0x3a2   :  { %1979 = vst [vmem:[#allocation4 + $0x3c8] sm:$0xf] %v1953_v6  ;;  %2319 = vrot.lane.b32.xlu2 %v2304_v1, %s4470_s17  ;;  %v2438_v1 = vld [vmem:[#allocation3 + $0x28] sm:$0x3f] }
 0x3a3   :  { %2317 = vrot.lane.b32.xlu1 %v2303_v33, %s4470_s17  ;;  %v1945_v41 = vpop.permute.xlu0 %1944 }
 0x3a4   :  { %v5717_v12 = vpop.permute.xlu2 %2092  ;;  %v1955_v16 = vsel %vm1948_vm4, %v5678_v35, %v1945_v41  ;;  %v2364_v35 = vld [vmem:[#allocation3 + $0x8] sm:$0x3f] }
 0x3a5   :  { %v1947_v14 = vpop.permute.xlu1 %1946  ;;  %1972 = vst [vmem:[#allocation4 + $0x390] sm:$0xc0] %v1955_v16  ;;  %v2382_v27 = vrot.slane %v2364_v35, 6 }
 0x3a6   :  { %1974 = vst.msk [vmem:[#allocation4 + $0x3a0] sm:$0xc0] %vm763_vm6, %v1947_v14  ;;  %v1956_v15 = vsel %vm1948_vm4, %v1945_v41, %v1947_v14 }
 0x3a7   :  { %1983 = vst.msk [vmem:[#allocation4 + $0x3e8] sm:$0xf] %vm773_vm7, %v1947_v14 }
 0x3a8   :  { %1973 = vst [vmem:[#allocation4 + $0x398] sm:$0xc0] %v1956_v15 }
 0x3a9   :  { %1981 = vst [vmem:[#allocation4 + $0x3d8] sm:$0xf] %v1955_v16  ;;  %2321 = vrot.lane.b32.xlu0 %v2305_v24, %s4470_s17 }
 0x3aa   :  { %1982 = vst [vmem:[#allocation4 + $0x3e0] sm:$0xf] %v1956_v15  ;;  %2388 = vrot.lane.b32.xlu2 %v2379_v32, %s4471_s1  ;;  %v2441_v15 = vld [vmem:[#allocation3 + $0x40] sm:$0x3f] }
 0x3ab   :  { %2323 = vrot.lane.b32.xlu1 %v2306_v21, %s4470_s17  ;;  %v2014_v25 = vpop.permute.xlu0 %2013 }
 0x3ac   :  { %v5727_v38 = vpop.permute.xlu2 %2098  ;;  %v2030_v22 = vsel %vm2029_vm9, %v5688_v45, %v2014_v25  ;;  %v2367_v45 = vld [vmem:[#allocation3 + $0x48] sm:$0x3f] }
 0x3ad   :  { %v2016_v29 = vpop.permute.xlu1 %2015  ;;  %2047 = vst [vmem:[#allocation4 + $0x3a8] sm:$0xf0] %v2030_v22  ;;  %v2385_v59 = vrot.slane %v2367_v45, 6 }
 0x3ae   :  { %v2032_v30 = vsel %vm2029_vm9, %v2016_v29, %v5697_v26  ;;  %v2031_v56 = vsel %vm2029_vm9, %v2014_v25, %v2016_v29  ;;  %2056 = vst [vmem:[#allocation4 + $0x3f0] sm:$0x3] %v2030_v22  ;;  %v2671_v25 = vld [vmem:[%s6638_s4 + $0x8] sm:$0xff] }
 0x3af   :  { %2049 = vst [vmem:[#allocation4 + $0x3b8] sm:$0xf0] %v2032_v30 }
 0x3b0   :  { %2058 = vst [vmem:[#allocation4 + $0x400] sm:$0x3] %v2032_v30 }
 0x3b1   :  { %2048 = vst [vmem:[#allocation4 + $0x3b0] sm:$0xf0] %v2031_v56  ;;  %2390 = vrot.lane.b32.xlu0 %v2380_v4, %s4471_s1 }
 0x3b2   :  { %2057 = vst [vmem:[#allocation4 + $0x3f8] sm:$0x3] %v2031_v56  ;;  %2394 = vrot.lane.b32.xlu2 %v2382_v27, %s4471_s1 }
 0x3b3   :  { %2392 = vrot.lane.b32.xlu1 %v2381_v10, %s4471_s1  ;;  %v2020_v36 = vpop.permute.xlu0 %2019 }
 0x3b4   :  { %v5737_v31 = vpop.permute.xlu2 %2104  ;;  %v2033_v53 = vsel %vm2029_vm9, %v5697_v26, %v2020_v36  ;;  %v2369_v26 = vld [vmem:[#allocation3 + $0x40] sm:$0x3f] }
 0x3b5   :  { %v2022_v37 = vpop.permute.xlu1 %2021  ;;  %2050 = vst [vmem:[#allocation4 + $0x3c0] sm:$0xf0] %v2033_v53  ;;  %v2387_v17 = vrot.slane %v2369_v26, 6 }
 0x3b6   :  { %v2035_v7 = vsel %vm2029_vm9, %v2022_v37, %v5707_v42  ;;  %v2034_v43 = vsel %vm2029_vm9, %v2020_v36, %v2022_v37  ;;  %2059 = vst [vmem:[#allocation4 + $0x408] sm:$0x3] %v2033_v53 }
 0x3b7   :  { %2052 = vst [vmem:[#allocation4 + $0x3d0] sm:$0xf0] %v2035_v7 }
 0x3b8   :  { %2061 = vst [vmem:[#allocation4 + $0x418] sm:$0x3] %v2035_v7 }
 0x3b9   :  { %2051 = vst [vmem:[#allocation4 + $0x3c8] sm:$0xf0] %v2034_v43  ;;  %2396 = vrot.lane.b32.xlu0 %v2383_v5, %s4471_s1 }
 0x3ba   :  { %2060 = vst [vmem:[#allocation4 + $0x410] sm:$0x3] %v2034_v43  ;;  %2400 = vrot.lane.b32.xlu2 %v2385_v59, %s4471_s1 }
 0x3bb   :  { %2398 = vrot.lane.b32.xlu1 %v2384_v47, %s4471_s1  ;;  %v2026_v11 = vpop.permute.xlu0 %2025 }
 0x3bc   :  { %v5747_v50 = vpop.permute.xlu2 %2154  ;;  %v2036_v52 = vsel %vm2029_vm9, %v5707_v42, %v2026_v11  ;;  %v2435_v42 = vld [vmem:[#allocation3 + $0x20] sm:$0x3f] }
 0x3bd   :  { %v2028_v51 = vpop.permute.xlu1 %2027  ;;  %2053 = vst [vmem:[#allocation4 + $0x3d8] sm:$0xf0] %v2036_v52 }
 0x3be   :  { %2055 = vst.msk [vmem:[#allocation4 + $0x3e8] sm:$0xf0] %vm846_vm8, %v2028_v51  ;;  %v2037_v57 = vsel %vm2029_vm9, %v2026_v11, %v2028_v51 }
 0x3bf   :  { %2064 = vst.msk [vmem:[#allocation4 + $0x430] sm:$0x3] %vm856_vm10, %v2028_v51 }
 0x3c0   :  { %2054 = vst [vmem:[#allocation4 + $0x3e0] sm:$0xf0] %v2037_v57 }
 0x3c1   :  { %2062 = vst [vmem:[#allocation4 + $0x420] sm:$0x3] %v2036_v52  ;;  %2402 = vrot.lane.b32.xlu0 %v2386_v20, %s4471_s1  ;;  %v2618_v20 = vld [vmem:[#allocation4 + $0x3b8] sm:$0xff] }
 0x3c2   :  { %2063 = vst [vmem:[#allocation4 + $0x428] sm:$0x3] %v2037_v57  ;;  %2451 = vrot.lane.b32.xlu2 %v2433_v34, %s4465_s12  ;;  %v2616_v57 = vld [vmem:[#allocation4 + $0x3a8] sm:$0xff]  ;;  %v2617_v34 = vld [vmem:[#allocation4 + $0x3b0] sm:$0xff] }
 0x3c3   :  { %2404 = vrot.lane.b32.xlu1 %v2387_v17, %s4471_s1  ;;  %v2095_v13 = vpop.permute.xlu0 %2094  ;;  %v2607_v17 = vld [vmem:[#allocation4 + $0x360] sm:$0xff] }
 0x3c4   :  { %v2161_v9 = vpop.permute.xlu2 %2160  ;;  %v2110_v62 = vsel %vm1413_vm0, %v5717_v12, %v2095_v13 }
 0x3c5   :  { %v2097_v58 = vpop.permute.xlu1 %2096  ;;  %2127 = vst [vmem:[#allocation4 + $0x3f0] sm:$0xfc] %v2110_v62 }
 0x3c6   :  { %v2112_v44 = vsel %vm1413_vm0, %v2097_v58, %v5727_v38  ;;  %v2111_v63 = vsel %vm1413_vm0, %v2095_v13, %v2097_v58  ;;  %v2609_v13 = vld [vmem:[#allocation4 + $0x370] sm:$0xff] }
 0x3c7   :  { %2129 = vst [vmem:[#allocation4 + $0x400] sm:$0xfc] %v2112_v44  ;;  %v2598_v44 = vld [vmem:[#allocation4 + $0x318] sm:$0xff] }
 0x3c8   :  { %2128 = vst [vmem:[#allocation4 + $0x3f8] sm:$0xfc] %v2111_v63  ;;  %v2608_v63 = vld [vmem:[#allocation4 + $0x368] sm:$0xff] }
 0x3c9   :  { %2453 = vrot.lane.b32.xlu0 %v2434_v0, %s4465_s12 }
 0x3ca   :  { %2457 = vrot.lane.b32.xlu2 %v2436_v2, %s4465_s12  ;;  %v2600_v2 = vld [vmem:[#allocation4 + $0x328] sm:$0xff] }
 0x3cb   :  { %2455 = vrot.lane.b32.xlu1 %v2435_v42, %s4465_s12  ;;  %v2101_v23 = vpop.permute.xlu0 %2100  ;;  %v2589_v42 = vld [vmem:[#allocation4 + $0x2d0] sm:$0xff] }
 0x3cc   :  { %v2167_v60 = vpop.permute.xlu2 %2166  ;;  %v2113_v18 = vsel %vm1413_vm0, %v5727_v38, %v2101_v23  ;;  %v2625_v51 = vld [vmem:[#allocation4 + $0x3f0] sm:$0xff] }
 0x3cd   :  { %v2103_v3 = vpop.permute.xlu1 %2102  ;;  %2130 = vst [vmem:[#allocation4 + $0x408] sm:$0xfc] %v2113_v18  ;;  %v2580_v18 = vld [vmem:[#allocation4 + $0x288] sm:$0xff] }
 0x3ce   :  { %v2115_v6 = vsel %vm1413_vm0, %v2103_v3, %v5737_v31  ;;  %v2114_v8 = vsel %vm1413_vm0, %v2101_v23, %v2103_v3  ;;  %v2627_v54 = vld [vmem:[#allocation4 + $0x400] sm:$0xff] }
 0x3cf   :  { %2132 = vst [vmem:[#allocation4 + $0x418] sm:$0xfc] %v2115_v6  ;;  %v2626_v26 = vld [vmem:[#allocation4 + $0x3f8] sm:$0xff]  ;;  %v2599_v23 = vld [vmem:[#allocation4 + $0x320] sm:$0xff] }
 0x3d0   :  { %2131 = vst [vmem:[#allocation4 + $0x410] sm:$0xfc] %v2114_v8  ;;  %v2590_v6 = vld [vmem:[#allocation4 + $0x2d8] sm:$0xff] }
 0x3d1   :  { %2459 = vrot.lane.b32.xlu0 %v2437_v39, %s4465_s12  ;;  %v2582_v8 = vld [vmem:[#allocation4 + $0x298] sm:$0xff]  ;;  %v2571_v39 = vld [vmem:[#allocation4 + $0x240] sm:$0xff] }
 0x3d2   :  { %2463 = vrot.lane.b32.xlu2 %v2439_v19, %s4465_s12  ;;  %v2581_v19 = vld [vmem:[#allocation4 + $0x290] sm:$0xff] }
 0x3d3   :  { %2461 = vrot.lane.b32.xlu1 %v2438_v1, %s4465_s12  ;;  %v2107_v33 = vpop.permute.xlu0 %2106  ;;  %v2573_v1 = vld [vmem:[#allocation4 + $0x250] sm:$0xff] }
 0x3d4   :  { %v2116_v12 = vsel %vm1413_vm0, %v5737_v31, %v2107_v33  ;;  %v2227_v16 = vpop.permute.xlu2 %2226 }
 0x3d5   :  { %v2109_v41 = vpop.permute.xlu1 %2108  ;;  %2133 = vst [vmem:[#allocation4 + $0x420] sm:$0xfc] %v2116_v12 }
 0x3d6   :  { %2135 = vst.msk [vmem:[#allocation4 + $0x430] sm:$0xfc] %vm929_vm11, %v2109_v41  ;;  %v2117_v14 = vsel %vm1413_vm0, %v2107_v33, %v2109_v41 }
 0x3d7   :  { %2134 = vst [vmem:[#allocation4 + $0x428] sm:$0xfc] %v2117_v14  ;;  %v2562_v14 = vld [vmem:[#allocation4 + $0x1f8] sm:$0xff] }
 0x3d9   :  { %2465 = vrot.lane.b32.xlu0 %v2440_v40, %s4465_s12  ;;  %v2572_v40 = vld [vmem:[#allocation4 + $0x248] sm:$0xff] }
 0x3db   :  { %2467 = vrot.lane.b32.xlu1 %v2441_v15, %s4465_s12  ;;  %v2157_v49 = vpop.permute.xlu0 %2156 }
 0x3dc   :  { %v2173_v24 = vsel %vm2172_vm12, %v5747_v50, %v2157_v49  ;;  %v2233_v38 = vpop.permute.xlu2 %2232 }
 0x3dd   :  { %v2159_v61 = vpop.permute.xlu1 %2158  ;;  %2190 = vst [vmem:[#allocation4 + $0x438] sm:$0x3f] %v2173_v24  ;;  %v2563_v24 = vld [vmem:[#allocation4 + $0x200] sm:$0xff] }
 0x3de   :  { %v2175_v32 = vsel %vm2172_vm12, %v2159_v61, %v2161_v9  ;;  %v2174_v21 = vsel %vm2172_vm12, %v2157_v49, %v2159_v61  ;;  %v2564_v49 = vld [vmem:[#allocation4 + $0x208] sm:$0xff]  ;;  %v2553_v61 = vld [vmem:[#allocation4 + $0x1b0] sm:$0xff] }
 0x3df   :  { %2192 = vst [vmem:[#allocation4 + $0x448] sm:$0x3f] %v2175_v32  ;;  %v2555_v32 = vld [vmem:[#allocation4 + $0x1c0] sm:$0xff] }
 0x3e0   :  { %2191 = vst [vmem:[#allocation4 + $0x440] sm:$0x3f] %v2174_v21  ;;  %v2544_v21 = vld [vmem:[#allocation4 + $0x168] sm:$0xff] }
 0x3e1   :  { %2679 = vperm.xlu0 %4441, %v2671_v25   ;;  %v2554_v25 = vld [vmem:[#allocation4 + $0x1b8] sm:$0xff] }
 0x3e3   :  { %v2163_v29 = vpop.permute.xlu0 %2162 }
 0x3e4   :  { %v2176_v28 = vsel %vm2172_vm12, %v2161_v9, %v2163_v29  ;;  %v2239_v35 = vpop.permute.xlu2 %2238 }
 0x3e5   :  { %v2165_v22 = vpop.permute.xlu1 %2164  ;;  %2193 = vst [vmem:[#allocation4 + $0x450] sm:$0x3f] %v2176_v28  ;;  %v2545_v28 = vld [vmem:[#allocation4 + $0x170] sm:$0xff] }
 0x3e6   :  { %v2178_v30 = vsel %vm2172_vm12, %v2165_v22, %v2167_v60  ;;  %v2177_v56 = vsel %vm2172_vm12, %v2163_v29, %v2165_v22  ;;  %v2535_v22 = vld [vmem:[#allocation4 + $0x120] sm:$0xff] }
 0x3e7   :  { %2195 = vst [vmem:[#allocation4 + $0x460] sm:$0x3f] %v2178_v30  ;;  %v2537_v30 = vld [vmem:[#allocation4 + $0x130] sm:$0xff] }
 0x3e8   :  { %2194 = vst [vmem:[#allocation4 + $0x458] sm:$0x3f] %v2177_v56 }
 0x3eb   :  { %v2169_v55 = vpop.permute.xlu0 %2168 }
 0x3ec   :  { %v2179_v27 = vsel %vm2172_vm12, %v2167_v60, %v2169_v55  ;;  %v5792_v31 = vpop.permute.xlu2 %2307  ;;  %v2591_v60 = vld [vmem:[#allocation4 + $0x2e0] sm:$0xff] }
 0x3ed   :  { %v2171_v4 = vpop.permute.xlu1 %2170  ;;  %2196 = vst [vmem:[#allocation4 + $0x468] sm:$0x3f] %v2179_v27 }
 0x3ee   :  { %2198 = vst.msk [vmem:[#allocation4 + $0x478] sm:$0x3f] %vm690_vm5, %v2171_v4  ;;  %v2180_v10 = vsel %vm2172_vm12, %v2169_v55, %v2171_v4  ;;  %v2526_v4 = vld [vmem:[#allocation4 + $0xd8] sm:$0xff] }
 0x3ef   :  { %2197 = vst [vmem:[#allocation4 + $0x470] sm:$0x3f] %v2180_v10  ;;  %v2536_v10 = vld [vmem:[#allocation4 + $0x128] sm:$0xff] }
 0x3f3   :  { %v2229_v36 = vpop.permute.xlu0 %2228 }
 0x3f4   :  { %v2245_v53 = vsel %vm2244_vm14, %v2227_v16, %v2229_v36  ;;  %v5800_v50 = vpop.permute.xlu2 %2313 }
 0x3f5   :  { %v2231_v37 = vpop.permute.xlu1 %2230  ;;  %2262 = vst [vmem:[#allocation4 + $0x438] sm:$0xc0] %v2245_v53 }
 0x3f6   :  { %v2247_v48 = vsel %vm2244_vm14, %v2231_v37, %v2233_v38  ;;  %v2246_v7 = vsel %vm2244_vm14, %v2229_v36, %v2231_v37  ;;  %2271 = vst [vmem:[#allocation4 + $0x480] sm:$0xf] %v2245_v53  ;;  %v2517_v37 = vld [vmem:[#allocation4 + $0x90] sm:$0xff]  ;;  %v2527_v53 = vld [vmem:[#allocation4 + $0xe0] sm:$0xff] }
 0x3f7   :  { %2264 = vst [vmem:[#allocation4 + $0x448] sm:$0xc0] %v2247_v48 }
 0x3f8   :  { %2273 = vst [vmem:[#allocation4 + $0x490] sm:$0xf] %v2247_v48  ;;  %v2519_v48 = vld [vmem:[#allocation4 + $0xa0] sm:$0xff] }
 0x3f9   :  { %2263 = vst [vmem:[#allocation4 + $0x440] sm:$0xc0] %v2246_v7 }
 0x3fa   :  { %2272 = vst [vmem:[#allocation4 + $0x488] sm:$0xf] %v2246_v7  ;;  %v2508_v7 = vld [vmem:[#allocation4 + $0x48] sm:$0xff] }
 0x3fb   :  { %v2235_v43 = vpop.permute.xlu0 %2234 }
 0x3fc   :  { %v2248_v46 = vsel %vm2244_vm14, %v2233_v38, %v2235_v43  ;;  %v2634_v5 = vld [vmem:[#allocation4 + $0x438] sm:$0xff]  ;;  %v5806_v3 = vpop.permute.xlu2 %2319 }
 0x3fd   :  { %v2237_v45 = vpop.permute.xlu1 %2236  ;;  %2265 = vst [vmem:[#allocation4 + $0x450] sm:$0xc0] %v2248_v46  ;;  %2717 = vmatpush.msrb.mxu1 %v2634_v5  ;;  %v2546_v38 = vld [vmem:[#allocation4 + $0x178] sm:$0xff] }
 0x3fe   :  { %v2250_v59 = vsel %vm2244_vm14, %v2237_v45, %v2239_v35  ;;  %v2249_v47 = vsel %vm2244_vm14, %v2235_v43, %v2237_v45  ;;  %v2636_v11 = vld [vmem:[#allocation4 + $0x448] sm:$0xff]  ;;  %2274 = vst [vmem:[#allocation4 + $0x498] sm:$0xf] %v2248_v46  ;;  %v2518_v43 = vld [vmem:[#allocation4 + $0x98] sm:$0xff]  ;;  %v2499_v46 = vld [vmem:[#allocation4] sm:$0xff] }
 0x3ff   :  { %2267 = vst [vmem:[#allocation4 + $0x460] sm:$0xc0] %v2250_v59  ;;  %2809 = vmatpush.msra.mxu0 %v2636_v11  ;;  %2718 = vmatpush.msrb.mxu1 %v2625_v51  ;;  %v2510_v45 = vld [vmem:[#allocation4 + $0x58] sm:$0xff] }
 0x400   :  { %2276 = vst [vmem:[#allocation4 + $0x4a8] sm:$0xf] %v2250_v59  ;;  %v2635_v52 = vld [vmem:[#allocation4 + $0x440] sm:$0xff]  ;;  %v5823_v5 = vld [vmem:[%s6639_s3] sm:$0xff]  ;;  %v2509_v59 = vld [vmem:[#allocation4 + $0x50] sm:$0xff] }
 0x401   :  { %2266 = vst [vmem:[#allocation4 + $0x458] sm:$0xc0] %v2249_v47  ;;  %2763 = vmatpush.msrb.mxu3 %v2635_v52  ;;  %2810 = vmatpush.msra.mxu0 %v2627_v54  ;;  %v2500_v54 = vld [vmem:[#allocation4 + $0x8] sm:$0xff] }
 0x402   :  { %2719 = vmatpush.msrb.mxu1 %v2616_v57  ;;  %2275 = vst [vmem:[#allocation4 + $0x4a0] sm:$0xf] %v2249_v47  ;;  %v2501_v47 = vld [vmem:[#allocation4 + $0x10] sm:$0xff] }
 0x403   :  { %2764 = vmatpush.msrb.mxu3 %v2626_v26  ;;  %2811 = vmatpush.msra.mxu0 %v2618_v20  ;;  %v2241_v9 = vpop.permute.xlu0 %2240 }
 0x404   :  { %2720 = vmatpush.msrb.mxu1 %v2607_v17  ;;  %v2251_v62 = vsel %vm2244_vm14, %v2239_v35, %v2241_v9  ;;  %v5813_v29 = vpop.permute.xlu2 %2388  ;;  %v2637_v26 = vld [vmem:[#allocation4 + $0x450] sm:$0xff]  ;;  %v2628_v17 = vld [vmem:[#allocation4 + $0x408] sm:$0xff] }
 0x405   :  { %2765 = vmatpush.msrb.mxu3 %v2617_v34  ;;  %2812 = vmatpush.msra.mxu0 %v2609_v13  ;;  %v2243_v58 = vpop.permute.xlu1 %2242  ;;  %2268 = vst [vmem:[#allocation4 + $0x468] sm:$0xc0] %v2251_v62  ;;  %v2630_v34 = vld [vmem:[#allocation4 + $0x418] sm:$0xff]  ;;  %v2619_v13 = vld [vmem:[#allocation4 + $0x3c0] sm:$0xff] }
 0x406   :  { %2270 = vst.msk [vmem:[#allocation4 + $0x478] sm:$0xc0] %vm763_vm6, %v2243_v58  ;;  %v2252_v0 = vsel %vm2244_vm14, %v2241_v9, %v2243_v58  ;;  %2721 = vmatpush.msrb.mxu1 %v2598_v44  ;;  %vm2325_vm6 = vcmask 457728   ;;  %v2639_v20 = vld [vmem:[#allocation4 + $0x460] sm:$0xff]  ;;  %v2621_v9 = vld [vmem:[#allocation4 + $0x3d0] sm:$0xff] }
 0x407   :  { %2279 = vst.msk [vmem:[#allocation4 + $0x4c0] sm:$0xf] %vm773_vm7, %v2243_v58  ;;  %2766 = vmatpush.msrb.mxu3 %v2608_v63  ;;  %2813 = vmatpush.msra.mxu0 %v2600_v2  ;;  %vm2406_vm7 = vcmask 424960   ;;  %v5838_v58 = vld [vmem:[%s6639_s3 + $0x10] sm:$0xff] }
 0x408   :  { %2722 = vmatpush.msrb.mxu1 %v2589_v42  ;;  %2269 = vst [vmem:[#allocation4 + $0x470] sm:$0xc0] %v2252_v0  ;;  %v2612_v63 = vld [vmem:[#allocation4 + $0x388] sm:$0xff] }
 0x409   :  { %2767 = vmatpush.msrb.mxu3 %v2599_v23  ;;  %2814 = vmatpush.msra.mxu0 %v2591_v60  ;;  %2277 = vst [vmem:[#allocation4 + $0x4b0] sm:$0xf] %v2251_v62  ;;  %v2610_v62 = vld [vmem:[#allocation4 + $0x378] sm:$0xff]  ;;  %v2601_v60 = vld [vmem:[#allocation4 + $0x330] sm:$0xff] }
 0x40a   :  { %2723 = vmatpush.msrb.mxu1 %v2580_v18  ;;  %2278 = vst [vmem:[#allocation4 + $0x4b8] sm:$0xf] %v2252_v0  ;;  %v2603_v18 = vld [vmem:[#allocation4 + $0x340] sm:$0xff] }
 0x40b   :  { %2768 = vmatpush.msrb.mxu3 %v2590_v6  ;;  %2815 = vmatpush.msra.mxu0 %v2582_v8  ;;  %v2310_v33 = vpop.permute.xlu0 %2309  ;;  %v2592_v6 = vld [vmem:[#allocation4 + $0x2e8] sm:$0xff]  ;;  %v2594_v8 = vld [vmem:[#allocation4 + $0x2f8] sm:$0xff] }
 0x40c   :  { %2724 = vmatpush.msrb.mxu1 %v2571_v39  ;;  %v2326_v12 = vsel %vm2325_vm6, %v5792_v31, %v2310_v33  ;;  %v2528_v31 = vld [vmem:[#allocation4 + $0xe8] sm:$0xff]  ;;  %v2583_v39 = vld [vmem:[#allocation4 + $0x2a0] sm:$0xff] }
 0x40d   :  { %2769 = vmatpush.msrb.mxu3 %v2581_v19  ;;  %v2312_v41 = vpop.permute.xlu1 %2311  ;;  %2816 = vmatpush.msra.mxu0 %v2573_v1  ;;  %2343 = vst [vmem:[#allocation4 + $0x480] sm:$0xf0] %v2326_v12  ;;  %v2585_v19 = vld [vmem:[#allocation4 + $0x2b0] sm:$0xff]  ;;  %v2574_v1 = vld [vmem:[#allocation4 + $0x258] sm:$0xff] }
 0x40e   :  { %v2328_v16 = vsel %vm2325_vm6, %v2312_v41, %v5800_v50  ;;  %v2327_v15 = vsel %vm2325_vm6, %v2310_v33, %v2312_v41  ;;  %2725 = vmatpush.msrb.mxu1 %v2562_v14  ;;  %2352 = vst [vmem:[#allocation4 + $0x4c8] sm:$0x3] %v2326_v12  ;;  %v2576_v41 = vld [vmem:[#allocation4 + $0x268] sm:$0xff] }
 0x40f   :  { %2345 = vst [vmem:[#allocation4 + $0x490] sm:$0xf0] %v2328_v16  ;;  %2770 = vmatpush.msrb.mxu3 %v2572_v40  ;;  %2817 = vmatpush.msra.mxu0 %v2564_v49  ;;  %v2567_v49 = vld [vmem:[#allocation4 + $0x220] sm:$0xff] }
 0x410   :  { %2354 = vst [vmem:[#allocation4 + $0x4d8] sm:$0x3] %v2328_v16  ;;  %2726 = vmatpush.msrb.mxu1 %v2553_v61  ;;  %v2556_v61 = vld [vmem:[#allocation4 + $0x1c8] sm:$0xff] }
 0x411   :  { %2344 = vst [vmem:[#allocation4 + $0x488] sm:$0xf0] %v2327_v15  ;;  %2771 = vmatpush.msrb.mxu3 %v2563_v24  ;;  %2818 = vmatpush.msra.mxu0 %v2555_v32  ;;  %v2558_v32 = vld [vmem:[#allocation4 + $0x1d8] sm:$0xff] }
 0x412   :  { %2727 = vmatpush.msrb.mxu1 %v2544_v21  ;;  %2353 = vst [vmem:[#allocation4 + $0x4d0] sm:$0x3] %v2327_v15  ;;  %v2565_v15 = vld [vmem:[#allocation4 + $0x210] sm:$0xff]  ;;  %v2547_v21 = vld [vmem:[#allocation4 + $0x180] sm:$0xff] }
 0x413   :  { %2772 = vmatpush.msrb.mxu3 %v2554_v25  ;;  %2819 = vmatpush.msra.mxu0 %v2546_v38  ;;  %v2316_v56 = vpop.permute.xlu0 %2315  ;;  %v2549_v25 = vld [vmem:[#allocation4 + $0x190] sm:$0xff]  ;;  %v2538_v38 = vld [vmem:[#allocation4 + $0x138] sm:$0xff] }
 0x414   :  { %2728 = vmatpush.msrb.mxu1 %v2535_v22  ;;  %v2329_v55 = vsel %vm2325_vm6, %v5800_v50, %v2316_v56  ;;  %v5825_v50 = vpop.permute.xlu2 %2394  ;;  %v2540_v22 = vld [vmem:[#allocation4 + $0x148] sm:$0xff] }
 0x415   :  { %2773 = vmatpush.msrb.mxu3 %v2545_v28  ;;  %v2318_v35 = vpop.permute.xlu1 %2317  ;;  %2820 = vmatpush.msra.mxu0 %v2537_v30  ;;  %2346 = vst [vmem:[#allocation4 + $0x498] sm:$0xf0] %v2329_v55 }
 0x416   :  { %v2331_v27 = vsel %vm2325_vm6, %v2318_v35, %v5806_v3  ;;  %v2330_v36 = vsel %vm2325_vm6, %v2316_v56, %v2318_v35  ;;  %2729 = vmatpush.msrb.mxu1 %v2526_v4  ;;  %2355 = vst [vmem:[#allocation4 + $0x4e0] sm:$0x3] %v2329_v55  ;;  %v2529_v35 = vld [vmem:[#allocation4 + $0xf0] sm:$0xff]  ;;  %v2531_v55 = vld [vmem:[#allocation4 + $0x100] sm:$0xff]  ;;  %v2520_v4 = vld [vmem:[#allocation4 + $0xa8] sm:$0xff] }
 0x417   :  { %2348 = vst [vmem:[#allocation4 + $0x4a8] sm:$0xf0] %v2331_v27  ;;  %2774 = vmatpush.msrb.mxu3 %v2536_v10  ;;  %2821 = vmatpush.msra.mxu0 %v2528_v31  ;;  %v2511_v10 = vld [vmem:[#allocation4 + $0x60] sm:$0xff]  ;;  %v2513_v31 = vld [vmem:[#allocation4 + $0x70] sm:$0xff] }
 0x418   :  { %2357 = vst [vmem:[#allocation4 + $0x4f0] sm:$0x3] %v2331_v27  ;;  %2730 = vmatpush.msrb.mxu1 %v2517_v37  ;;  %v2522_v27 = vld [vmem:[#allocation4 + $0xb8] sm:$0xff] }
 0x419   :  { %2347 = vst [vmem:[#allocation4 + $0x4a0] sm:$0xf0] %v2330_v36  ;;  %2775 = vmatpush.msrb.mxu3 %v2527_v53  ;;  %2822 = vmatpush.msra.mxu0 %v2519_v48  ;;  %v2502_v37 = vld [vmem:[#allocation4 + $0x18] sm:$0xff]  ;;  %v2504_v48 = vld [vmem:[#allocation4 + $0x28] sm:$0xff] }
 0x41a   :  { %2731 = vmatpush.msrb.mxu1 %v2508_v7  ;;  %2356 = vst [vmem:[#allocation4 + $0x4e8] sm:$0x3] %v2330_v36 }
 0x41b   :  { %2776 = vmatpush.msrb.mxu3 %v2518_v43  ;;  %2823 = vmatpush.msra.mxu0 %v2510_v45  ;;  %v2322_v11 = vpop.permute.xlu0 %2321 }
 0x41c   :  { %2732 = vmatpush.msrb.mxu1 %v2499_v46  ;;  %v2332_v52 = vsel %vm2325_vm6, %v5806_v3, %v2322_v11  ;;  %v2401_v3 = vpop.permute.xlu2 %2400 }
 0x41d   :  { %2777 = vmatpush.msrb.mxu3 %v2509_v59  ;;  %v2324_v51 = vpop.permute.xlu1 %2323  ;;  %2824 = vmatpush.msra.mxu0 %v2501_v47  ;;  %2349 = vst [vmem:[#allocation4 + $0x4b0] sm:$0xf0] %v2332_v52 }
 0x41e   :  { %2351 = vst.msk [vmem:[#allocation4 + $0x4c0] sm:$0xf0] %vm846_vm8, %v2324_v51  ;;  %v2333_v57 = vsel %vm2325_vm6, %v2322_v11, %v2324_v51  ;;  %2733 = vmatmul.f32.vlgmr.msrb.gmra.mxu1 %v5823_v5  ;;  %2825 = vmatmul.f32.vlgmr.msra.gmra.mxu0 %v5823_v5  ;;  %vm2689_vm8 = vcmask 1045504  }
 0x41f   :  { %2360 = vst.msk [vmem:[#allocation4 + $0x508] sm:$0x3] %vm856_vm10, %v2324_v51  ;;  %2778 = vmatpush.msrb.mxu3 %v2500_v54  ;;  %2855 = vmatpush.msra.mxu1 %v2637_v26  ;;  %v5869_v26 = vld [vmem:[%s6639_s3 + $0x8] sm:$0xff]  ;;  %vm2682_vm10 = vcmask 179200  }
 0x420   :  { %2779 = vmatmul.f32.vlgmr.msrb.gmra.mxu3 %v5823_v5  ;;  %2947 = vmatpush.msrb.mxu0 %v2639_v20  ;;  %2350 = vst [vmem:[#allocation4 + $0x4b8] sm:$0xf0] %v2333_v57  ;;  %v2643_v20 = vld [vmem:[#allocation4 + $0x480] sm:$0xff] }
 0x421   :  { %2856 = vmatpush.msra.mxu1 %v2628_v17  ;;  %2358 = vst [vmem:[#allocation4 + $0x4f8] sm:$0x3] %v2332_v52 }
 0x422   :  { %2948 = vmatpush.msrb.mxu0 %v2630_v34  ;;  %2359 = vst [vmem:[#allocation4 + $0x500] sm:$0x3] %v2333_v57 }
 0x423   :  { %2857 = vmatpush.msra.mxu1 %v2619_v13  ;;  %v2391_v44 = vpop.permute.xlu0 %2390 }
 0x424   :  { %2949 = vmatpush.msrb.mxu0 %v2621_v9  ;;  %v2407_v2 = vsel %vm2406_vm7, %v5813_v29, %v2391_v44  ;;  %v2452_v24 = vpop.permute.xlu2 %2451 }
 0x425   :  { %2858 = vmatpush.msra.mxu1 %v2610_v62  ;;  %v2393_v0 = vpop.permute.xlu1 %2392  ;;  %2424 = vst [vmem:[#allocation4 + $0x4c8] sm:$0xfc] %v2407_v2  ;;  %v2644_v2 = vld [vmem:[#allocation4 + $0x488] sm:$0xff] }
 0x426   :  { %2950 = vmatpush.msrb.mxu0 %v2612_v63  ;;  %v2409_v42 = vsel %vm2406_vm7, %v2393_v0, %v5825_v50  ;;  %v2408_v23 = vsel %vm2406_vm7, %v2391_v44, %v2393_v0  ;;  %2736 = vmatmul.f32.gmra.mxu1 %v5838_v58 }
 0x427   :  { %2426 = vst [vmem:[#allocation4 + $0x4d8] sm:$0xfc] %v2409_v42  ;;  %2828 = vmatmul.f32.gmra.mxu0 %v5838_v58  ;;  %2859 = vmatpush.msra.mxu1 %v2601_v60 }
 0x428   :  { %2425 = vst [vmem:[#allocation4 + $0x4d0] sm:$0xfc] %v2408_v23  ;;  %2782 = vmatmul.f32.gmra.mxu3 %v5838_v58  ;;  %2951 = vmatpush.msrb.mxu0 %v2603_v18  ;;  %v5883_v18 = vld [vmem:[%s6639_s3 + $0x18] sm:$0xff] }
 0x429   :  { %2860 = vmatpush.msra.mxu1 %v2592_v6 }
 0x42a   :  { %2952 = vmatpush.msrb.mxu0 %v2594_v8  ;;  %v2648_v8 = vld [vmem:[#allocation4 + $0x4a8] sm:$0xff] }
 0x42b   :  { %2861 = vmatpush.msra.mxu1 %v2583_v39  ;;  %v2397_v33 = vpop.permute.xlu0 %2396 }
 0x42c   :  { %2953 = vmatpush.msrb.mxu0 %v2585_v19  ;;  %v2410_v14 = vsel %vm2406_vm7, %v5825_v50, %v2397_v33  ;;  %v2458_v36 = vpop.permute.xlu2 %2457  ;;  %v2652_v57 = vld [vmem:[#allocation4 + $0x4c8] sm:$0xff]  ;;  %v2641_v19 = vld [vmem:[#allocation4 + $0x470] sm:$0xff] }
 0x42d   :  { %2862 = vmatpush.msra.mxu1 %v2574_v1  ;;  %v2399_v12 = vpop.permute.xlu1 %2398  ;;  %2427 = vst [vmem:[#allocation4 + $0x4e0] sm:$0xfc] %v2410_v14  ;;  %v2645_v1 = vld [vmem:[#allocation4 + $0x490] sm:$0xff]  ;;  %v2670_v14 = vld [vmem:[%s6638_s4] sm:$0xff]  ;;  %s4472_s4 = smov 104  }
 0x42e   :  { %2954 = vmatpush.msrb.mxu0 %v2576_v41  ;;  %v2412_v16 = vsel %vm2406_vm7, %v2399_v12, %v2401_v3  ;;  %v2411_v40 = vsel %vm2406_vm7, %v2397_v33, %v2399_v12  ;;  %v2654_v6 = vld [vmem:[#allocation4 + $0x4d8] sm:$0xff]  ;;  %v2632_v41 = vld [vmem:[#allocation4 + $0x428] sm:$0xff]  ;;  %2674 = vperm.xlu2 %4442, %v2670_v14  }
 0x42f   :  { %2429 = vst [vmem:[#allocation4 + $0x4f0] sm:$0xfc] %v2412_v16  ;;  %2863 = vmatpush.msra.mxu1 %v2565_v15  ;;  %v2653_v62 = vld [vmem:[#allocation4 + $0x4d0] sm:$0xff]  ;;  %v2647_v16 = vld [vmem:[#allocation4 + $0x4a0] sm:$0xff]  ;;  %v2640_v15 = vld [vmem:[#allocation4 + $0x468] sm:$0xff] }
 0x430   :  { %2428 = vst [vmem:[#allocation4 + $0x4e8] sm:$0xfc] %v2411_v40  ;;  %2955 = vmatpush.msrb.mxu0 %v2567_v49  ;;  %v2623_v40 = vld [vmem:[#allocation4 + $0x3e0] sm:$0xff]  ;;  %v2606_v14 = vld [vmem:[#allocation4 + $0x358] sm:$0xff] }
 0x431   :  { %2864 = vmatpush.msra.mxu1 %v2556_v61  ;;  %v2614_v61 = vld [vmem:[#allocation4 + $0x398] sm:$0xff] }
 0x432   :  { %2956 = vmatpush.msrb.mxu0 %v2558_v32  ;;  %v2650_v32 = vld [vmem:[#allocation4 + $0x4b8] sm:$0xff] }
 0x433   :  { %2865 = vmatpush.msra.mxu1 %v2547_v21  ;;  %v2403_v29 = vpop.permute.xlu0 %2402  ;;  %v2638_v21 = vld [vmem:[#allocation4 + $0x458] sm:$0xff] }
 0x434   :  { %2957 = vmatpush.msrb.mxu0 %v2549_v25  ;;  %v2413_v30 = vsel %vm2406_vm7, %v2401_v3, %v2403_v29  ;;  %v2464_v47 = vpop.permute.xlu2 %2463  ;;  %v2655_v42 = vld [vmem:[#allocation4 + $0x4e0] sm:$0xff]  ;;  %v2646_v3 = vld [vmem:[#allocation4 + $0x498] sm:$0xff] }
 0x435   :  { %2866 = vmatpush.msra.mxu1 %v2538_v38  ;;  %v2405_v28 = vpop.permute.xlu1 %2404  ;;  %2430 = vst [vmem:[#allocation4 + $0x4f8] sm:$0xfc] %v2413_v30  ;;  %v2622_v25 = vld [vmem:[#allocation4 + $0x3d8] sm:$0xff]  ;;  %v2605_v38 = vld [vmem:[#allocation4 + $0x350] sm:$0xff]  ;;  %v2620_v30 = vld [vmem:[#allocation4 + $0x3c8] sm:$0xff] }
 0x436   :  { %2958 = vmatpush.msrb.mxu0 %v2540_v22  ;;  %2432 = vst.msk [vmem:[#allocation4 + $0x508] sm:$0xfc] %vm929_vm11, %v2405_v28  ;;  %v2414_v56 = vsel %vm2406_vm7, %v2403_v29, %v2405_v28  ;;  %v2657_v60 = vld [vmem:[#allocation4 + $0x4f0] sm:$0xff]  ;;  %v2596_v28 = vld [vmem:[#allocation4 + $0x308] sm:$0xff] }
 0x437   :  { %2867 = vmatpush.msra.mxu1 %v2529_v35  ;;  %2431 = vst [vmem:[#allocation4 + $0x500] sm:$0xfc] %v2414_v56  ;;  %v2656_v33 = vld [vmem:[#allocation4 + $0x4e8] sm:$0xff]  ;;  %v2629_v29 = vld [vmem:[#allocation4 + $0x410] sm:$0xff]  ;;  %v2587_v35 = vld [vmem:[#allocation4 + $0x2c0] sm:$0xff] }
 0x438   :  { %2959 = vmatpush.msrb.mxu0 %v2531_v55  ;;  %v2613_v22 = vld [vmem:[#allocation4 + $0x390] sm:$0xff]  ;;  %v2604_v56 = vld [vmem:[#allocation4 + $0x348] sm:$0xff]  ;;  %v2611_v55 = vld [vmem:[#allocation4 + $0x380] sm:$0xff] }
 0x439   :  { %2868 = vmatpush.msra.mxu1 %v2520_v4  ;;  %v2595_v4 = vld [vmem:[#allocation4 + $0x300] sm:$0xff] }
 0x43a   :  { %2960 = vmatpush.msrb.mxu0 %v2522_v27  ;;  %v2578_v27 = vld [vmem:[#allocation4 + $0x278] sm:$0xff] }
 0x43b   :  { %2869 = vmatpush.msra.mxu1 %v2511_v10  ;;  %v2454_v53 = vpop.permute.xlu0 %2453  ;;  %v2602_v10 = vld [vmem:[#allocation4 + $0x338] sm:$0xff] }
 0x43c   :  { %2961 = vmatpush.msrb.mxu0 %v2513_v31  ;;  %v2469_v43 = vsel %vm1813_vm3, %v2452_v24, %v2454_v53  ;;  %v2631_v24 = vld [vmem:[#allocation4 + $0x420] sm:$0xff]  ;;  %v2569_v31 = vld [vmem:[#allocation4 + $0x230] sm:$0xff] }
 0x43d   :  { %2870 = vmatpush.msra.mxu1 %v2502_v37  ;;  %v2456_v7 = vpop.permute.xlu1 %2455  ;;  %2486 = vst [vmem:[#allocation4 + $0x510] sm:$0x3f] %v2469_v43  ;;  %v2593_v37 = vld [vmem:[#allocation4 + $0x2f0] sm:$0xff]  ;;  %v2551_v43 = vld [vmem:[#allocation4 + $0x1a0] sm:$0xff] }
 0x43e   :  { %2962 = vmatpush.msrb.mxu0 %v2504_v48  ;;  %v2471_v45 = vsel %vm1813_vm3, %v2456_v7, %v2458_v36  ;;  %2871 = vmatmul.f32.vlgmr.msra.gmra.mxu1 %v5823_v5  ;;  %v2470_v46 = vsel %vm1813_vm3, %v2454_v53, %v2456_v7  ;;  %v2659_v49 = vld [vmem:[#allocation4 + $0x500] sm:$0xff]  ;;  %v2577_v53 = vld [vmem:[#allocation4 + $0x270] sm:$0xff]  ;;  %v2560_v48 = vld [vmem:[#allocation4 + $0x1e8] sm:$0xff] }
 0x43f   :  { %2488 = vst [vmem:[#allocation4 + $0x520] sm:$0x3f] %v2471_v45  ;;  %2963 = vmatmul.f32.vlgmr.msrb.gmra.mxu0 %v5823_v5  ;;  %v2584_v7 = vld [vmem:[#allocation4 + $0x2a8] sm:$0xff] }
 0x440   :  { %2487 = vst [vmem:[#allocation4 + $0x518] sm:$0x3f] %v2470_v46  ;;  %v2568_v45 = vld [vmem:[#allocation4 + $0x228] sm:$0xff]  ;;  %v2575_v46 = vld [vmem:[#allocation4 + $0x260] sm:$0xff] }
 0x443   :  { %v2460_v59 = vpop.permute.xlu0 %2459 }
 0x444   :  { %v2472_v50 = vsel %vm1813_vm3, %v2458_v36, %v2460_v59  ;;  %v2661_v51 = vld [vmem:[#allocation4 + $0x510] sm:$0x3f]  ;;  %v2586_v36 = vld [vmem:[#allocation4 + $0x2b8] sm:$0xff] }
 0x445   :  { %v2462_v11 = vpop.permute.xlu1 %2461  ;;  %2489 = vst [vmem:[#allocation4 + $0x528] sm:$0x3f] %v2472_v50  ;;  %4385 = vmatpush.msk.msrb.mxu2 %vm2689_vm8, %v2661_v51  ;;  %v2533_v50 = vld [vmem:[#allocation4 + $0x110] sm:$0xff]  ;;  %v2550_v51 = vld [vmem:[#allocation4 + $0x198] sm:$0xff] }
 0x446   :  { %v2474_v52 = vsel %vm1813_vm3, %v2462_v11, %v2464_v47  ;;  %2874 = vmatmul.f32.gmra.mxu1 %v5838_v58  ;;  %v2473_v54 = vsel %vm1813_vm3, %v2460_v59, %v2462_v11  ;;  %v2663_v23 = vld [vmem:[#allocation4 + $0x520] sm:$0x3f]  ;;  %v2542_v59 = vld [vmem:[#allocation4 + $0x158] sm:$0xff] }
 0x447   :  { %2491 = vst [vmem:[#allocation4 + $0x538] sm:$0x3f] %v2474_v52  ;;  %2966 = vmatmul.f32.gmra.mxu0 %v5838_v58  ;;  %2754 = vmatpush.msrb.mxu2 %v2652_v57  ;;  %v2662_v17 = vld [vmem:[#allocation4 + $0x518] sm:$0x3f]  ;;  %v2557_v52 = vld [vmem:[#allocation4 + $0x1d0] sm:$0xff] }
 0x448   :  { %2490 = vst [vmem:[#allocation4 + $0x530] sm:$0x3f] %v2473_v54  ;;  %v2566_v11 = vld [vmem:[#allocation4 + $0x218] sm:$0xff]  ;;  %v2524_v54 = vld [vmem:[#allocation4 + $0xc8] sm:$0xff]  ;;  %v2541_v57 = vld [vmem:[#allocation4 + $0x150] sm:$0xff] }
 0x449   :  { %2755 = vmatpush.msrb.mxu2 %v2643_v20  ;;  %v2548_v20 = vld [vmem:[#allocation4 + $0x188] sm:$0xff] }
 0x44a   :  { %4386 = vmatmul.msk.f32.vlgmr.msrb.gmra.mxu2 %vm2682_vm10, %v5869_v26 }
 0x44b   :  { %4388 = vmatpush.msk.msra.mxu2 %vm2689_vm8, %v2662_v17  ;;  %v2466_v34 = vpop.permute.xlu0 %2465  ;;  %v2515_v17 = vld [vmem:[#allocation4 + $0x80] sm:$0xff] }
 0x44c   :  { %v2475_v9 = vsel %vm1813_vm3, %v2464_v47, %v2466_v34  ;;  %v2664_v44 = vld [vmem:[#allocation4 + $0x528] sm:$0x3f]  ;;  %v2559_v47 = vld [vmem:[#allocation4 + $0x1e0] sm:$0xff] }
 0x44d   :  { %v2468_v13 = vpop.permute.xlu1 %2467  ;;  %2800 = vmatpush.msra.mxu2 %v2653_v62  ;;  %4394 = vmatpush.msk.msra.mxu3 %vm2689_vm8, %v2664_v44  ;;  %2492 = vst [vmem:[#allocation4 + $0x540] sm:$0x3f] %v2475_v9  ;;  %v2506_v9 = vld [vmem:[#allocation4 + $0x38] sm:$0xff]  ;;  %v2523_v62 = vld [vmem:[#allocation4 + $0xc0] sm:$0xff] }
 0x44e   :  { %2494 = vst.msk [vmem:[#allocation4 + $0x550] sm:$0x3f] %vm690_vm5, %v2468_v13  ;;  %v2476_v63 = vsel %vm1813_vm3, %v2466_v34, %v2468_v13  ;;  %v2666_v0 = vld [vmem:[#allocation4 + $0x538] sm:$0x3f]  ;;  %v2532_v34 = vld [vmem:[#allocation4 + $0x108] sm:$0xff]  ;;  %v2539_v13 = vld [vmem:[#allocation4 + $0x140] sm:$0xff] }
 0x44f   :  { %4400 = vmatpush.msk.msrb.mxu1 %vm2689_vm8, %v2666_v0  ;;  %2493 = vst [vmem:[#allocation4 + $0x548] sm:$0x3f] %v2476_v63  ;;  %2801 = vmatpush.msra.mxu2 %v2644_v2  ;;  %v2665_v39 = vld [vmem:[#allocation4 + $0x530] sm:$0x3f]  ;;  %v2530_v44 = vld [vmem:[#allocation4 + $0xf8] sm:$0xff]  ;;  %vm3189_vm5 = vcmask 15360  }
 0x450   :  { %2892 = vmatpush.msra.mxu3 %v2655_v42  ;;  %v2514_v63 = vld [vmem:[#allocation4 + $0x78] sm:$0xff]  ;;  %v2521_v0 = vld [vmem:[#allocation4 + $0xb0] sm:$0xff]  ;;  %v2512_v42 = vld [vmem:[#allocation4 + $0x68] sm:$0xff] }
 0x451   :  { %4391 = vmatpush.msk.msrb.mxu2 %vm2689_vm8, %v2663_v23  ;;  %2984 = vmatpush.msrb.mxu1 %v2657_v60  ;;  %v2505_v2 = vld [vmem:[#allocation4 + $0x30] sm:$0xff]  ;;  %v2503_v60 = vld [vmem:[#allocation4 + $0x20] sm:$0xff] }
 0x452   :  { %2893 = vmatpush.msra.mxu3 %v2646_v3  ;;  %4387 = vmatmul.msk.f32.gmra.mxu2 %vm2682_vm10, %v5883_v18  ;;  %v2660_v3 = vld [vmem:[#allocation4 + $0x508] sm:$0xff] }
 0x453   :  { %2846 = vmatpush.msrb.mxu2 %v2654_v6  ;;  %2985 = vmatpush.msrb.mxu1 %v2648_v8  ;;  %v2651_v8 = vld [vmem:[#allocation4 + $0x4c0] sm:$0xff] }
 0x454   :  { %4395 = vmatmul.msk.f32.vlgmr.msra.gmra.mxu3 %vm2682_vm10, %v5869_v26  ;;  %4401 = vmatmul.msk.f32.vlgmr.msrb.gmra.mxu1 %vm2682_vm10, %v5869_v26  ;;  %v2667_v6 = vld [vmem:[#allocation4 + $0x540] sm:$0x3f] }
 0x455   :  { %4397 = vmatpush.msk.msrb.mxu3 %vm2689_vm8, %v2665_v39  ;;  %3039 = vmatpush.msra.mxu1 %v2641_v19  ;;  %v2669_v23 = vld [vmem:[#allocation4 + $0x550] sm:$0x3f]  ;;  %v2658_v39 = vld [vmem:[#allocation4 + $0x4f8] sm:$0xff] }
 0x456   :  { %2847 = vmatpush.msrb.mxu2 %v2645_v1  ;;  %v2668_v12 = vld [vmem:[#allocation4 + $0x548] sm:$0x3f]  ;;  %v2649_v19 = vld [vmem:[#allocation4 + $0x4b0] sm:$0xff]  ;;  %v2642_v1 = vld [vmem:[#allocation4 + $0x478] sm:$0xff] }
 0x457   :  { %2938 = vmatpush.msrb.mxu3 %v2656_v33  ;;  %3040 = vmatpush.msra.mxu1 %v2632_v41  ;;  %v2633_v33 = vld [vmem:[#allocation4 + $0x430] sm:$0xff]  ;;  %v2624_v41 = vld [vmem:[#allocation4 + $0x3e8] sm:$0xff] }
 0x458   :  { %4406 = vmatpush.msk.msra.mxu0 %vm2689_vm8, %v2668_v12  ;;  %v2615_v12 = vld [vmem:[#allocation4 + $0x3a0] sm:$0xff] }
 0x459   :  { %2939 = vmatpush.msrb.mxu3 %v2647_v16  ;;  %3041 = vmatpush.msra.mxu1 %v2623_v40  ;;  %v2597_v16 = vld [vmem:[#allocation4 + $0x310] sm:$0xff]  ;;  %v2588_v40 = vld [vmem:[#allocation4 + $0x2c8] sm:$0xff] }
 0x45a   :  { %3076 = vmatpush.msra.mxu0 %v2659_v49  ;;  %4389 = vmatmul.msk.f32.vlgmr.msra.gmra.mxu2 %vm2682_vm10, %v5869_v26  ;;  %v2570_v49 = vld [vmem:[#allocation4 + $0x238] sm:$0xff] }
 0x45b   :  { %2993 = vmatpush.msra.mxu3 %v2640_v15  ;;  %3042 = vmatpush.msra.mxu1 %v2614_v61  ;;  %v2579_v15 = vld [vmem:[#allocation4 + $0x280] sm:$0xff]  ;;  %v2561_v61 = vld [vmem:[#allocation4 + $0x1f0] sm:$0xff] }
 0x45c   :  { %3077 = vmatpush.msra.mxu0 %v2650_v32  ;;  %4396 = vmatmul.msk.f32.gmra.mxu3 %vm2682_vm10, %v5883_v18  ;;  %v2543_v32 = vld [vmem:[#allocation4 + $0x160] sm:$0xff] }
 0x45d   :  { %2994 = vmatpush.msra.mxu3 %v2631_v24  ;;  %2901 = vmatpush.msra.mxu2 %v2638_v21  ;;  %v2552_v24 = vld [vmem:[#allocation4 + $0x1a8] sm:$0xff]  ;;  %v2534_v21 = vld [vmem:[#allocation4 + $0x118] sm:$0xff] }
 0x45e   :  { %4402 = vmatmul.msk.f32.gmra.mxu1 %vm2682_vm10, %v5883_v18  ;;  %4407 = vmatmul.msk.f32.vlgmr.msra.gmra.mxu0 %vm2682_vm10, %v5869_v26 }
 0x45f   :  { %2995 = vmatpush.msra.mxu3 %v2622_v25  ;;  %3043 = vmatpush.msra.mxu1 %v2605_v38  ;;  %v2516_v25 = vld [vmem:[#allocation4 + $0x88] sm:$0xff]  ;;  %v2507_v38 = vld [vmem:[#allocation4 + $0x40] sm:$0xff] }
 0x460   :  { %2902 = vmatpush.msra.mxu2 %v2629_v29 }
 0x461   :  { %2996 = vmatpush.msra.mxu3 %v2613_v22  ;;  %3044 = vmatpush.msra.mxu1 %v2596_v28 }
 0x462   :  { %2903 = vmatpush.msra.mxu2 %v2620_v30 }
 0x463   :  { %2997 = vmatpush.msra.mxu3 %v2604_v56  ;;  %3045 = vmatpush.msra.mxu1 %v2587_v35 }
 0x464   :  { %2904 = vmatpush.msra.mxu2 %v2611_v55  ;;  %4398 = vmatmul.msk.f32.vlgmr.msrb.gmra.mxu3 %vm2682_vm10, %v5869_v26 }
 0x465   :  { %2998 = vmatpush.msra.mxu3 %v2595_v4  ;;  %4390 = vmatmul.msk.f32.gmra.mxu2 %vm2682_vm10, %v5883_v18 }
 0x466   :  { %3046 = vmatpush.msra.mxu1 %v2578_v27  ;;  %2905 = vmatpush.msra.mxu2 %v2602_v10 }
 0x467   :  { %2999 = vmatpush.msra.mxu3 %v2586_v36  ;;  %4408 = vmatmul.msk.f32.gmra.mxu0 %vm2682_vm10, %v5883_v18 }
 0x468   :  { %3047 = vmatpush.msra.mxu1 %v2569_v31  ;;  %2906 = vmatpush.msra.mxu2 %v2593_v37 }
 0x469   :  { %3000 = vmatpush.msra.mxu3 %v2577_v53 }
 0x46a   :  { %3048 = vmatpush.msra.mxu1 %v2560_v48  ;;  %2907 = vmatpush.msra.mxu2 %v2584_v7  ;;  %v5948_v48 = vpop.permute.xlu0 %2679 }
 0x46b   :  { %3001 = vmatpush.msra.mxu3 %v2568_v45 }
 0x46c   :  { %3049 = vmatpush.msra.mxu1 %v2551_v43  ;;  %2908 = vmatpush.msra.mxu2 %v2575_v46 }
 0x46d   :  { %3002 = vmatpush.msra.mxu3 %v2559_v47  ;;  %4392 = vmatmul.msk.f32.vlgmr.msrb.gmra.mxu2 %vm2682_vm10, %v5869_v26 }
 0x46e   :  { %3050 = vmatpush.msra.mxu1 %v2542_v59  ;;  %2909 = vmatpush.msra.mxu2 %v2566_v11 }
 0x46f   :  { %3003 = vmatpush.msra.mxu3 %v2550_v51 }
 0x470   :  { %3051 = vmatpush.msra.mxu1 %v2533_v50  ;;  %2910 = vmatpush.msra.mxu2 %v2557_v52 }
 0x471   :  { %3004 = vmatpush.msra.mxu3 %v2541_v57 }
 0x472   :  { %3052 = vmatpush.msra.mxu1 %v2524_v54  ;;  %2911 = vmatpush.msra.mxu2 %v2548_v20 }
 0x473   :  { %4399 = vmatmul.msk.f32.gmra.mxu3 %vm2682_vm10, %v5883_v18 }
 0x474   :  { %3053 = vmatpush.msra.mxu1 %v2515_v17  ;;  %3005 = vmatpush.msra.mxu3 %v2532_v34 }
 0x475   :  { %2912 = vmatpush.msra.mxu2 %v2539_v13 }
 0x476   :  { %3054 = vmatpush.msra.mxu1 %v2506_v9  ;;  %3006 = vmatpush.msra.mxu3 %v2523_v62 }
 0x477   :  { %3055 = vmatmul.f32.vlgmr.msra.gmra.mxu1 %v5823_v5  ;;  %4393 = vmatmul.msk.f32.gmra.mxu2 %vm2682_vm10, %v5883_v18 }
 0x478   :  { %2913 = vmatpush.msra.mxu2 %v2530_v44  ;;  %3007 = vmatpush.msra.mxu3 %v2514_v63 }
 0x47a   :  { %2914 = vmatpush.msra.mxu2 %v2521_v0  ;;  %3008 = vmatpush.msra.mxu3 %v2505_v2 }
 0x47b   :  { %3009 = vmatmul.f32.vlgmr.msra.gmra.mxu3 %v5823_v5 }
 0x47c   :  { %2915 = vmatpush.msra.mxu2 %v2512_v42  ;;  %4409 = vmatpush.msk.msrb.mxu3 %vm2689_vm8, %v2669_v23 }
 0x47e   :  { %2916 = vmatpush.msra.mxu2 %v2503_v60  ;;  %3122 = vmatpush.msrb.mxu3 %v2660_v3 }
 0x47f   :  { %3058 = vmatmul.f32.gmra.mxu1 %v5838_v58  ;;  %2917 = vmatmul.f32.vlgmr.msra.gmra.mxu2 %v5823_v5 }
 0x480   :  { %4403 = vmatpush.msk.msrb.mxu2 %vm2689_vm8, %v2667_v6  ;;  %3123 = vmatpush.msrb.mxu3 %v2651_v8 }
 0x482   :  { %3030 = vmatpush.msrb.mxu2 %v2658_v39 }
 0x483   :  { %3012 = vmatmul.f32.gmra.mxu3 %v5838_v58 }
 0x484   :  { %3031 = vmatpush.msrb.mxu2 %v2649_v19 }
 0x486   :  { %3085 = vmatpush.msra.mxu2 %v2642_v1 }
 0x487   :  { %2920 = vmatmul.f32.gmra.mxu2 %v5838_v58 }
 0x488   :  { %3086 = vmatpush.msra.mxu2 %v2633_v33  ;;  %v5936_v35 = vpop.permute.xlu2 %2674 }
 0x48a   :  { %3087 = vmatpush.msra.mxu2 %v2624_v41 }
 0x48b   :  { %4410 = vmatmul.msk.f32.vlgmr.msrb.gmra.mxu3 %vm2682_vm10, %v5869_v26 }
 0x48c   :  { %3088 = vmatpush.msra.mxu2 %v2615_v12 }
 0x48e   :  { %3089 = vmatpush.msra.mxu2 %v2606_v14 }
 0x48f   :  { %4404 = vmatmul.msk.f32.vlgmr.msrb.gmra.mxu2 %vm2682_vm10, %v5869_v26  ;;  %v2525_v26 = vld [vmem:[#allocation4 + $0xd0] sm:$0xff] }
 0x490   :  { %3090 = vmatpush.msra.mxu2 %v2597_v16 }
 0x492   :  { %3091 = vmatpush.msra.mxu2 %v2588_v40 }
 0x493   :  { %4411 = vmatmul.msk.f32.gmra.mxu3 %vm2682_vm10, %v5883_v18 }
 0x494   :  { %3092 = vmatpush.msra.mxu2 %v2579_v15 }
 0x496   :  { %3093 = vmatpush.msra.mxu2 %v2570_v49 }
 0x497   :  { %4405 = vmatmul.msk.f32.gmra.mxu2 %vm2682_vm10, %v5883_v18 }
 0x498   :  { %3094 = vmatpush.msra.mxu2 %v2561_v61 }
 0x49a   :  { %3095 = vmatpush.msra.mxu2 %v2552_v24 }
 0x49b   :  { %v2734_v29 = vpop.f32.mrf.mxu1  ;;  %v2826_v28 = vpop.f32.mrf.mxu0 }
 0x49c   :  { %3096 = vmatpush.msra.mxu2 %v2543_v32  ;;  %v2735_v4 = vadd.f32 %v2734_v29, %v5936_v35  ;;  %v2827_v6 = vadd.f32 %v2826_v28, %v5936_v35 }
 0x49e   :  { %3097 = vmatpush.msra.mxu2 %v2534_v21 }
 0x4a0   :  { %3098 = vmatpush.msra.mxu2 %v2525_v26 }
 0x4a2   :  { %3099 = vmatpush.msra.mxu2 %v2516_v25 }
 0x4a3   :  { %v2737_v22 = vpop.f32.mrf.mxu1  ;;  %v2780_v30 = vpop.f32.mrf.mxu3 }
 0x4a4   :  { %3100 = vmatpush.msra.mxu2 %v2507_v38  ;;  %v5934_v56 = vpop.f32.mrf.mxu0  ;;  %v2738_v43 = vadd.f32 %v2737_v22, %v5948_v48  ;;  %v2781_v34 = vadd.f32 %v2780_v30, %v5936_v35 }
 0x4a5   :  { %3101 = vmatmul.f32.vlgmr.msra.gmra.mxu2 %v5823_v5  ;;  %v2830_v14 = vadd.f32 %v5934_v56, %v5948_v48 }
 0x4ab   :  { %v2783_v36 = vpop.f32.mrf.mxu3 }
 0x4ac   :  { %v2784_v42 = vadd.f32 %v2783_v36, %v5948_v48 }
 0x4ad   :  { %3104 = vmatmul.f32.gmra.mxu2 %v5838_v58 }
 0x4bb   :  { %v2872_v18 = vpop.f32.mrf.mxu1 }
 0x4bc   :  { %v2964_v27 = vpop.f32.mrf.mxu0  ;;  %v2873_v45 = vadd.f32 %v2872_v18, %v5936_v35 }
 0x4bd   :  { %v2965_v5 = vadd.f32 %v2964_v27, %v5936_v35 }
 0x4c3   :  { %v2875_v55 = vpop.f32.mrf.mxu1 }
 0x4c4   :  { %v2967_v47 = vpop.f32.mrf.mxu0  ;;  %v2876_v13 = vadd.f32 %v2875_v55, %v5948_v48 }
 0x4c5   :  { %v2968_v54 = vadd.f32 %v2967_v47, %v5948_v48 }
 0x4cd   :  { %v2757_v10 = vpop.f32.mrf.mxu2 }
 0x4ce   :  { %v2758_v31 = vadd.f32 %v2757_v10, %v2735_v4 }
 0x4d0   :  { %v5939_v37 = vmax.f32 %v2758_v31, 0.0 }
 0x4d1   :  { %v2987_v58 = vpop.f32.mrf.mxu1 }
 0x4d2   :  { %v2988_v53 = vadd.f32 %v2987_v58, %v2965_v5  ;;  %3316 = vrot.lane.b32.xlu0 %v5939_v37, %s4455_s25  ;;  %3196 = vrot.lane.b32.xlu2 %v5939_v37, %s4455_s25 }
 0x4d3   :  { %3171 = vrot.lane.b32.xlu1 %v5939_v37, %s4455_s25 }
 0x4d4   :  { %v5950_v7 = vmax.f32 %v2988_v53, 0.0 }
 0x4d5   :  { %v2760_v46 = vpop.f32.mrf.mxu2 }
 0x4d6   :  { %3154 = vst [vmem:[#allocation5 + $0x28] sm:$0xff] %v5950_v7  ;;  %v2761_v11 = vadd.f32 %v2760_v46, %v2738_v43 }
 0x4d7   :  { %v2895_v59 = vpop.f32.mrf.mxu3 }
 0x4d8   :  { %v2896_v50 = vadd.f32 %v2895_v59, %v2873_v45  ;;  %v5955_v51 = vmax.f32 %v2761_v11, 0.0 }
 0x4da   :  { %v5957_v52 = vmax.f32 %v2896_v50, 0.0  ;;  %3228 = vrot.lane.b32.xlu2 %v5939_v37, %s4455_s25 }
 0x4db   :  { %v2990_v57 = vpop.f32.mrf.mxu1  ;;  %3272 = vrot.lane.b32.xlu1 %v5939_v37, %s4455_s25  ;;  %v3079_v19 = vpop.f32.mrf.mxu0 }
 0x4dc   :  { %3152 = vst [vmem:[#allocation5 + $0x18] sm:$0xff] %v5957_v52  ;;  %v2991_v20 = vadd.f32 %v2990_v57, %v2968_v54 }
 0x4dd   :  { %v2803_v9 = vpop.f32.mrf.mxu2 }
 0x4de   :  { %v5965_v17 = vmax.f32 %v2991_v20, 0.0  ;;  %v2804_v62 = vadd.f32 %v2803_v9, %v2781_v34 }
 0x4df   :  { %v2898_v44 = vpop.f32.mrf.mxu3 }
 0x4e0   :  { %3163 = vst [vmem:[#allocation5 + $0x70] sm:$0xff] %v5965_v17  ;;  %v2899_v63 = vadd.f32 %v2898_v44, %v2876_v13  ;;  %v5970_v0 = vmax.f32 %v2804_v62, 0.0 }
 0x4e2   :  { %v5972_v2 = vmax.f32 %v2899_v63, 0.0  ;;  %3284 = vrot.lane.b32.xlu0 %v5970_v0, %s4455_s25  ;;  %3328 = vrot.lane.b32.xlu2 %v5970_v0, %s4455_s25 }
 0x4e3   :  { %3240 = vrot.lane.b32.xlu1 %v5970_v0, %s4455_s25 }
 0x4e4   :  { %3161 = vst [vmem:[#allocation5 + $0x60] sm:$0xff] %v5972_v2  ;;  %v3082_v24 = vpop.f32.mrf.mxu0 }
 0x4e7   :  { %v2941_v16 = vpop.f32.mrf.mxu3 }
 0x4e8   :  { %v2806_v23 = vpop.f32.mrf.mxu2 }
 0x4e9   :  { %v2807_v60 = vadd.f32 %v2806_v23, %v2784_v42 }
 0x4ea   :  { %3448 = vrot.lane.b32.xlu0 %v5970_v0, %s4455_s25  ;;  %3360 = vrot.lane.b32.xlu2 %v5970_v0, %s4455_s25 }
 0x4eb   :  { %v5982_v3 = vmax.f32 %v2807_v60, 0.0  ;;  %3404 = vrot.lane.b32.xlu1 %v5970_v0, %s4455_s25 }
 0x4f0   :  { %v2849_v8 = vpop.f32.mrf.mxu2 }
 0x4f1   :  { %v2850_v39 = vadd.f32 %v2849_v8, %v2827_v6 }
 0x4f2   :  { %3492 = vrot.lane.b32.xlu2 %v5970_v0, %s4455_s25  ;;  %3198 = vrot.lane.b32.xlu0 %v5955_v51, %s4455_s25 }
 0x4f3   :  { %v5991_v1 = vmax.f32 %v2850_v39, 0.0  ;;  %3318 = vrot.lane.b32.xlu1 %v5955_v51, %s4455_s25 }
 0x4f4   :  { %v3056_v33 = vpop.f32.mrf.mxu1 }
 0x4f5   :  { %v3057_v41 = vadd.f32 %v3056_v33, %v5936_v35 }
 0x4f6   :  { %v2944_v38 = vpop.f32.mrf.mxu3 }
 0x4f7   :  { %v3080_v12 = vadd.f32 %v3079_v19, %v3057_v41 }
 0x4f9   :  { %v6002_v40 = vmax.f32 %v3080_v12, 0.0 }
 0x4fa   :  { %v2852_v15 = vpop.f32.mrf.mxu2  ;;  %3230 = vrot.lane.b32.xlu0 %v5955_v51, %s4455_s25  ;;  %3173 = vrot.lane.b32.xlu2 %v5955_v51, %s4455_s25 }
 0x4fb   :  { %3156 = vst [vmem:[#allocation5 + $0x38] sm:$0xff] %v6002_v40  ;;  %v2853_v49 = vadd.f32 %v2852_v15, %v2830_v14  ;;  %3372 = vrot.lane.b32.xlu1 %v5991_v1, %s4455_s25 }
 0x4fc   :  { %v3059_v61 = vpop.f32.mrf.mxu1 }
 0x4fd   :  { %v6009_v32 = vmax.f32 %v2853_v49, 0.0  ;;  %v3060_v21 = vadd.f32 %v3059_v61, %v5948_v48 }
 0x4fe   :  { %v3010_v55 = vpop.f32.mrf.mxu3 }
 0x4ff   :  { %v3083_v26 = vadd.f32 %v3082_v24, %v3060_v21  ;;  %v3011_v10 = vadd.f32 %v3010_v55, %v5936_v35 }
 0x501   :  { %v6014_v25 = vmax.f32 %v3083_v26, 0.0 }
 0x502   :  { %v2918_v29 = vpop.f32.mrf.mxu2  ;;  %3416 = vrot.lane.b32.xlu0 %v5991_v1, %s4455_s25  ;;  %3274 = vrot.lane.b32.xlu2 %v5955_v51, %s4455_s25 }
 0x503   :  { %3165 = vst [vmem:[#allocation5 + $0x80] sm:$0xff] %v6014_v25  ;;  %v2919_v22 = vadd.f32 %v2918_v29, %v5936_v35  ;;  %3504 = vrot.lane.b32.xlu1 %v5991_v1, %s4455_s25 }
 0x505   :  { %v2942_v28 = vadd.f32 %v2941_v16, %v2919_v22 }
 0x506   :  { %v3013_v58 = vpop.f32.mrf.mxu3 }
 0x507   :  { %v6024_v18 = vmax.f32 %v2942_v28, 0.0  ;;  %v3014_v53 = vadd.f32 %v3013_v58, %v5948_v48 }
 0x50a   :  { %v2921_v30 = vpop.f32.mrf.mxu2  ;;  %3330 = vrot.lane.b32.xlu0 %v5982_v3, %s4455_s25  ;;  %3460 = vrot.lane.b32.xlu2 %v5991_v1, %s4455_s25 }
 0x50b   :  { %v2922_v56 = vadd.f32 %v2921_v30, %v5948_v48  ;;  %3286 = vrot.lane.b32.xlu1 %v5982_v3, %s4455_s25 }
 0x50d   :  { %v2945_v4 = vadd.f32 %v2944_v38, %v2922_v56 }
 0x50e   :  { %v3125_v59 = vpop.f32.mrf.mxu3 }
 0x50f   :  { %v6033_v27 = vmax.f32 %v2945_v4, 0.0 }
 0x512   :  { %v3033_v36 = vpop.f32.mrf.mxu2  ;;  %3362 = vrot.lane.b32.xlu0 %v5982_v3, %s4455_s25  ;;  %3242 = vrot.lane.b32.xlu2 %v5982_v3, %s4455_s25 }
 0x513   :  { %v3034_v31 = vadd.f32 %v3033_v36, %v3011_v10  ;;  %3450 = vrot.lane.b32.xlu1 %v5982_v3, %s4455_s25 }
 0x515   :  { %v6042_v5 = vmax.f32 %v3034_v31, 0.0 }
 0x516   :  { %v3128_v34 = vpop.f32.mrf.mxu3 }
 0x51a   :  { %v3036_v43 = vpop.f32.mrf.mxu2  ;;  %3494 = vrot.lane.b32.xlu0 %v5982_v3, %s4455_s25  ;;  %3406 = vrot.lane.b32.xlu2 %v5982_v3, %s4455_s25 }
 0x51b   :  { %v3037_v45 = vadd.f32 %v3036_v43, %v3014_v53  ;;  %3418 = vrot.lane.b32.xlu1 %v6009_v32, %s4455_s25 }
 0x51d   :  { %v6051_v46 = vmax.f32 %v3037_v45, 0.0 }
 0x522   :  { %3462 = vrot.lane.b32.xlu0 %v6009_v32, %s4455_s25  ;;  %3374 = vrot.lane.b32.xlu2 %v6009_v32, %s4455_s25 }
 0x523   :  { %3536 = vrot.lane.b32.xlu1 %v5991_v1, %s4455_s25 }
 0x528   :  { %v3102_v47 = vpop.f32.mrf.mxu2 }
 0x529   :  { %v3103_v11 = vadd.f32 %v3102_v47, %v5936_v35 }
 0x52a   :  { %3562 = vrot.lane.b32.xlu0 %v5972_v2, %s4455_s25  ;;  %3506 = vrot.lane.b32.xlu2 %v6009_v32, %s4455_s25 }
 0x52b   :  { %v3126_v50 = vadd.f32 %v3125_v59, %v3103_v11  ;;  %3572 = vrot.lane.b32.xlu1 %v6024_v18, %s4455_s25 }
 0x52c   :  { %v3197_v57 = vpop.permute.xlu2 %3196 }
 0x52d   :  { %v3139_v54 = vmax.f32 %v3126_v50, 0.0  ;;  %v6117_v12 = vmax.f32 %v5939_v37, %v3197_v57 }
 0x52f   :  { %3157 = vst.msk [vmem:[#allocation5 + $0x40] sm:$0xff] %vm1413_vm0, %v3139_v54 }
 0x530   :  { %v3105_v20 = vpop.f32.mrf.mxu2 }
 0x531   :  { %v3106_v13 = vadd.f32 %v3105_v20, %v5948_v48 }
 0x532   :  { %3616 = vrot.lane.b32.xlu0 %v6024_v18, %s4455_s25  ;;  %3538 = vrot.lane.b32.xlu2 %v6009_v32, %s4455_s25 }
 0x533   :  { %v3129_v9 = vadd.f32 %v3128_v34, %v3106_v13  ;;  %3604 = vrot.lane.b32.xlu1 %v5957_v52, %s4455_s25 }
 0x534   :  { %v6072_v62 = vpop.permute.xlu2 %3228 }
 0x535   :  { %v3148_v35 = vmax.f32 %v3129_v9, 0.0 }
 0x536   :  { %v6105_v8 = vld [vmem:[#allocation5 + $0x40] sm:$0xff] }
 0x537   :  { %3166 = vst.msk [vmem:[#allocation5 + $0x88] sm:$0xff] %vm1413_vm0, %v3148_v35 }
 0x53a   :  { %3648 = vrot.lane.b32.xlu0 %v5957_v52, %s4455_s25  ;;  %3560 = vrot.lane.b32.xlu2 %v5957_v52, %s4455_s25 }
 0x53b   :  { %3618 = vrot.lane.b32.xlu1 %v6033_v27, %s4455_s25 }
 0x53c   :  { %v3329_v48 = vpop.permute.xlu2 %3328 }
 0x53d   :  { %v3334_v61 = vmax.f32 %v5970_v0, %v3329_v48 }
 0x53e   :  { %v6091_v42 = vld [vmem:[#allocation5 + $0x88] sm:$0xff] }
 0x542   :  { %3794 = vrot.lane.b32.xlu0 %v6051_v46, %s4455_s25  ;;  %3574 = vrot.lane.b32.xlu2 %v6033_v27, %s4455_s25 }
 0x543   :  { %3750 = vrot.lane.b32.xlu1 %v6033_v27, %s4455_s25 }
 0x544   :  { %v6089_v63 = vpop.permute.xlu2 %3360  ;;  %v6101_v60 = vpop.permute.xlu0 %3316 }
 0x545   :  { %v3172_v44 = vpop.permute.xlu1 %3171 }
 0x546   :  { %v6114_v41 = vmax.f32 %v5939_v37, %v3172_v44 }
 0x54a   :  { %3748 = vrot.lane.b32.xlu0 %v6024_v18, %s4455_s25  ;;  %3606 = vrot.lane.b32.xlu2 %v5972_v2, %s4455_s25 }
 0x54b   :  { %4114 = vrot.lane.b32.xlu1 %v6091_v42, %s4455_s25 }
 0x54c   :  { %v6103_v6 = vpop.permute.xlu2 %3492 }
 0x54d   :  { %v6099_v23 = vpop.permute.xlu1 %3272 }
 0x552   :  { %4068 = vrot.lane.b32.xlu0 %v6105_v8, %s4455_s25  ;;  %4112 = vrot.lane.b32.xlu2 %v6105_v8, %s4455_s25 }
 0x553   :  { %4070 = vrot.lane.b32.xlu1 %v6091_v42, %s4455_s25 }
 0x554   :  { %v3174_v39 = vpop.permute.xlu2 %3173  ;;  %v3285_v19 = vpop.permute.xlu0 %3284 }
 0x555   :  { %v3241_v33 = vpop.permute.xlu1 %3240  ;;  %v3290_v38 = vmax.f32 %v5970_v0, %v3285_v19  ;;  %v6141_v29 = vmax.f32 %v5955_v51, %v3174_v39 }
 0x556   :  { %v3246_v49 = vmax.f32 %v5970_v0, %v3241_v33 }
 0x55a   :  { %3181 = vrot.lane.b32.xlu0 %v6114_v41, %s4460_s30  ;;  %3792 = vrot.lane.b32.xlu2 %v6042_v5, %s4455_s25 }
 0x55b   :  { %3206 = vrot.lane.b32.xlu1 %v6117_v12, %s4460_s30 }
 0x55c   :  { %v6125_v14 = vpop.permute.xlu2 %3274  ;;  %v6127_v16 = vpop.permute.xlu0 %3448 }
 0x55d   :  { %v6129_v15 = vpop.permute.xlu1 %3404 }
 0x562   :  { %3250 = vrot.lane.b32.xlu0 %v3246_v49, %s4460_s30  ;;  %4026 = vrot.lane.b32.xlu2 %v6014_v25, %s4455_s25 }
 0x563   :  { %3338 = vrot.lane.b32.xlu1 %v3334_v61, %s4460_s30 }
 0x564   :  { %v3461_v24 = vpop.permute.xlu2 %3460  ;;  %v3199_v21 = vpop.permute.xlu0 %3198 }
 0x565   :  { %v6137_v26 = vpop.permute.xlu1 %3318  ;;  %v6150_v55 = vmax.f32 %v5955_v51, %v3199_v21  ;;  %v3466_v4 = vmax.f32 %v5991_v1, %v3461_v24 }
 0x56a   :  { %3294 = vrot.lane.b32.xlu2 %v3290_v38, %s4460_s30 }
 0x56b   :  { %3183 = vrot.lane.b32.xlu1 %v6141_v29, %s4460_s30 }
 0x56c   :  { %v3243_v22 = vpop.permute.xlu2 %3242  ;;  %v6146_v28 = vpop.permute.xlu0 %3230 }
 0x56d   :  { %v3373_v30 = vpop.permute.xlu1 %3372  ;;  %v3247_v43 = vmax.f32 %v5982_v3, %v3243_v22 }
 0x56e   :  { %v3378_v56 = vmax.f32 %v5991_v1, %v3373_v30 }
 0x570   :  { %3382 = vrot.lane.b32.xlu0 %v3378_v56, %s4460_s30 }
 0x572   :  { %3208 = vrot.lane.b32.xlu2 %v6150_v55, %s4460_s30 }
 0x573   :  { %3470 = vrot.lane.b32.xlu1 %v3466_v4, %s4460_s30 }
 0x574   :  { %v6157_v10 = vpop.permute.xlu2 %3406  ;;  %v3417_v36 = vpop.permute.xlu0 %3416 }
 0x575   :  { %v3505_v31 = vpop.permute.xlu1 %3504  ;;  %v3422_v53 = vmax.f32 %v5991_v1, %v3417_v36 }
 0x576   :  { %v3510_v58 = vmax.f32 %v5991_v1, %v3505_v31 }
 0x578   :  { %3514 = vrot.lane.b32.xlu0 %v3510_v58, %s4460_s30 }
 0x57a   :  { %3426 = vrot.lane.b32.xlu2 %v3422_v53, %s4460_s30 }
 0x57b   :  { %3252 = vrot.lane.b32.xlu1 %v3247_v43, %s4460_s30 }
 0x57c   :  { %v3375_v45 = vpop.permute.xlu2 %3374  ;;  %v3331_v59 = vpop.permute.xlu0 %3330 }
 0x57d   :  { %v3287_v47 = vpop.permute.xlu1 %3286  ;;  %v3335_v11 = vmax.f32 %v5982_v3, %v3331_v59  ;;  %v3379_v50 = vmax.f32 %v6009_v32, %v3375_v45 }
 0x57e   :  { %v3291_v38 = vmax.f32 %v5982_v3, %v3287_v47 }
 0x582   :  { %3340 = vrot.lane.b32.xlu2 %v3335_v11, %s4460_s30 }
 0x583   :  { %3384 = vrot.lane.b32.xlu1 %v3379_v50, %s4460_s30 }
 0x584   :  { %v3507_v54 = vpop.permute.xlu2 %3506  ;;  %v6169_v57 = vpop.permute.xlu0 %3362 }
 0x585   :  { %v6171_v20 = vpop.permute.xlu1 %3450  ;;  %v3511_v34 = vmax.f32 %v6009_v32, %v3507_v54 }
 0x58b   :  { %3516 = vrot.lane.b32.xlu1 %v3511_v34, %s4460_s30 }
 0x58c   :  { %v3539_v13 = vpop.permute.xlu2 %3538  ;;  %v6175_v9 = vpop.permute.xlu0 %3494 }
 0x58d   :  { %v3419_v35 = vpop.permute.xlu1 %3418  ;;  %v6178_v48 = vmax.f32 %v6009_v32, %v3539_v13 }
 0x58e   :  { %v3423_v56 = vmax.f32 %v6009_v32, %v3419_v35 }
 0x593   :  { %3548 = vrot.lane.b32.xlu1 %v6178_v48, %s4460_s30 }
 0x594   :  { %v6182_v44 = vpop.permute.xlu2 %3560  ;;  %v3463_v39 = vpop.permute.xlu0 %3462 }
 0x595   :  { %v3537_v19 = vpop.permute.xlu1 %3536  ;;  %v3467_v33 = vmax.f32 %v6009_v32, %v3463_v39 }
 0x596   :  { %v6186_v49 = vmax.f32 %v5991_v1, %v3537_v19 }
 0x597   :  { %3472 = vrot.lane.b32.xlu2 %v3467_v33, %s4460_s30 }
 0x598   :  { %3546 = vrot.lane.b32.xlu0 %v6186_v49, %s4460_s30 }
 0x59b   :  { %4024 = vrot.lane.b32.xlu1 %v6002_v40, %s4455_s25 }
 0x59c   :  { %v3575_v61 = vpop.permute.xlu2 %3574  ;;  %v6193_v24 = vpop.permute.xlu0 %3562 }
 0x59d   :  { %v3573_v21 = vpop.permute.xlu1 %3572  ;;  %v3579_v32 = vmax.f32 %v6033_v27, %v3575_v61 }
 0x59e   :  { %v3578_v34 = vmax.f32 %v6024_v18, %v3573_v21 }
 0x59f   :  { %3706 = vrot.lane.b32.xlu2 %v6033_v27, %s4455_s25 }
 0x5a0   :  { %3296 = vrot.lane.b32.xlu0 %v3291_v38, %s4460_s30 }
 0x5a3   :  { %3662 = vrot.lane.b32.xlu1 %v6033_v27, %s4455_s25 }
 0x5a4   :  { %v6201_v1 = vpop.permute.xlu2 %3606  ;;  %v3617_v22 = vpop.permute.xlu0 %3616 }
 0x5a5   :  { %v6203_v30 = vpop.permute.xlu1 %3604  ;;  %v3622_v53 = vmax.f32 %v6024_v18, %v3617_v22 }
 0x5a7   :  { %3970 = vrot.lane.b32.xlu2 %v6051_v46, %s4455_s25 }
 0x5a8   :  { %3428 = vrot.lane.b32.xlu0 %v3423_v56, %s4460_s30 }
 0x5ab   :  { %3968 = vrot.lane.b32.xlu1 %v6042_v5, %s4455_s25 }
 0x5ac   :  { %v6211_v4 = vpop.permute.xlu0 %3648  ;;  %v4113_v31 = vpop.permute.xlu2 %4112 }
 0x5ad   :  { %v3619_v36 = vpop.permute.xlu1 %3618 }
 0x5ae   :  { %v3623_v33 = vmax.f32 %v6033_v27, %v3619_v36 }
 0x5af   :  { %3926 = vrot.lane.b32.xlu2 %v6051_v46, %s4455_s25 }
 0x5b0   :  { %3704 = vrot.lane.b32.xlu0 %v6024_v18, %s4455_s25 }
 0x5b3   :  { %3584 = vrot.lane.b32.xlu1 %v3579_v32, %s4460_s30 }
 0x5b4   :  { %v3795_v58 = vpop.permute.xlu0 %3794  ;;  %v6222_v45 = vpop.permute.xlu2 %3792 }
 0x5b5   :  { %v6220_v43 = vpop.permute.xlu1 %3750 }
 0x5b7   :  { %3626 = vrot.lane.b32.xlu2 %v3622_v53, %s4460_s30  ;;  %v4118_v53 = vmax.f32 %v6105_v8, %v4113_v31 }
 0x5b8   :  { %3660 = vrot.lane.b32.xlu0 %v6024_v18, %s4455_s25 }
 0x5bb   :  { %3882 = vrot.lane.b32.xlu1 %v6051_v46, %s4455_s25 }
 0x5bc   :  { %v6229_v59 = vpop.permute.xlu0 %3748  ;;  %v6235_v11 = vpop.permute.xlu2 %4026 }
 0x5bd   :  { %v4115_v47 = vpop.permute.xlu1 %4114 }
 0x5be   :  { %v4119_v31 = vmax.f32 %v6091_v42, %v4115_v47 }
 0x5bf   :  { %3880 = vrot.lane.b32.xlu2 %v6042_v5, %s4455_s25 }
 0x5c0   :  { %3924 = vrot.lane.b32.xlu0 %v6042_v5, %s4455_s25 }
 0x5c3   :  { %3836 = vrot.lane.b32.xlu1 %v6042_v5, %s4455_s25 }
 0x5c4   :  { %v6239_v50 = vpop.permute.xlu0 %4068  ;;  %v3295_v13 = vpop.permute.xlu2 %3294 }
 0x5c5   :  { %v4071_v54 = vpop.permute.xlu1 %4070 }
 0x5c6   :  { %v4075_v36 = vmax.f32 %v6091_v42, %v4071_v54 }
 0x5c7   :  { %4158 = vrot.lane.b32.xlu2 %v6091_v42, %s4455_s25 }
 0x5c8   :  { %3582 = vrot.lane.b32.xlu0 %v3578_v34, %s4460_s30 }
 0x5cb   :  { %4102 = vrot.lane.b32.xlu1 %v6014_v25, %s4455_s25 }
 0x5cc   :  { %v3182_v35 = vpop.permute.xlu0 %3181  ;;  %v3209_v61 = vpop.permute.xlu2 %3208 }
 0x5cd   :  { %v3207_v39 = vpop.permute.xlu1 %3206  ;;  %v3187_v19 = vmax.f32 %v6114_v41, %v3182_v35  ;;  %v3799_v41 = vmax.f32 %v6051_v46, %v3795_v58  ;;  %v3278_v58 = vmax.f32 %v5939_v37, %v6099_v23 }
 0x5cf   :  { %3190 = vst.msk [vmem:[#allocation6] sm:$0xff] %vm3189_vm5, %v3187_v19  ;;  %4100 = vrot.lane.b32.xlu2 %v6002_v40, %s4455_s25  ;;  %v3300_v34 = vmax.f32 %v3278_v58, %v3295_v13  ;;  %v3234_v19 = vmax.f32 %v5939_v37, %v6072_v62  ;;  %v3366_v13 = vmax.f32 %v5970_v0, %v6089_v63 }
 0x5d0   :  { %3628 = vrot.lane.b32.xlu0 %v3623_v33, %s4460_s30 }
 0x5d3   :  { %3782 = vrot.lane.b32.xlu1 %v5965_v17, %s4455_s25 }
 0x5d4   :  { %v3427_v56 = vpop.permute.xlu2 %3426 }
 0x5d5   :  { %v3339_v21 = vpop.permute.xlu1 %3338 }
 0x5d7   :  { %4058 = vrot.lane.b32.xlu2 %v6014_v25, %s4455_s25 }
 0x5d8   :  { %3838 = vrot.lane.b32.xlu0 %v6051_v46, %s4455_s25 }
 0x5db   :  { %3780 = vrot.lane.b32.xlu1 %v5950_v7, %s4455_s25 }
 0x5dc   :  { %v3341_v35 = vpop.permute.xlu2 %3340 }
 0x5dd   :  { %v3184_v38 = vpop.permute.xlu1 %3183 }
 0x5de   :  { %v3188_v22 = vmax.f32 %v6141_v29, %v3184_v38  ;;  %v3251_v29 = vpop.permute.xlu0 %3250 }
 0x5df   :  { %3804 = vrot.lane.b32.xlu2 %v3799_v41, %s4460_s30  ;;  %v3256_v54 = vmax.f32 %v3234_v19, %v3251_v29  ;;  %v3213_v41 = vmax.f32 %v6150_v55, %v3209_v61  ;;  %v3498_v61 = vmax.f32 %v5970_v0, %v6103_v6  ;;  %v3212_v29 = vmax.f32 %v6117_v12, %v3207_v39 }
 0x5e0   :  { %3191 = vst.msk [vmem:[#allocation6 + $0x8] sm:$0xff] %vm3189_vm5, %v3188_v22  ;;  %4156 = vrot.lane.b32.xlu0 %v6105_v8, %s4455_s25  ;;  %v3322_v6 = vmax.f32 %v5939_v37, %v6101_v60  ;;  %v3454_v37 = vmax.f32 %v5970_v0, %v6127_v16 }
 0x5e3   :  { %4080 = vrot.lane.b32.xlu1 %v4075_v36, %s4460_s30  ;;  %v3410_v36 = vmax.f32 %v5970_v0, %v6129_v15  ;;  %v3323_v15 = vmax.f32 %v5955_v51, %v6137_v26  ;;  %v3455_v26 = vmax.f32 %v5982_v3, %v6171_v20  ;;  %v3279_v20 = vmax.f32 %v5955_v51, %v6125_v14 }
 0x5e4   :  { %v3235_v0 = vmax.f32 %v5955_v51, %v6146_v28  ;;  %v3411_v14 = vmax.f32 %v5982_v3, %v6157_v10  ;;  %v3367_v51 = vmax.f32 %v5982_v3, %v6169_v57  ;;  %v3610_v10 = vmax.f32 %v5957_v52, %v6203_v30 }
 0x5e5   :  { %v3471_v32 = vpop.permute.xlu1 %3470  ;;  %v3432_v47 = vmax.f32 %v3410_v36, %v3427_v56  ;;  %v3345_v56 = vmax.f32 %v3323_v15, %v3341_v35 }
 0x5e6   :  { %v3383_v23 = vpop.permute.xlu0 %3382 }
 0x5e7   :  { %3738 = vrot.lane.b32.xlu2 %v5972_v2, %s4455_s25  ;;  %v3388_v62 = vmax.f32 %v3366_v13, %v3383_v23 }
 0x5e8   :  { %4122 = vrot.lane.b32.xlu0 %v4118_v53, %s4460_s30 }
 0x5eb   :  { %3304 = vrot.lane.b32.xlu1 %v3300_v34, %s4472_s4 }
 0x5ed   :  { %v3253_v33 = vpop.permute.xlu1 %3252 }
 0x5ee   :  { %v3515_v55 = vpop.permute.xlu0 %3514 }
 0x5ef   :  { %3260 = vrot.lane.b32.xlu2 %v3256_v54, %s4452_s22  ;;  %v3520_v63 = vmax.f32 %v3498_v61, %v3515_v55  ;;  %v3344_v54 = vmax.f32 %v3322_v6, %v3339_v21  ;;  %v4074_v21 = vmax.f32 %v6105_v8, %v6239_v50  ;;  %v6333_v50 = vmax.f32 %v6014_v25, %v6235_v11 }
 0x5f0   :  { %4124 = vrot.lane.b32.xlu0 %v4119_v31, %s4460_s30  ;;  %v3499_v61 = vmax.f32 %v5982_v3, %v6175_v9  ;;  %v3798_v3 = vmax.f32 %v6042_v5, %v6222_v45  ;;  %v3755_v6 = vmax.f32 %v6033_v27, %v6220_v43  ;;  %v3566_v45 = vmax.f32 %v5957_v52, %v6182_v44 }
 0x5f1   :  { %v3473_v38 = vpop.permute.xlu2 %3472 }
 0x5f2   :  { %v3477_v39 = vmax.f32 %v3455_v26, %v3473_v38 }
 0x5f3   :  { %3218 = vrot.lane.b32.xlu1 %v3213_v41, %s4457_s27 }
 0x5f5   :  { %v3385_v22 = vpop.permute.xlu1 %3384 }
 0x5f7   :  { %3392 = vrot.lane.b32.xlu2 %v3388_v62, %s4462_s9 }
 0x5f8   :  { %4056 = vrot.lane.b32.xlu0 %v6002_v40, %s4455_s25 }
 0x5f9   :  { %v6290_v53 = vpop.permute.xlu2 %3706 }
 0x5fa   :  { %v3711_v9 = vmax.f32 %v6033_v27, %v6290_v53 }
 0x5fb   :  { %3436 = vrot.lane.b32.xlu1 %v3432_v47, %s4453_s23 }
 0x5fd   :  { %v3517_v58 = vpop.permute.xlu1 %3516 }
 0x5ff   :  { %3524 = vrot.lane.b32.xlu2 %v3520_v63, %s4458_s28  ;;  %v3521_v63 = vmax.f32 %v3499_v61, %v3517_v58 }
 0x600   :  { %3216 = vrot.lane.b32.xlu0 %v3212_v29, %s4457_s27 }
 0x601   :  { %v6300_v34 = vpop.permute.xlu2 %3970 }
 0x603   :  { %3350 = vrot.lane.b32.xlu1 %v3345_v56, %s4473_s14 }
 0x605   :  { %v3549_v19 = vpop.permute.xlu1 %3548 }
 0x606   :  { %v3553_v12 = vmax.f32 %v6178_v48, %v3549_v19  ;;  %v3476_v48 = vmax.f32 %v3454_v37, %v3471_v32  ;;  %v3257_v32 = vmax.f32 %v3235_v0, %v3253_v33  ;;  %v3389_v33 = vmax.f32 %v3367_v51, %v3385_v22 }
 0x608   :  { %3555 = vst.msk [vmem:[#allocation6 + $0x98] sm:$0xff] %vm3189_vm5, %v3553_v12  ;;  %3348 = vrot.lane.b32.xlu0 %v3344_v54, %s4473_s14 }
 0x609   :  { %v6310_v35 = vpop.permute.xlu2 %3926 }
 0x60a   :  { %v3547_v31 = vpop.permute.xlu0 %3546 }
 0x60b   :  { %v3552_v23 = vmax.f32 %v6186_v49, %v3547_v31  ;;  %3482 = vrot.lane.b32.xlu1 %v3477_v39, %s4460_s30  ;;  %v3754_v39 = vmax.f32 %v6024_v18, %v6229_v59 }
 0x60d   :  { %3554 = vst.msk [vmem:[#allocation6 + $0x90] sm:$0xff] %vm3189_vm5, %v3552_v23  ;;  %v4025_v60 = vpop.permute.xlu1 %4024  ;;  %v3567_v23 = vmax.f32 %v5972_v2, %v6193_v24 }
 0x60e   :  { %v6391_v44 = vmax.f32 %v6002_v40, %v4025_v60  ;;  %v3611_v60 = vmax.f32 %v5972_v2, %v6201_v1 }
 0x610   :  { %3480 = vrot.lane.b32.xlu0 %v3476_v48, %s4460_s30 }
 0x611   :  { %v3627_v41 = vpop.permute.xlu2 %3626 }
 0x612   :  { %v3297_v38 = vpop.permute.xlu0 %3296  ;;  %v3632_v11 = vmax.f32 %v3610_v10, %v3627_v41 }
 0x613   :  { %v3301_v49 = vmax.f32 %v3279_v20, %v3297_v38  ;;  %4078 = vrot.lane.b32.xlu1 %v4074_v21, %s4460_s30  ;;  %v3931_v38 = vmax.f32 %v6051_v46, %v6310_v35 }
 0x615   :  { %v6325_v16 = vpop.permute.xlu1 %3662  ;;  %3306 = vrot.lane.b32.xlu2 %v3301_v49, %s4472_s4 }
 0x616   :  { %v3667_v51 = vmax.f32 %v6033_v27, %v6325_v16 }
 0x618   :  { %3262 = vrot.lane.b32.xlu0 %v3257_v32, %s4452_s22 }
 0x619   :  { %v6335_v13 = vpop.permute.xlu2 %3880 }
 0x61a   :  { %v3429_v62 = vpop.permute.xlu0 %3428 }
 0x61b   :  { %v3433_v36 = vmax.f32 %v3411_v14, %v3429_v62  ;;  %4036 = vrot.lane.b32.xlu1 %v6333_v50, %s4460_s30  ;;  %v6429_v62 = vld [vmem:[#allocation5 + $0x28] sm:$0xff] }
 0x61d   :  { %v6341_v28 = vpop.permute.xlu1 %3968  ;;  %3438 = vrot.lane.b32.xlu2 %v3433_v36, %s4453_s23 }
 0x61e   :  { %v3974_v16 = vmax.f32 %v6042_v5, %v6341_v28  ;;  %v6466_v28 = vld [vmem:[#allocation5 + $0x70] sm:$0xff] }
 0x620   :  { %3394 = vrot.lane.b32.xlu0 %v3389_v33, %s4462_s9  ;;  %v3886_v33 = vmax.f32 %v6042_v5, %v6335_v13 }
 0x621   :  { %v6347_v47 = vpop.permute.xlu2 %4158 }
 0x622   :  { %v3705_v55 = vpop.permute.xlu0 %3704 }
 0x623   :  { %3636 = vrot.lane.b32.xlu1 %v3632_v11, %s4470_s17  ;;  %v3710_v19 = vmax.f32 %v6024_v18, %v3705_v55  ;;  %v3975_v11 = vmax.f32 %v6051_v46, %v6300_v34 }
 0x625   :  { %v3585_v57 = vpop.permute.xlu1 %3584  ;;  %3736 = vrot.lane.b32.xlu2 %v5957_v52, %s4455_s25 }
 0x626   :  { %v3589_v48 = vmax.f32 %v3567_v23, %v3585_v57 }
 0x628   :  { %3526 = vrot.lane.b32.xlu0 %v3521_v63, %s4458_s28  ;;  %s4474_s28 = smov 80  }
 0x629   :  { %v6355_v22 = vpop.permute.xlu2 %4100 }
 0x62a   :  { %v6357_v30 = vpop.permute.xlu0 %3660 }
 0x62b   :  { %4002 = vrot.lane.b32.xlu1 %v6014_v25, %s4455_s25 }
 0x62d   :  { %v6361_v29 = vpop.permute.xlu1 %3882  ;;  %3694 = vrot.lane.b32.xlu2 %v5972_v2, %s4455_s25 }
 0x630   :  { %3802 = vrot.lane.b32.xlu0 %v3798_v3, %s4460_s30 }
 0x631   :  { %v4059_v58 = vpop.permute.xlu2 %4058 }
 0x632   :  { %v6370_v15 = vpop.permute.xlu0 %3924  ;;  %v4063_v0 = vmax.f32 %v6014_v25, %v4059_v58 }
 0x633   :  { %3716 = vrot.lane.b32.xlu1 %v3711_v9, %s4460_s30  ;;  %v3930_v63 = vmax.f32 %v6042_v5, %v6370_v15  ;;  %v3887_v9 = vmax.f32 %v6051_v46, %v6361_v29 }
 0x635   :  { %v6373_v56 = vpop.permute.xlu1 %3836 }
 0x638   :  { %3760 = vrot.lane.b32.xlu0 %v3755_v6, %s4460_s30 }
 0x639   :  { %v3805_v54 = vpop.permute.xlu2 %3804 }
 0x63a   :  { %v3583_v12 = vpop.permute.xlu0 %3582 }
 0x63b   :  { %v3588_v53 = vmax.f32 %v3566_v45, %v3583_v12  ;;  %3714 = vrot.lane.b32.xlu1 %v3710_v19, %s4460_s30  ;;  %v3842_v12 = vmax.f32 %v6042_v5, %v6373_v56 }
 0x63d   :  { %v6382_v26 = vpop.permute.xlu1 %4102  ;;  %3592 = vrot.lane.b32.xlu2 %v3588_v53, %s4468_s15 }
 0x63e   :  { %v4107_v56 = vmax.f32 %v6014_v25, %v6382_v26 }
 0x640   :  { %3758 = vrot.lane.b32.xlu0 %v3754_v39, %s4460_s30 }
 0x641   :  { %v6388_v43 = vpop.permute.xlu2 %3738 }
 0x642   :  { %v3629_v31 = vpop.permute.xlu0 %3628 }
 0x643   :  { %3956 = vrot.lane.b32.xlu1 %v5950_v7, %s4455_s25  ;;  %v3633_v24 = vmax.f32 %v3611_v60, %v3629_v31 }
 0x645   :  { %v3783_v37 = vpop.permute.xlu1 %3782  ;;  %4034 = vrot.lane.b32.xlu2 %v6391_v44, %s4460_s30 }
 0x646   :  { %v3787_v59 = vmax.f32 %v5965_v17, %v3783_v37 }
 0x648   :  { %v6400_v20 = vmax.f32 %v3787_v59, %v3805_v54  ;;  %3594 = vrot.lane.b32.xlu0 %v3589_v48, %s4468_s15 }
 0x649   :  { %v3261_v21 = vpop.permute.xlu2 %3260 }
 0x64a   :  { %3266 = vst.msk [vmem:[#allocation6 + $0x20] sm:$0xff] %vm3189_vm5, %v3261_v21  ;;  %v6406_v7 = vpop.permute.xlu0 %3838 }
 0x64b   :  { %3914 = vrot.lane.b32.xlu1 %v5965_v17, %s4455_s25  ;;  %v3843_v45 = vmax.f32 %v6051_v46, %v6406_v7  ;;  %v6501_v46 = vld [vmem:[#allocation5 + $0x38] sm:$0xff] }
 0x64d   :  { %v6410_v41 = vpop.permute.xlu1 %3780  ;;  %3638 = vrot.lane.b32.xlu2 %v3633_v24, %s4470_s17 }
 0x650   :  { %3692 = vrot.lane.b32.xlu0 %v5957_v52, %s4455_s25 }
 0x651   :  { %v3393_v1 = vpop.permute.xlu2 %3392 }
 0x652   :  { %3398 = vst.msk [vmem:[#allocation6 + $0x50] sm:$0xff] %vm3189_vm5, %v3393_v1  ;;  %v6418_v49 = vpop.permute.xlu0 %4156 }
 0x653   :  { %3936 = vrot.lane.b32.xlu1 %v3931_v38, %s4460_s30  ;;  %v4162_v5 = vmax.f32 %v6105_v8, %v6418_v49  ;;  %v6520_v49 = vld [vmem:[#allocation5 + $0x28] sm:$0xff] }
 0x655   :  { %v4081_v32 = vpop.permute.xlu1 %4080  ;;  %4000 = vrot.lane.b32.xlu2 %v6002_v40, %s4455_s25 }
 0x656   :  { %v6424_v14 = vmax.f32 %v4063_v0, %v4081_v32  ;;  %v3786_v0 = vmax.f32 %v6520_v49, %v6410_v41  ;;  %v4196_v41 = vld [vmem:[#allocation6 + $0x20] sm:$0xff] }
 0x658   :  { %3650 = vrot.lane.b32.xlu0 %v5972_v2, %s4455_s25 }
 0x659   :  { %v3525_v52 = vpop.permute.xlu2 %3524  ;;  %v4202_v8 = vld [vmem:[#allocation6 + $0x50] sm:$0xff] }
 0x65a   :  { %3530 = vst.msk [vmem:[#allocation6 + $0x80] sm:$0xff] %vm3189_vm5, %v3525_v52  ;;  %v4123_v35 = vpop.permute.xlu0 %4122 }
 0x65b   :  { %3868 = vrot.lane.b32.xlu1 %v6429_v62, %s4455_s25 }
 0x65d   :  { %v3305_v36 = vpop.permute.xlu1 %3304  ;;  %3958 = vrot.lane.b32.xlu2 %v5965_v17, %s4455_s25  ;;  %v3666_v17 = vmax.f32 %v6024_v18, %v6357_v30  ;;  %v4163_v18 = vmax.f32 %v6091_v42, %v6347_v47  ;;  %v4106_v30 = vmax.f32 %v6002_v40, %v6355_v22 }
 0x65e   :  { %3310 = vst.msk [vmem:[#allocation6 + $0x30] sm:$0xff] %vm3189_vm5, %v3305_v36 }
 0x65f   :  { %v4128_v47 = vmax.f32 %v4106_v30, %v4123_v35 }
 0x660   :  { %3672 = vrot.lane.b32.xlu0 %v3667_v51, %s4460_s30 }
 0x662   :  { %v6441_v10 = vpop.permute.xlu0 %4124 }
 0x663   :  { %3890 = vrot.lane.b32.xlu1 %v3886_v33, %s4460_s30  ;;  %v4129_v59 = vmax.f32 %v4107_v56, %v6441_v10 }
 0x665   :  { %v3219_v55 = vpop.permute.xlu1 %3218  ;;  %3980 = vrot.lane.b32.xlu2 %v3975_v11, %s4460_s30  ;;  %v4198_v51 = vld [vmem:[#allocation6 + $0x30] sm:$0xff] }
 0x666   :  { %3223 = vst.msk [vmem:[#allocation6 + $0x18] sm:$0xff] %vm3189_vm5, %v3219_v55 }
 0x668   :  { %3670 = vrot.lane.b32.xlu0 %v3666_v17, %s4460_s30 }
 0x66a   :  { %v6451_v27 = vpop.permute.xlu0 %4056 }
 0x66b   :  { %4146 = vrot.lane.b32.xlu1 %v6014_v25, %s4455_s25  ;;  %v4062_v32 = vmax.f32 %v6002_v40, %v6451_v27  ;;  %v3743_v40 = vmax.f32 %v5972_v2, %v6388_v43  ;;  %v4184_v2 = vld [vmem:[%s6640_s5] sm:$0xff]  ;;  %v4444_v43 = vld [vmem:[#allocation5 + $0x18] sm:$0xff] }
 0x66d   :  { %v3437_v34 = vpop.permute.xlu1 %3436  ;;  %3978 = vrot.lane.b32.xlu2 %v3974_v16, %s4460_s30  ;;  %v4195_v55 = vld [vmem:[#allocation6 + $0x18] sm:$0xff] }
 0x66e   :  { %3442 = vst.msk [vmem:[#allocation6 + $0x60] sm:$0xff] %vm3189_vm5, %v3437_v34 }
 0x66f   :  { %v3307_v13 = vpop.permute.xlu2 %3306 }
 0x670   :  { %3311 = vst.msk [vmem:[#allocation6 + $0x38] sm:$0xff] %vm3189_vm5, %v3307_v13  ;;  %3912 = vrot.lane.b32.xlu0 %v6429_v62, %s4455_s25  ;;  %v4193_v13 = vld [vmem:[#allocation6 + $0x8] sm:$0xff] }
 0x672   :  { %v3217_v61 = vpop.permute.xlu0 %3216 }
 0x673   :  { %3222 = vst.msk [vmem:[#allocation6 + $0x10] sm:$0xff] %vm3189_vm5, %v3217_v61  ;;  %4168 = vrot.lane.b32.xlu1 %v4163_v18, %s4460_s30  ;;  %v4192_v61 = vld [vmem:[#allocation6] sm:$0xff] }
 0x675   :  { %v3351_v57 = vpop.permute.xlu1 %3350  ;;  %3870 = vrot.lane.b32.xlu2 %v6466_v28, %s4455_s25  ;;  %v4204_v31 = vld [vmem:[#allocation6 + $0x60] sm:$0xff] }
 0x676   :  { %3355 = vst.msk [vmem:[#allocation6 + $0x48] sm:$0xff] %vm3189_vm5, %v3351_v57 }
 0x677   :  { %v3439_v42 = vpop.permute.xlu2 %3438  ;;  %v4199_v35 = vld [vmem:[#allocation6 + $0x38] sm:$0xff] }
 0x678   :  { %3443 = vst.msk [vmem:[#allocation6 + $0x68] sm:$0xff] %vm3189_vm5, %v3439_v42  ;;  %3934 = vrot.lane.b32.xlu0 %v3930_v63, %s4460_s30 }
 0x67a   :  { %v3349_v3 = vpop.permute.xlu0 %3348  ;;  %v4194_v16 = vld [vmem:[#allocation6 + $0x10] sm:$0xff] }
 0x67b   :  { %3354 = vst.msk [vmem:[#allocation6 + $0x40] sm:$0xff] %vm3189_vm5, %v3349_v3  ;;  %4132 = vrot.lane.b32.xlu1 %v4128_v47, %s4472_s4 }
 0x67d   :  { %v3483_v58 = vpop.permute.xlu1 %3482  ;;  %3892 = vrot.lane.b32.xlu2 %v3887_v9, %s4460_s30  ;;  %v4201_v26 = vld [vmem:[#allocation6 + $0x48] sm:$0xff]  ;;  %v4445_v9 = vld [vmem:[#allocation5 + $0x60] sm:$0xff] }
 0x67e   :  { %3487 = vst.msk [vmem:[#allocation6 + $0x78] sm:$0xff] %vm3189_vm5, %v3483_v58 }
 0x67f   :  { %v6486_v15 = vpop.permute.xlu2 %3736  ;;  %v4205_v53 = vld [vmem:[#allocation6 + $0x68] sm:$0xff] }
 0x680   :  { %3826 = vrot.lane.b32.xlu0 %v6466_v28, %s4455_s25  ;;  %v3742_v57 = vmax.f32 %v4444_v43, %v6486_v15 }
 0x682   :  { %v3481_v22 = vpop.permute.xlu0 %3480  ;;  %v4200_v1 = vld [vmem:[#allocation6 + $0x40] sm:$0xff] }
 0x683   :  { %3486 = vst.msk [vmem:[#allocation6 + $0x70] sm:$0xff] %vm3189_vm5, %v3481_v22 }
 0x685   :  { %v4079_v6 = vpop.permute.xlu1 %4078  ;;  %3824 = vrot.lane.b32.xlu2 %v6429_v62, %s4455_s25  ;;  %v4207_v29 = vld [vmem:[#allocation6 + $0x78] sm:$0xff] }
 0x686   :  { %4260 = vmatpush.msrb.mxu0 %v4207_v29 }
 0x687   :  { %v6499_v23 = vpop.permute.xlu2 %3694 }
 0x688   :  { %3848 = vrot.lane.b32.xlu0 %v3843_v45, %s4460_s30  ;;  %v3699_v58 = vmax.f32 %v4445_v9, %v6499_v23  ;;  %v4447_v45 = vld [vmem:[#allocation5 + $0x70] sm:$0xff]  ;;  %v4188_v23 = vld [vmem:[%s6640_s5 + $0x20] sm:$0x3] }
 0x68a   :  { %v3263_v19 = vpop.permute.xlu0 %3262  ;;  %v4206_v54 = vld [vmem:[#allocation6 + $0x70] sm:$0xff] }
 0x68b   :  { %3267 = vst.msk [vmem:[#allocation6 + $0x28] sm:$0xff] %vm3189_vm5, %v3263_v19  ;;  %4261 = vmatpush.msrb.mxu0 %v4206_v54 }
 0x68d   :  { %v6496_v39 = vpop.permute.xlu1 %4036  ;;  %3846 = vrot.lane.b32.xlu2 %v3842_v12, %s4460_s30  ;;  %4262 = vmatpush.msrb.mxu0 %v4205_v53 }
 0x68e   :  { %v4041_v27 = vmax.f32 %v6333_v50, %v6496_v39 }
 0x68f   :  { %4263 = vmatpush.msrb.mxu0 %v4204_v31 }
 0x690   :  { %4144 = vrot.lane.b32.xlu0 %v6501_v46, %s4455_s25 }
 0x692   :  { %v3395_v37 = vpop.permute.xlu0 %3394 }
 0x693   :  { %3399 = vst.msk [vmem:[#allocation6 + $0x58] sm:$0xff] %vm3189_vm5, %v3395_v37 }
 0x695   :  { %v3637_v48 = vpop.permute.xlu1 %3636  ;;  %4166 = vrot.lane.b32.xlu2 %v4162_v5, %s4460_s30 }
 0x696   :  { %3642 = vst.msk [vmem:[#allocation6 + $0xb0] sm:$0xff] %vm3189_vm5, %v3637_v48 }
 0x697   :  { %v3593_v60 = vpop.permute.xlu2 %3592 }
 0x698   :  { %3598 = vst.msk [vmem:[#allocation6 + $0xa0] sm:$0xff] %vm3189_vm5, %v3593_v60  ;;  %4134 = vrot.lane.b32.xlu0 %v4129_v59, %s4472_s4 }
 0x69a   :  { %v3527_v21 = vpop.permute.xlu0 %3526  ;;  %v4203_v7 = vld [vmem:[#allocation6 + $0x58] sm:$0xff] }
 0x69b   :  { %3531 = vst.msk [vmem:[#allocation6 + $0x88] sm:$0xff] %vm3189_vm5, %v3527_v21  ;;  %4264 = vmatpush.msrb.mxu0 %v4203_v7 }
 0x69d   :  { %v4003_v24 = vpop.permute.xlu1 %4002  ;;  %3814 = vrot.lane.b32.xlu2 %v6400_v20, %s4473_s14  ;;  %4265 = vmatpush.msrb.mxu0 %v4202_v8  ;;  %v4084_v20 = vmax.f32 %v4062_v32, %v4079_v6  ;;  %v4446_v6 = vld [vmem:[#allocation5 + $0x38] sm:$0xff] }
 0x69e   :  { %v6540_v63 = vmax.f32 %v6014_v25, %v4003_v24 }
 0x69f   :  { %v4035_v38 = vpop.permute.xlu2 %4034  ;;  %4266 = vmatpush.msrb.mxu0 %v4201_v26 }
 0x6a0   :  { %4090 = vrot.lane.b32.xlu0 %v6424_v14, %s4452_s22  ;;  %v4197_v14 = vld [vmem:[#allocation6 + $0x28] sm:$0xff]  ;;  %v4040_v42 = vmax.f32 %v6391_v44, %v4035_v38 }
 0x6a1   :  { %4267 = vmatpush.msrb.mxu0 %v4200_v1 }
 0x6a2   :  { %v3803_v52 = vpop.permute.xlu0 %3802 }
 0x6a3   :  { %v3808_v36 = vmax.f32 %v3786_v0, %v3803_v52  ;;  %4268 = vmatpush.msrb.mxu0 %v4199_v35  ;;  %v3654_v0 = vmax.f32 %v4444_v43, %v6211_v4 }
 0x6a5   :  { %v3717_v33 = vpop.permute.xlu1 %3716  ;;  %4088 = vrot.lane.b32.xlu2 %v4084_v20, %s4452_s22  ;;  %4269 = vmatpush.msrb.mxu0 %v4198_v51 }
 0x6a6   :  { %3812 = vrot.lane.b32.xlu1 %v3808_v36, %s4473_s14  ;;  %v3721_v15 = vmax.f32 %v3699_v58, %v3717_v33 }
 0x6a7   :  { %v3639_v10 = vpop.permute.xlu2 %3638  ;;  %4270 = vmatpush.msrb.mxu0 %v4197_v14 }
 0x6a8   :  { %3643 = vst.msk [vmem:[#allocation6 + $0xb8] sm:$0xff] %vm3189_vm5, %v3639_v10 }
 0x6a9   :  { %4271 = vmatpush.msrb.mxu0 %v4196_v41  ;;  %v4448_v41 = vld [vmem:[#allocation5 + $0x80] sm:$0xff] }
 0x6aa   :  { %v3761_v11 = vpop.permute.xlu0 %3760 }
 0x6ab   :  { %v3765_v17 = vmax.f32 %v3743_v40, %v3761_v11  ;;  %4272 = vmatpush.msrb.mxu0 %v4195_v55 }
 0x6ad   :  { %v3715_v34 = vpop.permute.xlu1 %3714  ;;  %4273 = vmatpush.msrb.mxu0 %v4194_v16  ;;  %3770 = vrot.lane.b32.xlu0 %v3765_v17, %s4462_s9 }
 0x6ae   :  { %4046 = vrot.lane.b32.xlu1 %v4041_v27, %s4457_s27 }
 0x6af   :  { %v4001_v18 = vpop.permute.xlu2 %4000  ;;  %4274 = vmatpush.msrb.mxu0 %v4193_v13 }
 0x6b0   :  { %v6548_v25 = vmax.f32 %v4446_v6, %v4001_v18  ;;  %v4243_v18 = vld [vmem:[%s6641_s6 + $0x8] sm:$0x3] }
 0x6b1   :  { %4275 = vmatpush.msrb.mxu0 %v4192_v61 }
 0x6b2   :  { %v3759_v50 = vpop.permute.xlu0 %3758  ;;  %4276 = vmatmul.f32.vlgmr.msrb.gmra.mxu0 %v4184_v2 }
 0x6b3   :  { %v3764_v30 = vmax.f32 %v3742_v57, %v3759_v50 }
 0x6b5   :  { %v3957_v47 = vpop.permute.xlu1 %3956  ;;  %4012 = vrot.lane.b32.xlu0 %v6540_v63, %s4460_s30  ;;  %3768 = vrot.lane.b32.xlu2 %v3764_v30, %s4462_s9 }
 0x6b6   :  { %4044 = vrot.lane.b32.xlu1 %v4040_v42, %s4457_s27  ;;  %v3962_v32 = vmax.f32 %v6520_v49, %v3957_v47 }
 0x6b7   :  { %v3959_v3 = vpop.permute.xlu2 %3958 }
 0x6b8   :  { %v3963_v19 = vmax.f32 %v4447_v45, %v3959_v3 }
 0x6ba   :  { %v3595_v22 = vpop.permute.xlu0 %3594  ;;  %4279 = vmatmul.f32.gmra.mxu0 %v4188_v23 }
 0x6bb   :  { %3599 = vst.msk [vmem:[#allocation6 + $0xa8] sm:$0xff] %vm3189_vm5, %v3595_v22 }
 0x6bd   :  { %v3915_v44 = vpop.permute.xlu1 %3914  ;;  %4010 = vrot.lane.b32.xlu0 %v6548_v25, %s4460_s30  ;;  %3726 = vrot.lane.b32.xlu2 %v3721_v15, %s4466_s13  ;;  %s4475_s30 = smov 88  }
 0x6be   :  { %v3919_v5 = vmax.f32 %v4447_v45, %v3915_v44 }
 0x6bf   :  { %v3981_v29 = vpop.permute.xlu2 %3980 }
 0x6c0   :  { %v3985_v12 = vmax.f32 %v3963_v19, %v3981_v29 }
 0x6c2   :  { %v3693_v54 = vpop.permute.xlu0 %3692 }
 0x6c3   :  { %v3698_v53 = vmax.f32 %v4444_v43, %v3693_v54 }
 0x6c5   :  { %v3720_v39 = vmax.f32 %v3698_v53, %v3715_v34  ;;  %v3937_v31 = vpop.permute.xlu1 %3936  ;;  %3990 = vrot.lane.b32.xlu0 %v3985_v12, %s4468_s15 }
 0x6c6   :  { %v3941_v48 = vmax.f32 %v3919_v5, %v3937_v31 }
 0x6c7   :  { %v3979_v37 = vpop.permute.xlu2 %3978  ;;  %3724 = vrot.lane.b32.xlu1 %v3720_v39, %s4466_s13 }
 0x6c8   :  { %v3984_v35 = vmax.f32 %v3962_v32, %v3979_v37 }
 0x6ca   :  { %v3651_v56 = vpop.permute.xlu0 %3650 }
 0x6cb   :  { %v3655_v21 = vmax.f32 %v4445_v9, %v3651_v56 }
 0x6cd   :  { %v3869_v59 = vpop.permute.xlu1 %3868  ;;  %3946 = vrot.lane.b32.xlu0 %v3941_v48, %s4451_s2 }
 0x6ce   :  { %v3874_v24 = vmax.f32 %v6429_v62, %v3869_v59 }
 0x6cf   :  { %v3871_v60 = vpop.permute.xlu2 %3870 }
 0x6d0   :  { %v3875_v33 = vmax.f32 %v6466_v28, %v3871_v60 }
 0x6d2   :  { %v3673_v7 = vpop.permute.xlu0 %3672 }
 0x6d3   :  { %v3677_v8 = vmax.f32 %v3655_v21, %v3673_v7 }
 0x6d5   :  { %v3891_v26 = vpop.permute.xlu1 %3890  ;;  %3682 = vrot.lane.b32.xlu2 %v3677_v8, %s4465_s12 }
 0x6d6   :  { %v3896_v38 = vmax.f32 %v3874_v24, %v3891_v26 }
 0x6d7   :  { %v3893_v1 = vpop.permute.xlu2 %3892 }
 0x6d8   :  { %3900 = vrot.lane.b32.xlu0 %v3896_v38, %s4474_s28  ;;  %v3897_v10 = vmax.f32 %v3875_v33, %v3893_v1 }
 0x6da   :  { %v3671_v52 = vpop.permute.xlu0 %3670 }
 0x6db   :  { %v3676_v20 = vmax.f32 %v3654_v0, %v3671_v52 }
 0x6dd   :  { %v4147_v36 = vpop.permute.xlu1 %4146  ;;  %3988 = vrot.lane.b32.xlu2 %v3984_v35, %s4468_s15  ;;  %3680 = vrot.lane.b32.xlu1 %v3676_v20, %s4465_s12 }
 0x6de   :  { %v4151_v40 = vmax.f32 %v4448_v41, %v4147_v36 }
 0x6df   :  { %v3825_v51 = vpop.permute.xlu2 %3824 }
 0x6e0   :  { %v3830_v49 = vmax.f32 %v6429_v62, %v3825_v51 }
 0x6e2   :  { %v3913_v14 = vpop.permute.xlu0 %3912 }
 0x6e3   :  { %v3918_v17 = vmax.f32 %v6429_v62, %v3913_v14  ;;  %v4242_v62 = vld [vmem:[%s6641_s6] sm:$0xff] }
 0x6e5   :  { %v4169_v11 = vpop.permute.xlu1 %4168  ;;  %3902 = vrot.lane.b32.xlu2 %v3897_v10, %s4474_s28  ;;  %v4215_v10 = vld [vmem:[#allocation6 + $0xb8] sm:$0xff] }
 0x6e6   :  { %v4173_v4 = vmax.f32 %v4151_v40, %v4169_v11  ;;  %v4214_v40 = vld [vmem:[#allocation6 + $0xb0] sm:$0xff]  ;;  %v4213_v11 = vld [vmem:[#allocation6 + $0xa8] sm:$0xff] }
 0x6e7   :  { %v3847_v55 = vpop.permute.xlu2 %3846 }
 0x6e8   :  { %4178 = vrot.lane.b32.xlu0 %v4173_v4, %s4473_s14  ;;  %v3852_v16 = vmax.f32 %v3830_v49, %v3847_v55  ;;  %v4212_v55 = vld [vmem:[#allocation6 + $0xa0] sm:$0xff]  ;;  %v4211_v49 = vld [vmem:[#allocation6 + $0x98] sm:$0xff] }
 0x6ea   :  { %v3935_v27 = vpop.permute.xlu0 %3934 }
 0x6eb   :  { %v3940_v34 = vmax.f32 %v3918_v17, %v3935_v27  ;;  %v4210_v27 = vld [vmem:[#allocation6 + $0x90] sm:$0xff] }
 0x6ed   :  { %v4133_v13 = vpop.permute.xlu1 %4132  ;;  %3856 = vrot.lane.b32.xlu2 %v3852_v16, %s4475_s30  ;;  %3944 = vrot.lane.b32.xlu1 %v3940_v34, %s4451_s2  ;;  %v4209_v16 = vld [vmem:[#allocation6 + $0x88] sm:$0xff]  ;;  %v4185_v34 = vld [vmem:[%s6640_s5 + $0x8] sm:$0xff] }
 0x6ee   :  { %4138 = vst.msk [vmem:[#allocation6 + $0x170] sm:$0xff] %vm3189_vm5, %v4133_v13  ;;  %v4208_v13 = vld [vmem:[#allocation6 + $0x80] sm:$0xff] }
 0x6ef   :  { %v4167_v61 = vpop.permute.xlu2 %4166 }
 0x6f0   :  { %4251 = vperm.xlu0 %4441, %v4243_v18  }
 0x6f2   :  { %v3827_v2 = vpop.permute.xlu0 %3826 }
 0x6f3   :  { %v3831_v57 = vmax.f32 %v6466_v28, %v3827_v2 }
 0x6f5   :  { %4246 = vperm.xlu2 %4442, %v4242_v62   ;;  %v4238_v44 = vld [vmem:[#allocation6 + $0x170] sm:$0xff]  ;;  %v4189_v62 = vld [vmem:[%s6640_s5 + $0x28] sm:$0x3] }
 0x6f7   :  { %v3815_v43 = vpop.permute.xlu2 %3814 }
 0x6f8   :  { %3819 = vst.msk [vmem:[#allocation6 + $0xf8] sm:$0xff] %vm3189_vm5, %v3815_v43 }
 0x6fa   :  { %v3849_v50 = vpop.permute.xlu0 %3848 }
 0x6fb   :  { %v3853_v30 = vmax.f32 %v3831_v57, %v3849_v50  ;;  %v4186_v50 = vld [vmem:[%s6640_s5 + $0x10] sm:$0xff] }
 0x6fd   :  { %3858 = vrot.lane.b32.xlu1 %v3853_v30, %s4475_s30 }
 0x6ff   :  { %v4089_v42 = vpop.permute.xlu2 %4088  ;;  %v4223_v47 = vld [vmem:[#allocation6 + $0xf8] sm:$0xff] }
 0x700   :  { %4094 = vst.msk [vmem:[#allocation6 + $0x160] sm:$0xff] %vm3189_vm5, %v4089_v42  ;;  %4283 = vmatpush.msrb.mxu1 %v4223_v47  ;;  %v4190_v47 = vld [vmem:[%s6640_s5 + $0x30] sm:$0x3] }
 0x702   :  { %v4145_v3 = vpop.permute.xlu0 %4144 }
 0x703   :  { %v4150_v9 = vmax.f32 %v6501_v46, %v4145_v3  ;;  %v4187_v3 = vld [vmem:[%s6640_s5 + $0x18] sm:$0xff] }
 0x705   :  { %v4172_v58 = vmax.f32 %v4150_v9, %v4167_v61 }
 0x707   :  { %4176 = vrot.lane.b32.xlu1 %v4172_v58, %s4473_s14  ;;  %v4236_v19 = vld [vmem:[#allocation6 + $0x160] sm:$0xff]  ;;  %v4191_v58 = vld [vmem:[%s6640_s5 + $0x38] sm:$0x3] }
 0x70a   :  { %v4135_v22 = vpop.permute.xlu0 %4134 }
 0x70b   :  { %4139 = vst.msk [vmem:[#allocation6 + $0x178] sm:$0xff] %vm3189_vm5, %v4135_v22 }
 0x70f   :  { %v3769_v15 = vpop.permute.xlu2 %3768 }
 0x710   :  { %3774 = vst.msk [vmem:[#allocation6 + $0xe0] sm:$0xff] %vm3189_vm5, %v3769_v15 }
 0x712   :  { %v4091_v28 = vpop.permute.xlu0 %4090  ;;  %v4239_v6 = vld [vmem:[#allocation6 + $0x178] sm:$0xff] }
 0x713   :  { %4095 = vst.msk [vmem:[#allocation6 + $0x168] sm:$0xff] %vm3189_vm5, %v4091_v28  ;;  %4306 = vmatpush.msra.mxu3 %v4239_v6 }
 0x715   :  { %4307 = vmatpush.msra.mxu3 %v4238_v44 }
 0x717   :  { %v3727_v29 = vpop.permute.xlu2 %3726  ;;  %v4220_v56 = vld [vmem:[#allocation6 + $0xe0] sm:$0xff] }
 0x718   :  { %v3813_v45 = vpop.permute.xlu1 %3812  ;;  %3731 = vst.msk [vmem:[#allocation6 + $0xd8] sm:$0xff] %vm3189_vm5, %v3727_v29 }
 0x719   :  { %3818 = vst.msk [vmem:[#allocation6 + $0xf0] sm:$0xff] %vm3189_vm5, %v3813_v45 }
 0x71a   :  { %v4237_v46 = vld [vmem:[#allocation6 + $0x168] sm:$0xff] }
 0x71b   :  { %4308 = vmatpush.msra.mxu3 %v4237_v46 }
 0x71d   :  { %4309 = vmatpush.msra.mxu3 %v4236_v19 }
 0x71f   :  { %v3771_v54 = vpop.permute.xlu0 %3770  ;;  %v4219_v48 = vld [vmem:[#allocation6 + $0xd8] sm:$0xff] }
 0x720   :  { %v4047_v12 = vpop.permute.xlu1 %4046  ;;  %3775 = vst.msk [vmem:[#allocation6 + $0xe8] sm:$0xff] %vm3189_vm5, %v3771_v54  ;;  %v4222_v53 = vld [vmem:[#allocation6 + $0xf0] sm:$0xff] }
 0x721   :  { %4051 = vst.msk [vmem:[#allocation6 + $0x158] sm:$0xff] %vm3189_vm5, %v4047_v12  ;;  %4284 = vmatpush.msrb.mxu1 %v4222_v53 }
 0x727   :  { %v4013_v39 = vpop.permute.xlu0 %4012  ;;  %v4221_v31 = vld [vmem:[#allocation6 + $0xe8] sm:$0xff] }
 0x728   :  { %v4045_v23 = vpop.permute.xlu1 %4044  ;;  %v4017_v37 = vmax.f32 %v6540_v63, %v4013_v39  ;;  %4285 = vmatpush.msrb.mxu1 %v4221_v31  ;;  %v4235_v5 = vld [vmem:[#allocation6 + $0x158] sm:$0xff] }
 0x729   :  { %4050 = vst.msk [vmem:[#allocation6 + $0x150] sm:$0xff] %vm3189_vm5, %v4045_v23  ;;  %4310 = vmatpush.msra.mxu3 %v4235_v5 }
 0x72a   :  { %4019 = vst.msk [vmem:[#allocation6 + $0x148] sm:$0xff] %vm3189_vm5, %v4017_v37  ;;  %4286 = vmatpush.msrb.mxu1 %v4220_v56 }
 0x72c   :  { %4287 = vmatpush.msrb.mxu1 %v4219_v48 }
 0x72f   :  { %v3683_v59 = vpop.permute.xlu2 %3682  ;;  %v4011_v60 = vpop.permute.xlu0 %4010 }
 0x730   :  { %3687 = vst.msk [vmem:[#allocation6 + $0xc8] sm:$0xff] %vm3189_vm5, %v3683_v59  ;;  %v4016_v21 = vmax.f32 %v6548_v25, %v4011_v60  ;;  %v4234_v7 = vld [vmem:[#allocation6 + $0x150] sm:$0xff]  ;;  %v4277_v22 = vpop.f32.mrf.mxu0 }
 0x731   :  { %4311 = vmatpush.msra.mxu3 %v4234_v7  ;;  %v4233_v63 = vld [vmem:[#allocation6 + $0x148] sm:$0xff] }
 0x732   :  { %4018 = vst.msk [vmem:[#allocation6 + $0x140] sm:$0xff] %vm3189_vm5, %v4016_v21 }
 0x733   :  { %4312 = vmatpush.msra.mxu3 %v4233_v63 }
 0x737   :  { %v3989_v8 = vpop.permute.xlu2 %3988  ;;  %v3991_v24 = vpop.permute.xlu0 %3990  ;;  %v4217_v35 = vld [vmem:[#allocation6 + $0xc8] sm:$0xff] }
 0x738   :  { %3994 = vst.msk [vmem:[#allocation6 + $0x130] sm:$0xff] %vm3189_vm5, %v3989_v8  ;;  %v4280_v45 = vpop.f32.mrf.mxu0 }
 0x739   :  { %3995 = vst.msk [vmem:[#allocation6 + $0x138] sm:$0xff] %vm3189_vm5, %v3991_v24  ;;  %v3725_v26 = vpop.permute.xlu1 %3724  ;;  %v4232_v38 = vld [vmem:[#allocation6 + $0x140] sm:$0xff] }
 0x73a   :  { %3730 = vst.msk [vmem:[#allocation6 + $0xd0] sm:$0xff] %vm3189_vm5, %v3725_v26  ;;  %4313 = vmatpush.msra.mxu3 %v4232_v38 }
 0x73f   :  { %v3903_v1 = vpop.permute.xlu2 %3902  ;;  %v3947_v0 = vpop.permute.xlu0 %3946  ;;  %v4230_v52 = vld [vmem:[#allocation6 + $0x130] sm:$0xff] }
 0x740   :  { %3907 = vst.msk [vmem:[#allocation6 + $0x118] sm:$0xff] %vm3189_vm5, %v3903_v1  ;;  %v4231_v25 = vld [vmem:[#allocation6 + $0x138] sm:$0xff] }
 0x741   :  { %3951 = vst.msk [vmem:[#allocation6 + $0x128] sm:$0xff] %vm3189_vm5, %v3947_v0  ;;  %4314 = vmatpush.msra.mxu3 %v4231_v25  ;;  %v4218_v32 = vld [vmem:[#allocation6 + $0xd0] sm:$0xff] }
 0x742   :  { %4288 = vmatpush.msrb.mxu1 %v4218_v32 }
 0x743   :  { %4315 = vmatpush.msra.mxu3 %v4230_v52 }
 0x744   :  { %4289 = vmatpush.msrb.mxu1 %v4217_v35 }
 0x747   :  { %v3857_v20 = vpop.permute.xlu2 %3856  ;;  %v4227_v61 = vld [vmem:[#allocation6 + $0x118] sm:$0xff] }
 0x748   :  { %3862 = vst.msk [vmem:[#allocation6 + $0x100] sm:$0xff] %vm3189_vm5, %v3857_v20  ;;  %v4229_v36 = vld [vmem:[#allocation6 + $0x128] sm:$0xff] }
 0x749   :  { %4316 = vmatpush.msra.mxu3 %v4229_v36 }
 0x74a   :  { %v3901_v51 = vpop.permute.xlu0 %3900 }
 0x74b   :  { %3906 = vst.msk [vmem:[#allocation6 + $0x110] sm:$0xff] %vm3189_vm5, %v3901_v51 }
 0x74f   :  { %v3681_v33 = vpop.permute.xlu1 %3680  ;;  %v4224_v42 = vld [vmem:[#allocation6 + $0x100] sm:$0xff]  ;;  %v4247_v15 = vpop.permute.xlu2 %4246 }
 0x750   :  { %3686 = vst.msk [vmem:[#allocation6 + $0xc0] sm:$0xff] %vm3189_vm5, %v3681_v33  ;;  %v4278_v44 = vadd.f32 %v4277_v22, %v4247_v15 }
 0x752   :  { %v4226_v2 = vld [vmem:[#allocation6 + $0x110] sm:$0xff] }
 0x757   :  { %v4216_v14 = vld [vmem:[#allocation6 + $0xc0] sm:$0xff] }
 0x758   :  { %4290 = vmatpush.msrb.mxu1 %v4216_v14 }
 0x75a   :  { %4291 = vmatpush.msrb.mxu1 %v4215_v10  ;;  %v4179_v41 = vpop.permute.xlu0 %4178 }
 0x75b   :  { %4183 = vst.msk [vmem:[#allocation6 + $0x188] sm:$0xff] %vm3189_vm5, %v4179_v41 }
 0x75c   :  { %4292 = vmatpush.msrb.mxu1 %v4214_v40 }
 0x75e   :  { %4293 = vmatpush.msrb.mxu1 %v4213_v11 }
 0x75f   :  { %v3945_v4 = vpop.permute.xlu1 %3944 }
 0x760   :  { %3950 = vst.msk [vmem:[#allocation6 + $0x120] sm:$0xff] %vm3189_vm5, %v3945_v4  ;;  %4294 = vmatpush.msrb.mxu1 %v4212_v55 }
 0x762   :  { %4295 = vmatpush.msrb.mxu1 %v4211_v49  ;;  %v4241_v17 = vld [vmem:[#allocation6 + $0x188] sm:$0xff]  ;;  %v4252_v19 = vpop.permute.xlu0 %4251 }
 0x763   :  { %4343 = vmatpush.msrb.mxu2 %v4241_v17  ;;  %v4281_v39 = vadd.f32 %v4280_v45, %v4252_v19 }
 0x764   :  { %4296 = vmatpush.msrb.mxu1 %v4210_v27 }
 0x766   :  { %4297 = vmatpush.msrb.mxu1 %v4209_v16 }
 0x767   :  { %v4228_v18 = vld [vmem:[#allocation6 + $0x120] sm:$0xff] }
 0x768   :  { %4298 = vmatpush.msrb.mxu1 %v4208_v13  ;;  %4317 = vmatpush.msra.mxu3 %v4228_v18 }
 0x769   :  { %4299 = vmatmul.f32.vlgmr.msrb.gmra.mxu1 %v4185_v34 }
 0x76a   :  { %4318 = vmatpush.msra.mxu3 %v4227_v61 }
 0x76c   :  { %4319 = vmatpush.msra.mxu3 %v4226_v2 }
 0x76f   :  { %v3859_v43 = vpop.permute.xlu1 %3858 }
 0x770   :  { %3863 = vst.msk [vmem:[#allocation6 + $0x108] sm:$0xff] %vm3189_vm5, %v3859_v43 }
 0x771   :  { %4302 = vmatmul.f32.gmra.mxu1 %v4189_v62 }
 0x777   :  { %v4225_v57 = vld [vmem:[#allocation6 + $0x108] sm:$0xff] }
 0x778   :  { %4320 = vmatpush.msra.mxu3 %v4225_v57 }
 0x779   :  { %v4177_v30 = vpop.permute.xlu1 %4176 }
 0x77a   :  { %4182 = vst.msk [vmem:[#allocation6 + $0x180] sm:$0xff] %vm3189_vm5, %v4177_v30  ;;  %4321 = vmatpush.msra.mxu3 %v4224_v42 }
 0x77b   :  { %4322 = vmatmul.f32.vlgmr.msra.gmra.mxu3 %v4186_v50 }
 0x781   :  { %v4240_v9 = vld [vmem:[#allocation6 + $0x180] sm:$0xff] }
 0x782   :  { %4344 = vmatpush.msrb.mxu2 %v4240_v9 }
 0x783   :  { %4325 = vmatmul.f32.gmra.mxu3 %v4190_v47  ;;  %4412 = vmatmul.msk.f32.vlgmr.msrb.gmra.mxu2 %vm1044_vm13, %v4187_v3 }
 0x78b   :  { %4413 = vmatmul.msk.f32.gmra.mxu2 %vm1044_vm13, %v4191_v58  ;;  %vm4353_vm13 = vcmask 9216  }
 0x7e6   :  { %v4300_v28 = vpop.f32.mrf.mxu1 }
 0x7e7   :  { %v4301_v29 = vadd.f32 %v4300_v28, %v4278_v44 }
 0x7ee   :  { %v4303_v53 = vpop.f32.mrf.mxu1 }
 0x7ef   :  { %v4304_v23 = vadd.f32 %v4303_v53, %v4281_v39 }
 0x7fe   :  { %v4323_v6 = vpop.f32.mrf.mxu3 }
 0x7ff   :  { %v4324_v46 = vadd.f32 %v4323_v6, %v4301_v29 }
 0x806   :  { %v4346_v54 = vpop.f32.mrf.mxu2  ;;  %v4326_v31 = vpop.f32.mrf.mxu3 }
 0x807   :  { %v4347_v12 = vadd.f32 %v4346_v54, %v4324_v46  ;;  %v4327_v37 = vadd.f32 %v4326_v31, %v4304_v23 }
 0x809   :  { %4352 = vst.msk [vmem:[%s6642_s7] sm:$0xff] %vm3189_vm5, %v4347_v12 }
 0x80e   :  { %v4349_v5 = vpop.f32.mrf.mxu2 }
 0x80f   :  { %v4350_v56 = vadd.f32 %v4349_v5, %v4327_v37 }
 0x811   :  { %4354 = vst.msk [vmem:[%s6642_s7 + $0x8] sm:$0x3] %vm4353_vm13, %v4350_v56 }

</bundles_post_ra>
